<compile_context>
chip_gen: v7x
topology: tpu7x:2x2x1
jax: 0.10.0
libtpu: 0.0.40
codegen_flags: <defaults>
</compile_context>

<pallas_src>
import numpy as np

import jax
import jax.numpy as jnp
from jax.experimental import pallas as pl
from jax.experimental.pallas import tpu as pltpu

_EPS = 1e-5          # BatchNorm eps (PyTorch default)
_SLOPE = 0.2         # LeakyReLU negative slope
_K = 4               # conv kernel size
_S = 2               # conv stride


# ------------------------------ Pallas kernel -------------------------------

def _bn_lrelu(y, gamma, beta):
    """Training-mode BatchNorm2d over rows + LeakyReLU(0.2), all in f32.

    Two-pass (centered) statistics to avoid E[x^2]-mean^2 cancellation.
    `y` is (rows, channels) with channels on lanes.
    """
    inv_n = 1.0 / float(y.shape[0])
    mean = jnp.sum(y, axis=0, keepdims=True) * inv_n
    d = y - mean
    var = jnp.sum(d * d, axis=0, keepdims=True) * inv_n
    z = gamma * d * jax.lax.rsqrt(var + _EPS) + beta
    return jnp.where(z >= 0, z, _SLOPE * z)


def _make_kernel(batch, oh1, ow1, oh2, ow2):
    """Build the fused Critic kernel for a fixed (static) geometry."""
    p1 = oh1 * ow1                      # per-sample block-1 spatial positions
    p2 = oh2 * ow2                      # per-sample block-2 spatial positions
    # Stride-2 over-gather length: gathered row j <-> y1 row offset 2*j from
    # `base`, and the row needed for block-2 output (i2, j2) sits at
    # j = i2*ow1 + j2 for EVERY kernel offset (ki, kj).  Always in-bounds by
    # the stride-2 / k=4 conv arithmetic.
    n_over = (oh2 - 1) * ow1 + ow2

    def kernel(p1_ref, w1_ref, g1_ref, be1_ref,
               w2_ref, g2_ref, be2_ref,
               w3m_ref, b3_ref, o_ref, y1_scr):
        # ---- Block 1: conv as one bf16 MXU matmul + BN + LeakyReLU ----------
        y1 = jnp.dot(p1_ref[...], w1_ref[...],
                     preferred_element_type=jnp.float32)       # (B*P1, C1) f32
        y1 = _bn_lrelu(y1, g1_ref[...], be1_ref[...])
        y1_scr[...] = y1           # rows ordered (n, oh1, ow1); stays on-chip

        # ---- Block 2: in-kernel im2col + ONE (B*P2, 16*C1)@(16*C1, C2) matmul
        # Per sample and kernel offset (ki, kj), a single static stride-2
        # sublane slice over-gathers every row any output position could need;
        # the 16 slices are laid side by side on lanes (16*C1 wide) and the
        # valid (oh2, ow2) rows are picked with static contiguous slices.
        rows = []
        for n in range(batch):
            slabs = []
            for ki in range(_K):
                for kj in range(_K):
                    base = n * p1 + ki * ow1 + kj
                    slabs.append(y1_scr[pl.ds(base, n_over, stride=2), :])
            over = jnp.concatenate(slabs, axis=1)               # (n_over, 16*C1)
            for i2 in range(oh2):
                rows.append(over[i2 * ow1:i2 * ow1 + ow2, :])   # (OW2, 16*C1)
        patches2 = jnp.concatenate(rows, axis=0)                # (B*P2, 16*C1)
        y2 = jnp.dot(patches2.astype(jnp.bfloat16), w2_ref[...],
                     preferred_element_type=jnp.float32)        # (B*P2, C2) f32
        y2 = _bn_lrelu(y2, g2_ref[...], be2_ref[...])

        # ---- Block 3: final conv -> 1x1 spatial = per-sample masked VPU
        # contraction with the un-tiled (P2, C2) weight slab; bias from SMEM.
        w3m = w3m_ref[...]                                      # (P2, C2)
        outs = []
        for n in range(batch):
            t = y2[n * p2:(n + 1) * p2, :] * w3m
            outs.append(jnp.sum(t, keepdims=True))              # (1, 1)
        o_ref[...] = jnp.concatenate(outs, axis=0) + b3_ref[0]

    return kernel


# ------------------------------- glue (JAX) ---------------------------------

def _full_vmem_spec(shape):
    # Whole-array block (block_shape == array dims -> exempt from (8,128)).
    return pl.BlockSpec(shape, lambda: (0,) * len(shape))


def _conv_out(n, k=_K, s=_S):
    return (n - k) // s + 1


def _extract_patches_nchw(x, kh=_K, kw=_K, stride=_S):
    """(N, C, H, W) -> (N*OH*OW, C*kh*kw) with one identity-kernel XLA conv.

    # TODO(synk): at real DCGAN sizes (64x64x3, hidden 64) move this im2col
    # into the kernel (raw NCHW image via memory_space=pl.ANY + in-kernel
    # slices) to avoid the HBM round trip of the expanded patch tensor;
    # negligible at 28x28x1.
    """
    N, C, H, W = x.shape
    K = C * kh * kw
    eye = jnp.eye(K, dtype=x.dtype).reshape(K, C, kh, kw)   # k = c*kh*kw+i*kw+j
    p = jax.lax.conv_general_dilated(
        x, eye, window_strides=(stride, stride), padding="VALID",
        dimension_numbers=("NCHW", "OIHW", "NCHW"))          # (N, K, OH, OW)
    OH, OW = p.shape[2], p.shape[3]
    return p.transpose(0, 2, 3, 1).reshape(N * OH * OW, K)


@jax.jit
def critic_forward(x, params):
    """Critic forward pass: one fused Pallas kernel for all three blocks."""
    (w1, _b1, g1, be1), (w2, _b2, g2, be2), (w3, b3) = params
    N, _, H, W = x.shape
    c1 = w1.shape[0]
    c2 = w2.shape[0]

    oh1, ow1 = _conv_out(H), _conv_out(W)
    oh2, ow2 = _conv_out(oh1), _conv_out(ow1)
    assert _conv_out(oh2) == 1 and _conv_out(ow2) == 1, \
        "fused kernel assumes the final conv produces a 1x1 spatial output"

    # Block-1 input patches: the only off-kernel data movement (one XLA op on
    # the raw image), cast to bf16 (MXU operand + halves the patch DMA).
    patches1 = _extract_patches_nchw(x).astype(jnp.bfloat16)    # (P1, Cin*16)

    # Tiny weight re-layouts (outside the kernel); conv weights in bf16.
    w1m = w1.reshape(c1, -1).T.astype(jnp.bfloat16)              # (Cin*16, C1)
    w2f = (jnp.transpose(w2, (2, 3, 1, 0))
           .reshape(_K * _K * c1, c2).astype(jnp.bfloat16))      # (16*C1, C2)
    # Final conv (1x1 output): scatter its 4x4 window onto the (oh2*ow2) grid
    # of block-2 rows.  NOT tiled by batch.
    w3k = jnp.transpose(w3, (2, 3, 1, 0)).reshape(_K * _K, c2)   # (16, C2)
    pos = np.zeros((oh2 * ow2, _K * _K), np.float32)
    for ki in range(_K):
        for kj in range(_K):
            pos[ki * ow2 + kj, ki * _K + kj] = 1.0
    w3m = jnp.asarray(pos) @ w3k                                 # (oh2*ow2, C2)

    args = (patches1, w1m, g1.reshape(1, -1), be1.reshape(1, -1),
            w2f, g2.reshape(1, -1), be2.reshape(1, -1),
            w3m, b3.reshape(-1))

    in_specs = [_full_vmem_spec(a.shape) for a in args[:-1]]
    # Final-conv bias: a single scalar -> SMEM, not a padded VMEM tile.
    in_specs.append(pl.BlockSpec(memory_space=pltpu.MemorySpace.SMEM))

    kernel = _make_kernel(N, oh1, ow1, oh2, ow2)

    # Grid-less call: total VMEM footprint is a few tens of KiB (largest
    # operand ~11 KiB), so all activations stay in vregs / one small scratch
    # and there is nothing to pipeline.
    # TODO(synk): for real DCGAN sizes add a row-tiled ("parallel", ...) grid
    # with a two-stage BN reduction (uses both v7x TensorCores, overlaps DMA)
    # and re-derive tile sizes against v7x's 64 MiB VMEM.
    return pl.pallas_call(
        kernel,
        out_shape=jax.ShapeDtypeStruct((N, 1), jnp.float32),
        in_specs=in_specs,
        out_specs=_full_vmem_spec((N, 1)),
        scratch_shapes=[pltpu.VMEM((N * oh1 * ow1, c1), jnp.float32)],
    )(*args)


# ----------------------------- synthetic params ------------------------------

def make_params(key, im_chan=1, hidden_dim=8):
    """Deterministic synthetic parameters with PyTorch Conv2d shapes."""
    def conv_init(k, c_out, c_in, ks=4):
        kw_, kb_ = jax.random.split(k)
        fan_in = c_in * ks * ks
        bound = 1.0 / jnp.sqrt(fan_in)
        w = jax.random.uniform(kw_, (c_out, c_in, ks, ks), jnp.float32, -bound, bound)
        b = jax.random.uniform(kb_, (c_out,), jnp.float32, -bound, bound)
        return w, b

    k1, k2, k3, k4, k5 = jax.random.split(key, 5)
    w1, b1 = conv_init(k1, hidden_dim, im_chan)
    w2, b2 = conv_init(k2, hidden_dim * 2, hidden_dim)
    w3, b3 = conv_init(k3, 1, hidden_dim * 2)
    g1 = 1.0 + 0.1 * jax.random.normal(k4, (hidden_dim,), jnp.float32)
    be1 = 0.1 * jax.random.normal(k4, (hidden_dim,), jnp.float32)
    g2 = 1.0 + 0.1 * jax.random.normal(k5, (hidden_dim * 2,), jnp.float32)
    be2 = 0.1 * jax.random.normal(k5, (hidden_dim * 2,), jnp.float32)
    return (w1, b1, g1, be1), (w2, b2, g2, be2), (w3, b3)


# --------------------------- pure-JAX reference -----------------------------

def critic_reference(x, params):
    (w1, b1, g1, be1), (w2, b2, g2, be2), (w3, b3) = params

    def conv(x, w, b):
        y = jax.lax.conv_general_dilated(
            x, w, window_strides=(2, 2), padding="VALID",
            dimension_numbers=("NCHW", "OIHW", "NCHW"))
        return y + b.reshape(1, -1, 1, 1)

    def bn_lrelu(y, g, be):
        mean = jnp.mean(y, axis=(0, 2, 3), keepdims=True)
        var = jnp.mean((y - mean) ** 2, axis=(0, 2, 3), keepdims=True)
        z = g.reshape(1, -1, 1, 1) * (y - mean) * jax.lax.rsqrt(var + 1e-5) \
            + be.reshape(1, -1, 1, 1)
        return jnp.where(z >= 0, z, 0.2 * z)

    y = bn_lrelu(conv(x, w1, b1), g1, be1)
    y = bn_lrelu(conv(y, w2, b2), g2, be2)
    y = conv(y, w3, b3)
    return y.reshape(y.shape[0], -1)


# ----------------------------------- main -----------------------------------

if __name__ == "__main__":
    key = jax.random.PRNGKey(0)
    k_x, k_p = jax.random.split(key)

    # MNIST-like geometry (28x28 so three k=4,s=2 convs reach 1x1 spatial),
    # small channel counts: batch=2, im_chan=1, hidden_dim=8.
    batch, im_chan, hidden_dim, hw = 2, 1, 8, 28
    x = jax.random.normal(k_x, (batch, im_chan, hw, hw), jnp.float32)
    params = make_params(k_p, im_chan=im_chan, hidden_dim=hidden_dim)

    out = jax.block_until_ready(critic_forward(x, params))
    ref = critic_reference(x, params)

    assert out.shape == (batch, 1), out.shape
    # bf16 MXU operands (f32 accumulation / BN statistics) vs. an all-f32
    # reference: allow bf16-level end-to-end error after three conv+BN stages.
    assert jnp.allclose(out, ref, atol=5e-2, rtol=5e-2), (out, ref)

    print("KERNEL_OK")
</pallas_src>

<mosaic_0001>
module attributes {stable_mosaic.version = 11 : i64} {
  func.func @kernel(%arg0: memref<338x16xbf16, #tpu.memory_space<vmem>>, %arg1: memref<16x8xbf16, #tpu.memory_space<vmem>>, %arg2: memref<1x8xf32, #tpu.memory_space<vmem>>, %arg3: memref<1x8xf32, #tpu.memory_space<vmem>>, %arg4: memref<128x16xbf16, #tpu.memory_space<vmem>>, %arg5: memref<1x16xf32, #tpu.memory_space<vmem>>, %arg6: memref<1x16xf32, #tpu.memory_space<vmem>>, %arg7: memref<25x16xf32, #tpu.memory_space<vmem>>, %arg8: memref<1xf32, #tpu.memory_space<smem>>, %arg9: memref<2x1xf32, #tpu.memory_space<vmem>>, %arg10: memref<338x8xf32, #tpu.memory_space<vmem>>) attributes {dimension_semantics = [], scalar_prefetch = 0 : i64, scratch_operands = 1 : i64, tpu.core_type = #tpu.core_type<tc>} {
    %c0 = arith.constant 0 : index
    %c0_0 = arith.constant 0 : index
    %0 = vector.load %arg0[%c0, %c0_0] : memref<338x16xbf16, #tpu.memory_space<vmem>>, vector<338x16xbf16>
    %c0_1 = arith.constant 0 : index
    %c0_2 = arith.constant 0 : index
    %1 = vector.load %arg1[%c0_1, %c0_2] : memref<16x8xbf16, #tpu.memory_space<vmem>>, vector<16x8xbf16>
    %cst = arith.constant dense<0.000000e+00> : vector<338x8xf32>
    %2 = tpu.matmul %0, %1, %cst {dimension_numbers = #tpu.dot_dimension_numbers<[1], [0], [0], [1], [0, 0, 1, 1], [], []>} : vector<338x16xbf16>, vector<16x8xbf16>, vector<338x8xf32> -> vector<338x8xf32>
    %c0_3 = arith.constant 0 : index
    %c0_4 = arith.constant 0 : index
    %3 = vector.load %arg2[%c0_3, %c0_4] : memref<1x8xf32, #tpu.memory_space<vmem>>, vector<1x8xf32>
    %c0_5 = arith.constant 0 : index
    %c0_6 = arith.constant 0 : index
    %4 = vector.load %arg3[%c0_5, %c0_6] : memref<1x8xf32, #tpu.memory_space<vmem>>, vector<1x8xf32>
    %cst_7 = arith.constant dense<0.000000e+00> : vector<8xf32>
    %5 = vector.multi_reduction <add>, %2, %cst_7 [0] : vector<338x8xf32> to vector<8xf32>
    %6 = vector.shape_cast %5 : vector<8xf32> to vector<1x8xf32>
    %cst_8 = arith.constant 2.958580e-03 : f32
    %7 = vector.broadcast %cst_8 : f32 to vector<1x8xf32>
    %8 = arith.mulf %6, %7 : vector<1x8xf32>
    %9 = vector.broadcast %8 : vector<1x8xf32> to vector<338x8xf32>
    %10 = arith.subf %2, %9 : vector<338x8xf32>
    %11 = arith.mulf %10, %10 : vector<338x8xf32>
    %cst_9 = arith.constant dense<0.000000e+00> : vector<8xf32>
    %12 = vector.multi_reduction <add>, %11, %cst_9 [0] : vector<338x8xf32> to vector<8xf32>
    %13 = vector.shape_cast %12 : vector<8xf32> to vector<1x8xf32>
    %cst_10 = arith.constant 2.958580e-03 : f32
    %14 = vector.broadcast %cst_10 : f32 to vector<1x8xf32>
    %15 = arith.mulf %13, %14 : vector<1x8xf32>
    %16 = vector.broadcast %3 : vector<1x8xf32> to vector<338x8xf32>
    %17 = arith.mulf %16, %10 : vector<338x8xf32>
    %cst_11 = arith.constant 9.99999974E-6 : f32
    %18 = vector.broadcast %cst_11 : f32 to vector<1x8xf32>
    %19 = arith.addf %15, %18 : vector<1x8xf32>
    %20 = math.rsqrt %19 : vector<1x8xf32>
    %21 = vector.broadcast %20 : vector<1x8xf32> to vector<338x8xf32>
    %22 = arith.mulf %17, %21 : vector<338x8xf32>
    %23 = vector.broadcast %4 : vector<1x8xf32> to vector<338x8xf32>
    %24 = arith.addf %22, %23 : vector<338x8xf32>
    %cst_12 = arith.constant 0.000000e+00 : f32
    %25 = vector.broadcast %cst_12 : f32 to vector<338x8xf32>
    %26 = arith.cmpf oge, %24, %25 : vector<338x8xf32>
    %cst_13 = arith.constant 2.000000e-01 : f32
    %27 = vector.broadcast %cst_13 : f32 to vector<338x8xf32>
    %28 = arith.mulf %27, %24 : vector<338x8xf32>
    %29 = arith.select %26, %24, %28 : vector<338x8xi1>, vector<338x8xf32>
    %c0_14 = arith.constant 0 : index
    %c0_15 = arith.constant 0 : index
    %30 = vector.load %arg10[%c0_14, %c0_15] : memref<338x8xf32, #tpu.memory_space<vmem>>, vector<338x8xf32>
    tpu.vector_store %arg10[%c0_14, %c0_15], %29 {strides = array<i32>} : memref<338x8xf32, #tpu.memory_space<vmem>>, vector<338x8xf32>,
    %c0_16 = arith.constant 0 : index
    %c0_17 = arith.constant 0 : index
    %31 = tpu.strided_load %arg10[%c0_16, %c0_17] {strides = array<i32: 2, 1>} : memref<338x8xf32, #tpu.memory_space<vmem>>, vector<57x8xf32>
    %c1 = arith.constant 1 : index
    %c0_18 = arith.constant 0 : index
    %32 = tpu.strided_load %arg10[%c1, %c0_18] {strides = array<i32: 2, 1>} : memref<338x8xf32, #tpu.memory_space<vmem>>, vector<57x8xf32>
    %c2 = arith.constant 2 : index
    %c0_19 = arith.constant 0 : index
    %33 = tpu.strided_load %arg10[%c2, %c0_19] {strides = array<i32: 2, 1>} : memref<338x8xf32, #tpu.memory_space<vmem>>, vector<57x8xf32>
    %c3 = arith.constant 3 : index
    %c0_20 = arith.constant 0 : index
    %34 = tpu.strided_load %arg10[%c3, %c0_20] {strides = array<i32: 2, 1>} : memref<338x8xf32, #tpu.memory_space<vmem>>, vector<57x8xf32>
    %c13 = arith.constant 13 : index
    %c0_21 = arith.constant 0 : index
    %35 = tpu.strided_load %arg10[%c13, %c0_21] {strides = array<i32: 2, 1>} : memref<338x8xf32, #tpu.memory_space<vmem>>, vector<57x8xf32>
    %c14 = arith.constant 14 : index
    %c0_22 = arith.constant 0 : index
    %36 = tpu.strided_load %arg10[%c14, %c0_22] {strides = array<i32: 2, 1>} : memref<338x8xf32, #tpu.memory_space<vmem>>, vector<57x8xf32>
    %c15 = arith.constant 15 : index
    %c0_23 = arith.constant 0 : index
    %37 = tpu.strided_load %arg10[%c15, %c0_23] {strides = array<i32: 2, 1>} : memref<338x8xf32, #tpu.memory_space<vmem>>, vector<57x8xf32>
    %c16 = arith.constant 16 : index
    %c0_24 = arith.constant 0 : index
    %38 = tpu.strided_load %arg10[%c16, %c0_24] {strides = array<i32: 2, 1>} : memref<338x8xf32, #tpu.memory_space<vmem>>, vector<57x8xf32>
    %c26 = arith.constant 26 : index
    %c0_25 = arith.constant 0 : index
    %39 = tpu.strided_load %arg10[%c26, %c0_25] {strides = array<i32: 2, 1>} : memref<338x8xf32, #tpu.memory_space<vmem>>, vector<57x8xf32>
    %c27 = arith.constant 27 : index
    %c0_26 = arith.constant 0 : index
    %40 = tpu.strided_load %arg10[%c27, %c0_26] {strides = array<i32: 2, 1>} : memref<338x8xf32, #tpu.memory_space<vmem>>, vector<57x8xf32>
    %c28 = arith.constant 28 : index
    %c0_27 = arith.constant 0 : index
    %41 = tpu.strided_load %arg10[%c28, %c0_27] {strides = array<i32: 2, 1>} : memref<338x8xf32, #tpu.memory_space<vmem>>, vector<57x8xf32>
    %c29 = arith.constant 29 : index
    %c0_28 = arith.constant 0 : index
    %42 = tpu.strided_load %arg10[%c29, %c0_28] {strides = array<i32: 2, 1>} : memref<338x8xf32, #tpu.memory_space<vmem>>, vector<57x8xf32>
    %c39 = arith.constant 39 : index
    %c0_29 = arith.constant 0 : index
    %43 = tpu.strided_load %arg10[%c39, %c0_29] {strides = array<i32: 2, 1>} : memref<338x8xf32, #tpu.memory_space<vmem>>, vector<57x8xf32>
    %c40 = arith.constant 40 : index
    %c0_30 = arith.constant 0 : index
    %44 = tpu.strided_load %arg10[%c40, %c0_30] {strides = array<i32: 2, 1>} : memref<338x8xf32, #tpu.memory_space<vmem>>, vector<57x8xf32>
    %c41 = arith.constant 41 : index
    %c0_31 = arith.constant 0 : index
    %45 = tpu.strided_load %arg10[%c41, %c0_31] {strides = array<i32: 2, 1>} : memref<338x8xf32, #tpu.memory_space<vmem>>, vector<57x8xf32>
    %c42 = arith.constant 42 : index
    %c0_32 = arith.constant 0 : index
    %46 = tpu.strided_load %arg10[%c42, %c0_32] {strides = array<i32: 2, 1>} : memref<338x8xf32, #tpu.memory_space<vmem>>, vector<57x8xf32>
    %47 = tpu.concatenate %31, %32, %33, %34, %35, %36, %37, %38, %39, %40, %41, %42, %43, %44, %45, %46 in 1 : vector<57x8xf32>, vector<57x8xf32>, vector<57x8xf32>, vector<57x8xf32>, vector<57x8xf32>, vector<57x8xf32>, vector<57x8xf32>, vector<57x8xf32>, vector<57x8xf32>, vector<57x8xf32>, vector<57x8xf32>, vector<57x8xf32>, vector<57x8xf32>, vector<57x8xf32>, vector<57x8xf32>, vector<57x8xf32> -> vector<57x128xf32>
    %48 = vector.extract_strided_slice %47 {offsets = [0, 0], sizes = [5, 128], strides = [1, 1]} : vector<57x128xf32> to vector<5x128xf32>
    %49 = vector.extract_strided_slice %47 {offsets = [13, 0], sizes = [5, 128], strides = [1, 1]} : vector<57x128xf32> to vector<5x128xf32>
    %50 = vector.extract_strided_slice %47 {offsets = [26, 0], sizes = [5, 128], strides = [1, 1]} : vector<57x128xf32> to vector<5x128xf32>
    %51 = vector.extract_strided_slice %47 {offsets = [39, 0], sizes = [5, 128], strides = [1, 1]} : vector<57x128xf32> to vector<5x128xf32>
    %52 = vector.extract_strided_slice %47 {offsets = [52, 0], sizes = [5, 128], strides = [1, 1]} : vector<57x128xf32> to vector<5x128xf32>
    %c169 = arith.constant 169 : index
    %c0_33 = arith.constant 0 : index
    %53 = tpu.strided_load %arg10[%c169, %c0_33] {strides = array<i32: 2, 1>} : memref<338x8xf32, #tpu.memory_space<vmem>>, vector<57x8xf32>
    %c170 = arith.constant 170 : index
    %c0_34 = arith.constant 0 : index
    %54 = tpu.strided_load %arg10[%c170, %c0_34] {strides = array<i32: 2, 1>} : memref<338x8xf32, #tpu.memory_space<vmem>>, vector<57x8xf32>
    %c171 = arith.constant 171 : index
    %c0_35 = arith.constant 0 : index
    %55 = tpu.strided_load %arg10[%c171, %c0_35] {strides = array<i32: 2, 1>} : memref<338x8xf32, #tpu.memory_space<vmem>>, vector<57x8xf32>
    %c172 = arith.constant 172 : index
    %c0_36 = arith.constant 0 : index
    %56 = tpu.strided_load %arg10[%c172, %c0_36] {strides = array<i32: 2, 1>} : memref<338x8xf32, #tpu.memory_space<vmem>>, vector<57x8xf32>
    %c182 = arith.constant 182 : index
    %c0_37 = arith.constant 0 : index
    %57 = tpu.strided_load %arg10[%c182, %c0_37] {strides = array<i32: 2, 1>} : memref<338x8xf32, #tpu.memory_space<vmem>>, vector<57x8xf32>
    %c183 = arith.constant 183 : index
    %c0_38 = arith.constant 0 : index
    %58 = tpu.strided_load %arg10[%c183, %c0_38] {strides = array<i32: 2, 1>} : memref<338x8xf32, #tpu.memory_space<vmem>>, vector<57x8xf32>
    %c184 = arith.constant 184 : index
    %c0_39 = arith.constant 0 : index
    %59 = tpu.strided_load %arg10[%c184, %c0_39] {strides = array<i32: 2, 1>} : memref<338x8xf32, #tpu.memory_space<vmem>>, vector<57x8xf32>
    %c185 = arith.constant 185 : index
    %c0_40 = arith.constant 0 : index
    %60 = tpu.strided_load %arg10[%c185, %c0_40] {strides = array<i32: 2, 1>} : memref<338x8xf32, #tpu.memory_space<vmem>>, vector<57x8xf32>
    %c195 = arith.constant 195 : index
    %c0_41 = arith.constant 0 : index
    %61 = tpu.strided_load %arg10[%c195, %c0_41] {strides = array<i32: 2, 1>} : memref<338x8xf32, #tpu.memory_space<vmem>>, vector<57x8xf32>
    %c196 = arith.constant 196 : index
    %c0_42 = arith.constant 0 : index
    %62 = tpu.strided_load %arg10[%c196, %c0_42] {strides = array<i32: 2, 1>} : memref<338x8xf32, #tpu.memory_space<vmem>>, vector<57x8xf32>
    %c197 = arith.constant 197 : index
    %c0_43 = arith.constant 0 : index
    %63 = tpu.strided_load %arg10[%c197, %c0_43] {strides = array<i32: 2, 1>} : memref<338x8xf32, #tpu.memory_space<vmem>>, vector<57x8xf32>
    %c198 = arith.constant 198 : index
    %c0_44 = arith.constant 0 : index
    %64 = tpu.strided_load %arg10[%c198, %c0_44] {strides = array<i32: 2, 1>} : memref<338x8xf32, #tpu.memory_space<vmem>>, vector<57x8xf32>
    %c208 = arith.constant 208 : index
    %c0_45 = arith.constant 0 : index
    %65 = tpu.strided_load %arg10[%c208, %c0_45] {strides = array<i32: 2, 1>} : memref<338x8xf32, #tpu.memory_space<vmem>>, vector<57x8xf32>
    %c209 = arith.constant 209 : index
    %c0_46 = arith.constant 0 : index
    %66 = tpu.strided_load %arg10[%c209, %c0_46] {strides = array<i32: 2, 1>} : memref<338x8xf32, #tpu.memory_space<vmem>>, vector<57x8xf32>
    %c210 = arith.constant 210 : index
    %c0_47 = arith.constant 0 : index
    %67 = tpu.strided_load %arg10[%c210, %c0_47] {strides = array<i32: 2, 1>} : memref<338x8xf32, #tpu.memory_space<vmem>>, vector<57x8xf32>
    %c211 = arith.constant 211 : index
    %c0_48 = arith.constant 0 : index
    %68 = tpu.strided_load %arg10[%c211, %c0_48] {strides = array<i32: 2, 1>} : memref<338x8xf32, #tpu.memory_space<vmem>>, vector<57x8xf32>
    %69 = tpu.concatenate %53, %54, %55, %56, %57, %58, %59, %60, %61, %62, %63, %64, %65, %66, %67, %68 in 1 : vector<57x8xf32>, vector<57x8xf32>, vector<57x8xf32>, vector<57x8xf32>, vector<57x8xf32>, vector<57x8xf32>, vector<57x8xf32>, vector<57x8xf32>, vector<57x8xf32>, vector<57x8xf32>, vector<57x8xf32>, vector<57x8xf32>, vector<57x8xf32>, vector<57x8xf32>, vector<57x8xf32>, vector<57x8xf32> -> vector<57x128xf32>
    %70 = vector.extract_strided_slice %69 {offsets = [0, 0], sizes = [5, 128], strides = [1, 1]} : vector<57x128xf32> to vector<5x128xf32>
    %71 = vector.extract_strided_slice %69 {offsets = [13, 0], sizes = [5, 128], strides = [1, 1]} : vector<57x128xf32> to vector<5x128xf32>
    %72 = vector.extract_strided_slice %69 {offsets = [26, 0], sizes = [5, 128], strides = [1, 1]} : vector<57x128xf32> to vector<5x128xf32>
    %73 = vector.extract_strided_slice %69 {offsets = [39, 0], sizes = [5, 128], strides = [1, 1]} : vector<57x128xf32> to vector<5x128xf32>
    %74 = vector.extract_strided_slice %69 {offsets = [52, 0], sizes = [5, 128], strides = [1, 1]} : vector<57x128xf32> to vector<5x128xf32>
    %75 = tpu.concatenate %48, %49, %50, %51, %52, %70, %71, %72, %73, %74 in 0 : vector<5x128xf32>, vector<5x128xf32>, vector<5x128xf32>, vector<5x128xf32>, vector<5x128xf32>, vector<5x128xf32>, vector<5x128xf32>, vector<5x128xf32>, vector<5x128xf32>, vector<5x128xf32> -> vector<50x128xf32>
    %76 = arith.truncf %75 : vector<50x128xf32> to vector<50x128xbf16>
    %c0_49 = arith.constant 0 : index
    %c0_50 = arith.constant 0 : index
    %77 = vector.load %arg4[%c0_49, %c0_50] : memref<128x16xbf16, #tpu.memory_space<vmem>>, vector<128x16xbf16>
    %cst_51 = arith.constant dense<0.000000e+00> : vector<50x16xf32>
    %78 = tpu.matmul %76, %77, %cst_51 {dimension_numbers = #tpu.dot_dimension_numbers<[1], [0], [0], [1], [0, 0, 1, 1], [], []>} : vector<50x128xbf16>, vector<128x16xbf16>, vector<50x16xf32> -> vector<50x16xf32>
    %c0_52 = arith.constant 0 : index
    %c0_53 = arith.constant 0 : index
    %79 = vector.load %arg5[%c0_52, %c0_53] : memref<1x16xf32, #tpu.memory_space<vmem>>, vector<1x16xf32>
    %c0_54 = arith.constant 0 : index
    %c0_55 = arith.constant 0 : index
    %80 = vector.load %arg6[%c0_54, %c0_55] : memref<1x16xf32, #tpu.memory_space<vmem>>, vector<1x16xf32>
    %cst_56 = arith.constant dense<0.000000e+00> : vector<16xf32>
    %81 = vector.multi_reduction <add>, %78, %cst_56 [0] : vector<50x16xf32> to vector<16xf32>
    %82 = vector.shape_cast %81 : vector<16xf32> to vector<1x16xf32>
    %cst_57 = arith.constant 2.000000e-02 : f32
    %83 = vector.broadcast %cst_57 : f32 to vector<1x16xf32>
    %84 = arith.mulf %82, %83 : vector<1x16xf32>
    %85 = vector.broadcast %84 : vector<1x16xf32> to vector<50x16xf32>
    %86 = arith.subf %78, %85 : vector<50x16xf32>
    %87 = arith.mulf %86, %86 : vector<50x16xf32>
    %cst_58 = arith.constant dense<0.000000e+00> : vector<16xf32>
    %88 = vector.multi_reduction <add>, %87, %cst_58 [0] : vector<50x16xf32> to vector<16xf32>
    %89 = vector.shape_cast %88 : vector<16xf32> to vector<1x16xf32>
    %cst_59 = arith.constant 2.000000e-02 : f32
    %90 = vector.broadcast %cst_59 : f32 to vector<1x16xf32>
    %91 = arith.mulf %89, %90 : vector<1x16xf32>
    %92 = vector.broadcast %79 : vector<1x16xf32> to vector<50x16xf32>
    %93 = arith.mulf %92, %86 : vector<50x16xf32>
    %cst_60 = arith.constant 9.99999974E-6 : f32
    %94 = vector.broadcast %cst_60 : f32 to vector<1x16xf32>
    %95 = arith.addf %91, %94 : vector<1x16xf32>
    %96 = math.rsqrt %95 : vector<1x16xf32>
    %97 = vector.broadcast %96 : vector<1x16xf32> to vector<50x16xf32>
    %98 = arith.mulf %93, %97 : vector<50x16xf32>
    %99 = vector.broadcast %80 : vector<1x16xf32> to vector<50x16xf32>
    %100 = arith.addf %98, %99 : vector<50x16xf32>
    %cst_61 = arith.constant 0.000000e+00 : f32
    %101 = vector.broadcast %cst_61 : f32 to vector<50x16xf32>
    %102 = arith.cmpf oge, %100, %101 : vector<50x16xf32>
    %cst_62 = arith.constant 2.000000e-01 : f32
    %103 = vector.broadcast %cst_62 : f32 to vector<50x16xf32>
    %104 = arith.mulf %103, %100 : vector<50x16xf32>
    %105 = arith.select %102, %100, %104 : vector<50x16xi1>, vector<50x16xf32>
    %c0_63 = arith.constant 0 : index
    %c0_64 = arith.constant 0 : index
    %106 = vector.load %arg7[%c0_63, %c0_64] : memref<25x16xf32, #tpu.memory_space<vmem>>, vector<25x16xf32>
    %107 = vector.extract_strided_slice %105 {offsets = [0, 0], sizes = [25, 16], strides = [1, 1]} : vector<50x16xf32> to vector<25x16xf32>
    %108 = arith.mulf %107, %106 : vector<25x16xf32>
    %109 = vector.shape_cast %108 : vector<25x16xf32> to vector<1x25x16xf32>
    %cst_65 = arith.constant dense<0.000000e+00> : vector<1xf32>
    %110 = vector.multi_reduction <add>, %109, %cst_65 [1, 2] : vector<1x25x16xf32> to vector<1xf32>
    %111 = vector.shape_cast %110 : vector<1xf32> to vector<1x1x1xf32>
    %112 = vector.extract %111[0, 0, 0] : f32 from vector<1x1x1xf32>
    %113 = vector.broadcast %112 : f32 to vector<1x1xf32>
    %114 = vector.extract_strided_slice %105 {offsets = [25, 0], sizes = [25, 16], strides = [1, 1]} : vector<50x16xf32> to vector<25x16xf32>
    %115 = arith.mulf %114, %106 : vector<25x16xf32>
    %116 = vector.shape_cast %115 : vector<25x16xf32> to vector<1x25x16xf32>
    %cst_66 = arith.constant dense<0.000000e+00> : vector<1xf32>
    %117 = vector.multi_reduction <add>, %116, %cst_66 [1, 2] : vector<1x25x16xf32> to vector<1xf32>
    %118 = vector.shape_cast %117 : vector<1xf32> to vector<1x1x1xf32>
    %119 = vector.extract %118[0, 0, 0] : f32 from vector<1x1x1xf32>
    %120 = vector.broadcast %119 : f32 to vector<1x1xf32>
    %121 = tpu.concatenate %113, %120 in 0 : vector<1x1xf32>, vector<1x1xf32> -> vector<2x1xf32>
    %c0_67 = arith.constant 0 : index
    %122 = memref.load %arg8[%c0_67] : memref<1xf32, #tpu.memory_space<smem>>
    %123 = vector.broadcast %122 : f32 to vector<2x1xf32>
    %124 = arith.addf %121, %123 : vector<2x1xf32>
    %c0_68 = arith.constant 0 : index
    %c0_69 = arith.constant 0 : index
    %125 = vector.load %arg9[%c0_68, %c0_69] : memref<2x1xf32, #tpu.memory_space<vmem>>, vector<2x1xf32>
    tpu.vector_store %arg9[%c0_68, %c0_69], %124 {strides = array<i32>} : memref<2x1xf32, #tpu.memory_space<vmem>>, vector<2x1xf32>,
    return
  }
}

</mosaic_0001>

<bundles_post_ra>
// kernel: critic_forward.1
= control target key start
LH: loop header
LB: loop body
LE: loop exit
PB: predicated region body
PF: predicated region fallthrough
CT: control target
= control target key end

     0   :  { %vm6102_vm0 = vcmask 130048   ;;  %vm470_vm1 = vcmask 64512   ;;  %vm554_vm2 = vcmask 58368   ;;  %s3871_s13 = smov 8   ;;  %s3872_s14 = smov 24   ;;  %s6092_s1 = inlined_call_operand.vmem [shape: bf16[16,8], index: 1, kind: input, shape index: {}]   ;;  %s6093_s0 = inlined_call_operand.vmem [shape: bf16[338,16], index: 0, kind: input, shape index: {}]   ;;  %s6094_s2 = inlined_call_operand.vmem [shape: f32[1,8], index: 2, kind: input, shape index: {}]   ;;  %s6095_s3 = inlined_call_operand.vmem [shape: f32[1,8], index: 3, kind: input, shape index: {}]   ;;  %s6096_s4 = inlined_call_operand.vmem [shape: bf16[128,16], index: 4, kind: input, shape index: {}]   ;;  %s6097_s7 = inlined_call_operand.vmem [shape: f32[25,16], index: 7, kind: input, shape index: {}]   ;;  %s6098_s5 = inlined_call_operand.vmem [shape: f32[1,16], index: 5, kind: input, shape index: {}]   ;;  %s6099_s6 = inlined_call_operand.vmem [shape: f32[1,16], index: 6, kind: input, shape index: {}]   ;;  %s6100_s8 = inlined_call_operand.<no memory space> [shape: f32[1], index: 8, kind: input, shape index: {}]   ;;  %s6101_s9 = inlined_call_operand.vmem [shape: f32[2,1], index: 9, kind: output, shape index: {}]  }
   0x1   :  { %v3835_v0 = vld [vmem:[%s6092_s1] sm:$0xff]   ;;  %v3837_v2 = vld [vmem:[%s6093_s0 + $0x8] sm:$0xff]   ;;  %v3838_v3 = vld [vmem:[%s6093_s0 + $0x10] sm:$0xff]   ;;  %s3873_s15 = smov 32   ;;  %s3874_s16 = smov 40  }
   0x2   :  { %v3836_v1 = vld [vmem:[%s6093_s0] sm:$0xff]   ;;  %3144 = vmatprep.subr.bf16.mxu0 %v3835_v0  ;;  %3214 = vmatprep.subr.bf16.mxu1 %v3835_v0  ;;  %v3839_v4 = vld [vmem:[%s6093_s0 + $0x18] sm:$0xff]   ;;  %v3850_v6 = vld [vmem:[%s6093_s0 + $0x70] sm:$0xff]   ;;  %s3875_s1 = smov 48   ;;  %s3876_s17 = smov 56  }
   0x3   :  { %3145 = vmatpush3.bf16.msra.mxu0 %v3835_v0  ;;  %3146 = vmatprep.mubr.msk.bf16.mxu0 %vm6102_vm0, %v3836_v1  ;;  %v3840_v5 = vld [vmem:[%s6093_s0 + $0x20] sm:$0xff]   ;;  %v3851_v7 = vld [vmem:[%s6093_s0 + $0x78] sm:$0xff]   ;;  %v3841_v9 = vld [vmem:[%s6093_s0 + $0x28] sm:$0xff]   ;;  %s3877_s18 = smov 64   ;;  %s3878_s19 = smov 72  }
   0x4   :  { %3215 = vmatpush3.bf16.msra.mxu1 %v3835_v0  ;;  %3174 = vmatprep.mubr.msk.bf16.mxu1 %vm6102_vm0, %v3850_v6  ;;  %v3852_v8 = vld [vmem:[%s6093_s0 + $0x80] sm:$0xff]   ;;  %v3842_v10 = vld [vmem:[%s6093_s0 + $0x30] sm:$0xff]   ;;  %v3853_v11 = vld [vmem:[%s6093_s0 + $0x88] sm:$0xff]   ;;  %s3879_s20 = smov 80   ;;  %s3880_s21 = smov 88  }
   0x5   :  { %v3854_v12 = vld [vmem:[%s6093_s0 + $0x90] sm:$0xff]   ;;  %v3843_v13 = vld [vmem:[%s6093_s0 + $0x38] sm:$0xff]   ;;  %v3844_v14 = vld [vmem:[%s6093_s0 + $0x40] sm:$0xff]   ;;  %s3881_s22 = smov 96   ;;  %s3882_s23 = smov 104  }
   0x6   :  { %3147 = vmatmul.mubr.msk.bf16.vlgmr.msra.gmra.mrb[0].mxu0 %vm6102_vm0, %v3837_v2  ;;  %v3855_v15 = vld [vmem:[%s6093_s0 + $0x98] sm:$0xff]   ;;  %v3856_v16 = vld [vmem:[%s6093_s0 + $0xa0] sm:$0xff]   ;;  %v3845_v17 = vld [vmem:[%s6093_s0 + $0x48] sm:$0xff]   ;;  %s3883_s24 = smov 112   ;;  %s3884_s10 = smov 120  }
   0x7   :  { %3150 = vmatprep.mubr.msk.bf16.mxu0 %vm6102_vm0, %v3838_v3  ;;  %3175 = vmatmul.mubr.msk.bf16.vlgmr.msra.gmra.mrb[0].mxu1 %vm6102_vm0, %v3851_v7  ;;  %v3846_v18 = vld [vmem:[%s6093_s0 + $0x50] sm:$0xff]   ;;  %v3857_v19 = vld [vmem:[%s6093_s0 + $0xa8] ss:$0 sps:$4 sm:$0x11]   ;;  %v3847_v20 = vld [vmem:[%s6093_s0 + $0x58] sm:$0xff]  }
   0x8   :  { %3178 = vmatprep.mubr.msk.bf16.mxu1 %vm6102_vm0, %v3852_v8  ;;  %v3848_v21 = vld [vmem:[%s6093_s0 + $0x60] sm:$0xff]   ;;  %v3849_v22 = vld [vmem:[%s6093_s0 + $0x68] sm:$0xff]  }
   0xe   :  { %3151 = vmatmul.mubr.msk.bf16.gmra.mrb[4].mxu0 %vm6102_vm0, %v3839_v4 }
   0xf   :  { %3154 = vmatprep.mubr.msk.bf16.mxu0 %vm6102_vm0, %v3840_v5  ;;  %3179 = vmatmul.mubr.msk.bf16.gmra.mrb[4].mxu1 %vm6102_vm0, %v3853_v11 }
  0x10   :  { %3182 = vmatprep.mubr.msk.bf16.mxu1 %vm6102_vm0, %v3854_v12 }
  0x16   :  { %3155 = vmatmul.mubr.msk.bf16.gmra.mrb[8].mxu0 %vm6102_vm0, %v3841_v9 }
  0x17   :  { %3158 = vmatprep.mubr.msk.bf16.mxu0 %vm6102_vm0, %v3842_v10  ;;  %3183 = vmatmul.mubr.msk.bf16.gmra.mrb[8].mxu1 %vm6102_vm0, %v3855_v15 }
  0x18   :  { %3186 = vmatprep.mubr.msk.bf16.mxu1 %vm6102_vm0, %v3856_v16 }
  0x1e   :  { %3159 = vmatmul.mubr.msk.bf16.gmra.mrb[12].mxu0 %vm6102_vm0, %v3843_v13 }
  0x1f   :  { %3162 = vmatprep.mubr.msk.bf16.mxu0 %vm6102_vm0, %v3844_v14  ;;  %3187 = vmatmul.mubr.msk.bf16.gmra.mrb[12].mxu1 %vm6102_vm0, %v3857_v19 }
  0x26   :  { %3163 = vmatmul.mubr.msk.bf16.gmra.mrb[16].mxu0 %vm6102_vm0, %v3845_v17 }
  0x27   :  { %3166 = vmatprep.mubr.msk.bf16.mxu0 %vm6102_vm0, %v3846_v18 }
  0x2e   :  { %3167 = vmatmul.mubr.msk.bf16.gmra.mrb[20].mxu0 %vm6102_vm0, %v3847_v20 }
  0x2f   :  { %3170 = vmatprep.mubr.msk.bf16.mxu0 %vm6102_vm0, %v3848_v21 }
  0x36   :  { %3171 = vmatmul.mubr.msk.bf16.gmra.mrb[24].mxu0 %vm6102_vm0, %v3849_v22 }
  0xd9   :  { %v4026_v23 = vpop.f32.mrb[0].mxu0 }
  0xda   :  { %v4028_v24 = vpop.f32.mrb[1].mxu0  ;;  %v474_v30 = vsel %vm470_vm1, %v4026_v23, 0.0  ;;  %v4054_v41 = vpop.f32.mrb[0].mxu1 }
  0xdb   :  { %v4030_v25 = vpop.f32.mrb[2].mxu0  ;;  %v471_v27 = vsel %vm470_vm1, %v4028_v24, 0.0  ;;  %v4056_v43 = vpop.f32.mrb[1].mxu1 }
  0xdc   :  { %v4032_v26 = vpop.f32.mrb[3].mxu0  ;;  %v476_v32 = vsel %vm470_vm1, %v4030_v25, 0.0  ;;  %v4060_v45 = vpop.f32.mrb[2].mxu1 }
  0xdd   :  { %v472_v28 = vsel %vm470_vm1, %v4032_v26, 0.0  ;;  %v4062_v47 = vpop.f32.mrb[3].mxu1 }
  0xde   :  { %v473_v29 = vadd.f32 %v472_v28, %v471_v27 }
  0xe0   :  { %v475_v31 = vadd.f32 %v474_v30, %v473_v29 }
  0xe1   :  { %v4042_v33 = vpop.f32.mrb[4].mxu0 }
  0xe2   :  { %v4044_v34 = vpop.f32.mrb[5].mxu0  ;;  %v477_v35 = vadd.f32 %v476_v32, %v475_v31  ;;  %v482_v44 = vsel %vm470_vm1, %v4042_v33, 0.0  ;;  %v4078_v57 = vpop.f32.mrb[4].mxu1 }
  0xe3   :  { %v478_v36 = vsel %vm470_vm1, %v4044_v34, 0.0  ;;  %v4048_v37 = vpop.f32.mrb[6].mxu0  ;;  %v4080_v59 = vpop.f32.mrb[5].mxu1 }
  0xe4   :  { %v479_v38 = vadd.f32 %v478_v36, %v477_v35  ;;  %v4050_v39 = vpop.f32.mrb[7].mxu0  ;;  %v484_v48 = vsel %vm470_vm1, %v4048_v37, 0.0  ;;  %v4084_v61 = vpop.f32.mrb[6].mxu1 }
  0xe5   :  { %v480_v40 = vsel %vm470_vm1, %v4050_v39, 0.0  ;;  %v4086_v63 = vpop.f32.mrb[7].mxu1 }
  0xe6   :  { %v481_v42 = vadd.f32 %v480_v40, %v479_v38 }
  0xe8   :  { %v483_v46 = vadd.f32 %v482_v44, %v481_v42 }
  0xe9   :  { %v4066_v49 = vpop.f32.mrb[8].mxu0 }
  0xea   :  { %v4068_v50 = vpop.f32.mrb[9].mxu0  ;;  %v485_v51 = vadd.f32 %v484_v48, %v483_v46  ;;  %v490_v60 = vsel %vm470_vm1, %v4066_v49, 0.0  ;;  %v4102_v9 = vpop.f32.mrb[8].mxu1 }
  0xeb   :  { %v486_v52 = vsel %vm470_vm1, %v4068_v50, 0.0  ;;  %v4072_v53 = vpop.f32.mrb[10].mxu0  ;;  %v4104_v11 = vpop.f32.mrb[9].mxu1 }
  0xec   :  { %v487_v54 = vadd.f32 %v486_v52, %v485_v51  ;;  %v4074_v55 = vpop.f32.mrb[11].mxu0  ;;  %v492_v0 = vsel %vm470_vm1, %v4072_v53, 0.0  ;;  %v4108_v13 = vpop.f32.mrb[10].mxu1 }
  0xed   :  { %v488_v56 = vsel %vm470_vm1, %v4074_v55, 0.0  ;;  %v4110_v15 = vpop.f32.mrb[11].mxu1 }
  0xee   :  { %v489_v58 = vadd.f32 %v488_v56, %v487_v54 }
  0xf0   :  { %v491_v62 = vadd.f32 %v490_v60, %v489_v58 }
  0xf1   :  { %v4090_v1 = vpop.f32.mrb[12].mxu0 }
  0xf2   :  { %v4092_v2 = vpop.f32.mrb[13].mxu0  ;;  %v493_v3 = vadd.f32 %v492_v0, %v491_v62  ;;  %v498_v12 = vsel %vm470_vm1, %v4090_v1, 0.0  ;;  %v4126_v29 = vpop.f32.mrb[12].mxu1 }
  0xf3   :  { %v494_v4 = vsel %vm470_vm1, %v4092_v2, 0.0  ;;  %v4096_v5 = vpop.f32.mrb[14].mxu0  ;;  %v4128_v31 = vpop.f32.mrb[13].mxu1 }
  0xf4   :  { %v495_v6 = vadd.f32 %v494_v4, %v493_v3  ;;  %v4098_v7 = vpop.f32.mrb[15].mxu0  ;;  %v500_v16 = vsel %vm470_vm1, %v4096_v5, 0.0  ;;  %v3189_v35 = vpop.f32.mrb[14].mxu1 }
  0xf5   :  { %v496_v8 = vsel %vm470_vm1, %v4098_v7, 0.0  ;;  %v4132_v38 = vpop.f32.mrb[15].mxu1 }
  0xf6   :  { %v497_v10 = vadd.f32 %v496_v8, %v495_v6 }
  0xf8   :  { %v499_v14 = vadd.f32 %v498_v12, %v497_v10 }
  0xf9   :  { %v4114_v17 = vpop.f32.mrb[16].mxu0 }
  0xfa   :  { %v4116_v18 = vpop.f32.mrb[17].mxu0  ;;  %v501_v19 = vadd.f32 %v500_v16, %v499_v14  ;;  %v506_v32 = vsel %vm470_vm1, %v4114_v17, 0.0 }
  0xfb   :  { %v502_v20 = vsel %vm470_vm1, %v4116_v18, 0.0  ;;  %v4120_v21 = vpop.f32.mrb[18].mxu0 }
  0xfc   :  { %v503_v22 = vadd.f32 %v502_v20, %v501_v19  ;;  %v4122_v27 = vpop.f32.mrb[19].mxu0  ;;  %v508_v40 = vsel %vm470_vm1, %v4120_v21, 0.0 }
  0xfd   :  { %v504_v28 = vsel %vm470_vm1, %v4122_v27, 0.0 }
  0xfe   :  { %v505_v30 = vadd.f32 %v504_v28, %v503_v22 }
 0x100   :  { %v507_v36 = vadd.f32 %v506_v32, %v505_v30  ;;  %v526_v30 = vsel %vm470_vm1, %v4056_v43, 0.0 }
 0x101   :  { %v4136_v42 = vpop.f32.mrb[20].mxu0 }
 0x102   :  { %v4138_v44 = vpop.f32.mrb[21].mxu0  ;;  %v509_v46 = vadd.f32 %v508_v40, %v507_v36  ;;  %v514_v60 = vsel %vm470_vm1, %v4136_v42, 0.0  ;;  %v528_v36 = vsel %vm470_vm1, %v4062_v47, 0.0 }
 0x103   :  { %v510_v48 = vsel %vm470_vm1, %v4138_v44, 0.0  ;;  %v4142_v51 = vpop.f32.mrb[22].mxu0 }
 0x104   :  { %v511_v52 = vadd.f32 %v510_v48, %v509_v46  ;;  %v4144_v54 = vpop.f32.mrb[23].mxu0  ;;  %v516_v0 = vsel %vm470_vm1, %v4142_v51, 0.0  ;;  %v530_v46 = vsel %vm470_vm1, %v4054_v41, 0.0 }
 0x105   :  { %v512_v56 = vsel %vm470_vm1, %v4144_v54, 0.0 }
 0x106   :  { %v513_v58 = vadd.f32 %v512_v56, %v511_v52  ;;  %v532_v52 = vsel %vm470_vm1, %v4060_v45, 0.0  ;;  %v534_v56 = vsel %vm470_vm1, %v4080_v59, 0.0 }
 0x108   :  { %v515_v62 = vadd.f32 %v514_v60, %v513_v58 }
 0x109   :  { %v4152_v3 = vpop.f32.mrb[24].mxu0 }
 0x10a   :  { %v4154_v4 = vpop.f32.mrb[25].mxu0  ;;  %v517_v6 = vadd.f32 %v516_v0, %v515_v62  ;;  %v522_v20 = vsel %vm470_vm1, %v4152_v3, 0.0  ;;  %v536_v62 = vsel %vm470_vm1, %v4086_v63, 0.0 }
 0x10b   :  { %v518_v8 = vsel %vm470_vm1, %v4154_v4, 0.0  ;;  %v4158_v10 = vpop.f32.mrb[26].mxu0 }
 0x10c   :  { %v519_v12 = vadd.f32 %v518_v8, %v517_v6  ;;  %v4160_v14 = vpop.f32.mrb[27].mxu0  ;;  %v524_v28 = vsel %vm470_vm1, %v4158_v10, 0.0  ;;  %v538_v6 = vsel %vm470_vm1, %v4078_v57, 0.0 }
 0x10d   :  { %v520_v16 = vsel %vm470_vm1, %v4160_v14, 0.0 }
 0x10e   :  { %v521_v19 = vadd.f32 %v520_v16, %v519_v12  ;;  %v540_v12 = vsel %vm470_vm1, %v4084_v61, 0.0  ;;  %v542_v16 = vsel %vm470_vm1, %v4104_v11, 0.0 }
 0x110   :  { %v523_v22 = vadd.f32 %v522_v20, %v521_v19 }
 0x112   :  { %v525_v32 = vadd.f32 %v524_v28, %v523_v22  ;;  %v544_v22 = vsel %vm470_vm1, %v4110_v15, 0.0 }
 0x114   :  { %v527_v35 = vadd.f32 %v526_v30, %v525_v32  ;;  %v546_v30 = vsel %vm470_vm1, %v4102_v9, 0.0 }
 0x116   :  { %v529_v40 = vadd.f32 %v528_v36, %v527_v35  ;;  %v548_v35 = vsel %vm470_vm1, %v4108_v13, 0.0  ;;  %v550_v36 = vsel %vm470_vm1, %v4128_v31, 0.0 }
 0x118   :  { %v531_v48 = vadd.f32 %v530_v46, %v529_v40 }
 0x11a   :  { %v533_v58 = vadd.f32 %v532_v52, %v531_v48  ;;  %v552_v48 = vsel %vm470_vm1, %v4132_v38, 0.0 }
 0x11c   :  { %v535_v60 = vadd.f32 %v534_v56, %v533_v58  ;;  %v555_v56 = vsel %vm554_vm2, %v4126_v29, 0.0 }
 0x11e   :  { %v537_v0 = vadd.f32 %v536_v62, %v535_v60 }
 0x120   :  { %v539_v8 = vadd.f32 %v538_v6, %v537_v0 }
 0x122   :  { %v541_v19 = vadd.f32 %v540_v12, %v539_v8 }
 0x124   :  { %v543_v20 = vadd.f32 %v542_v16, %v541_v19 }
 0x126   :  { %v545_v28 = vadd.f32 %v544_v22, %v543_v20 }
 0x128   :  { %v547_v32 = vadd.f32 %v546_v30, %v545_v28 }
 0x12a   :  { %v549_v40 = vadd.f32 %v548_v35, %v547_v32 }
 0x12c   :  { %v551_v46 = vadd.f32 %v550_v36, %v549_v40 }
 0x12e   :  { %v553_v52 = vadd.f32 %v552_v48, %v551_v46 }
 0x130   :  { %v556_v58 = vadd.f32 %v555_v56, %v553_v52 }
 0x132   :  { %v557_v60 = vrot.slane %v556_v58, 4 }
 0x134   :  { %v558_v62 = vadd.f32 %v557_v60, %v556_v58 }
 0x136   :  { %v559_v0 = vrot.slane %v558_v62, 2 }
 0x138   :  { %v560_v6 = vadd.f32 %v559_v0, %v558_v62 }
 0x13a   :  { %v561_v8 = vrot.slane %v560_v6, 1 }
 0x13c   :  { %v562_v12 = vadd.f32 %v561_v8, %v560_v6 }
 0x13e   :  { %v563_v16 = vmul.f32 0.00295858, %v562_v12 }
 0x140   :  { %v4199_v19 = vsub.f32 %v4028_v24, %v563_v16  ;;  %v4202_v20 = vsub.f32 %v4032_v26, %v563_v16  ;;  %v4205_v22 = vsub.f32 %v4026_v23, %v563_v16  ;;  %v4208_v28 = vsub.f32 %v4030_v25, %v563_v16 }
 0x141   :  { %v4211_v30 = vsub.f32 %v4044_v34, %v563_v16  ;;  %v4214_v32 = vsub.f32 %v4050_v39, %v563_v16  ;;  %v4217_v35 = vsub.f32 %v4042_v33, %v563_v16  ;;  %v4220_v24 = vsub.f32 %v4048_v37, %v563_v16 }
 0x142   :  { %v4223_v26 = vsub.f32 %v4068_v50, %v563_v16  ;;  %v4226_v23 = vsub.f32 %v4074_v55, %v563_v16  ;;  %v4229_v25 = vsub.f32 %v4066_v49, %v563_v16  ;;  %v4232_v34 = vsub.f32 %v4072_v53, %v563_v16 }
 0x143   :  { %v4235_v39 = vsub.f32 %v4092_v2, %v563_v16  ;;  %v4238_v33 = vsub.f32 %v4098_v7, %v563_v16  ;;  %v4241_v37 = vsub.f32 %v4090_v1, %v563_v16  ;;  %v4244_v50 = vsub.f32 %v4096_v5, %v563_v16 }
 0x144   :  { %v4247_v55 = vsub.f32 %v4116_v18, %v563_v16  ;;  %v4250_v49 = vsub.f32 %v4122_v27, %v563_v16  ;;  %v4253_v53 = vsub.f32 %v4114_v17, %v563_v16  ;;  %v4256_v2 = vsub.f32 %v4120_v21, %v563_v16 }
 0x145   :  { %v4259_v7 = vsub.f32 %v4138_v44, %v563_v16  ;;  %v4262_v1 = vsub.f32 %v4144_v54, %v563_v16  ;;  %v4265_v5 = vsub.f32 %v4136_v42, %v563_v16  ;;  %v4268_v18 = vsub.f32 %v4142_v51, %v563_v16 }
 0x146   :  { %v4271_v27 = vsub.f32 %v4154_v4, %v563_v16  ;;  %v4274_v17 = vsub.f32 %v4160_v14, %v563_v16  ;;  %v4277_v21 = vsub.f32 %v4152_v3, %v563_v16  ;;  %v4280_v44 = vsub.f32 %v4158_v10, %v563_v16 }
 0x147   :  { %v4283_v54 = vsub.f32 %v4056_v43, %v563_v16  ;;  %v4286_v42 = vsub.f32 %v4062_v47, %v563_v16  ;;  %v4289_v51 = vsub.f32 %v4054_v41, %v563_v16  ;;  %v4292_v4 = vsub.f32 %v4060_v45, %v563_v16 }
 0x148   :  { %v4295_v14 = vsub.f32 %v4080_v59, %v563_v16  ;;  %v4298_v3 = vsub.f32 %v4086_v63, %v563_v16  ;;  %v4301_v10 = vsub.f32 %v4078_v57, %v563_v16  ;;  %v4304_v43 = vsub.f32 %v4084_v61, %v563_v16 }
 0x149   :  { %v4307_v47 = vsub.f32 %v4104_v11, %v563_v16  ;;  %v4310_v41 = vsub.f32 %v4110_v15, %v563_v16  ;;  %v4313_v45 = vsub.f32 %v4102_v9, %v563_v16  ;;  %v4316_v59 = vsub.f32 %v4108_v13, %v563_v16 }
 0x14a   :  { %v4319_v63 = vsub.f32 %v4128_v31, %v563_v16  ;;  %v4322_v57 = vsub.f32 %v4132_v38, %v563_v16  ;;  %v4325_v61 = vsub.f32 %v4126_v29, %v563_v16  ;;  %v607_v11 = vmul.f32 %v4199_v19, %v4199_v19 }
 0x14b   :  { %v608_v15 = vmul.f32 %v4202_v20, %v4202_v20  ;;  %v609_v9 = vmul.f32 %v4205_v22, %v4205_v22  ;;  %v610_v13 = vmul.f32 %v4208_v28, %v4208_v28  ;;  %v611_v29 = vmul.f32 %v4211_v30, %v4211_v30 }
 0x14c   :  { %v650_v31 = vsel %vm470_vm1, %v607_v11, 0.0  ;;  %v612_v48 = vmul.f32 %v4214_v32, %v4214_v32  ;;  %v613_v58 = vmul.f32 %v4217_v35, %v4217_v35  ;;  %v614_v0 = vmul.f32 %v4220_v24, %v4220_v24 }
 0x14d   :  { %v651_v38 = vsel %vm470_vm1, %v608_v15, 0.0  ;;  %v653_v40 = vsel %vm470_vm1, %v609_v9, 0.0  ;;  %v655_v52 = vsel %vm470_vm1, %v610_v13, 0.0  ;;  %v657_v60 = vsel %vm470_vm1, %v611_v29, 0.0 }
 0x14e   :  { %v652_v36 = vadd.f32 %v651_v38, %v650_v31  ;;  %v659_v6 = vsel %vm470_vm1, %v612_v48, 0.0  ;;  %v615_v12 = vmul.f32 %v4223_v26, %v4223_v26  ;;  %v661_v16 = vsel %vm470_vm1, %v613_v58, 0.0 }
 0x14f   :  { %v616_v15 = vmul.f32 %v4226_v23, %v4226_v23  ;;  %v663_v9 = vsel %vm470_vm1, %v614_v0, 0.0  ;;  %v617_v31 = vmul.f32 %v4229_v25, %v4229_v25  ;;  %v618_v29 = vmul.f32 %v4232_v34, %v4232_v34 }
 0x150   :  { %v654_v46 = vadd.f32 %v653_v40, %v652_v36  ;;  %v665_v38 = vsel %vm470_vm1, %v615_v12, 0.0  ;;  %v619_v48 = vmul.f32 %v4235_v39, %v4235_v39  ;;  %v620_v58 = vmul.f32 %v4238_v33, %v4238_v33 }
 0x151   :  { %v667_v40 = vsel %vm470_vm1, %v616_v15, 0.0  ;;  %v621_v0 = vmul.f32 %v4241_v37, %v4241_v37  ;;  %v622_v12 = vmul.f32 %v4244_v50, %v4244_v50  ;;  %v623_v15 = vmul.f32 %v4247_v55, %v4247_v55 }
 0x152   :  { %v656_v56 = vadd.f32 %v655_v52, %v654_v46  ;;  %v669_v52 = vsel %vm470_vm1, %v617_v31, 0.0  ;;  %v624_v31 = vmul.f32 %v4250_v49, %v4250_v49 }
 0x154   :  { %v658_v62 = vadd.f32 %v657_v60, %v656_v56  ;;  %v671_v60 = vsel %vm470_vm1, %v618_v29, 0.0  ;;  %v625_v29 = vmul.f32 %v4253_v53, %v4253_v53 }
 0x156   :  { %v660_v8 = vadd.f32 %v659_v6, %v658_v62  ;;  %v673_v6 = vsel %vm470_vm1, %v619_v48, 0.0  ;;  %v626_v48 = vmul.f32 %v4256_v2, %v4256_v2 }
 0x158   :  { %v662_v11 = vadd.f32 %v661_v16, %v660_v8  ;;  %v675_v16 = vsel %vm470_vm1, %v620_v58, 0.0  ;;  %v627_v58 = vmul.f32 %v4259_v7, %v4259_v7 }
 0x15a   :  { %v664_v13 = vadd.f32 %v663_v9, %v662_v11  ;;  %v677_v9 = vsel %vm470_vm1, %v621_v0, 0.0  ;;  %v628_v0 = vmul.f32 %v4262_v1, %v4262_v1 }
 0x15c   :  { %v666_v36 = vadd.f32 %v665_v38, %v664_v13  ;;  %v679_v38 = vsel %vm470_vm1, %v622_v12, 0.0  ;;  %v629_v12 = vmul.f32 %v4265_v5, %v4265_v5  ;;  %v691_v7 = vsel %vm470_vm1, %v628_v0, 0.0 }
 0x15e   :  { %v668_v46 = vadd.f32 %v667_v40, %v666_v36  ;;  %v681_v40 = vsel %vm470_vm1, %v623_v15, 0.0  ;;  %v630_v15 = vmul.f32 %v4268_v18, %v4268_v18 }
 0x160   :  { %v670_v56 = vadd.f32 %v669_v52, %v668_v46  ;;  %v683_v52 = vsel %vm470_vm1, %v624_v31, 0.0  ;;  %v693_v31 = vsel %vm470_vm1, %v629_v12, 0.0 }
 0x162   :  { %v672_v62 = vadd.f32 %v671_v60, %v670_v56  ;;  %v685_v60 = vsel %vm470_vm1, %v625_v29, 0.0  ;;  %v695_v29 = vsel %vm470_vm1, %v630_v15, 0.0 }
 0x164   :  { %v674_v8 = vadd.f32 %v673_v6, %v672_v62  ;;  %v687_v6 = vsel %vm470_vm1, %v626_v48, 0.0 }
 0x166   :  { %v676_v11 = vadd.f32 %v675_v16, %v674_v8  ;;  %v689_v16 = vsel %vm470_vm1, %v627_v58, 0.0 }
 0x168   :  { %v678_v13 = vadd.f32 %v677_v9, %v676_v11 }
 0x16a   :  { %v680_v36 = vadd.f32 %v679_v38, %v678_v13  ;;  %v631_v13 = vmul.f32 %v4271_v27, %v4271_v27 }
 0x16c   :  { %v682_v46 = vadd.f32 %v681_v40, %v680_v36  ;;  %v632_v36 = vmul.f32 %v4274_v17, %v4274_v17  ;;  %v697_v48 = vsel %vm470_vm1, %v631_v13, 0.0 }
 0x16e   :  { %v684_v56 = vadd.f32 %v683_v52, %v682_v46  ;;  %v633_v46 = vmul.f32 %v4277_v21, %v4277_v21  ;;  %v699_v58 = vsel %vm470_vm1, %v632_v36, 0.0 }
 0x170   :  { %v686_v62 = vadd.f32 %v685_v60, %v684_v56  ;;  %v634_v56 = vmul.f32 %v4280_v44, %v4280_v44  ;;  %v701_v0 = vsel %vm470_vm1, %v633_v46, 0.0 }
 0x172   :  { %v688_v8 = vadd.f32 %v687_v6, %v686_v62  ;;  %v635_v62 = vmul.f32 %v4283_v54, %v4283_v54  ;;  %v703_v12 = vsel %vm470_vm1, %v634_v56, 0.0 }
 0x174   :  { %v690_v11 = vadd.f32 %v689_v16, %v688_v8  ;;  %v636_v8 = vmul.f32 %v4286_v42, %v4286_v42  ;;  %v705_v15 = vsel %vm470_vm1, %v635_v62, 0.0 }
 0x176   :  { %v692_v9 = vadd.f32 %v691_v7, %v690_v11  ;;  %v637_v11 = vmul.f32 %v4289_v51, %v4289_v51  ;;  %v707_v13 = vsel %vm470_vm1, %v636_v8, 0.0 }
 0x178   :  { %v694_v38 = vadd.f32 %v693_v31, %v692_v9  ;;  %v638_v9 = vmul.f32 %v4292_v4, %v4292_v4  ;;  %v709_v36 = vsel %vm470_vm1, %v637_v11, 0.0 }
 0x17a   :  { %v696_v40 = vadd.f32 %v695_v29, %v694_v38  ;;  %v639_v38 = vmul.f32 %v4295_v14, %v4295_v14  ;;  %v711_v46 = vsel %vm470_vm1, %v638_v9, 0.0 }
 0x17c   :  { %v698_v52 = vadd.f32 %v697_v48, %v696_v40  ;;  %v640_v40 = vmul.f32 %v4298_v3, %v4298_v3  ;;  %v713_v56 = vsel %vm470_vm1, %v639_v38, 0.0 }
 0x17e   :  { %v700_v60 = vadd.f32 %v699_v58, %v698_v52  ;;  %v641_v52 = vmul.f32 %v4301_v10, %v4301_v10  ;;  %v715_v62 = vsel %vm470_vm1, %v640_v40, 0.0 }
 0x180   :  { %v702_v6 = vadd.f32 %v701_v0, %v700_v60  ;;  %v642_v60 = vmul.f32 %v4304_v43, %v4304_v43  ;;  %v717_v8 = vsel %vm470_vm1, %v641_v52, 0.0 }
 0x182   :  { %v704_v16 = vadd.f32 %v703_v12, %v702_v6  ;;  %v643_v6 = vmul.f32 %v4307_v47, %v4307_v47  ;;  %v719_v11 = vsel %vm470_vm1, %v642_v60, 0.0 }
 0x184   :  { %v706_v7 = vadd.f32 %v705_v15, %v704_v16  ;;  %v644_v16 = vmul.f32 %v4310_v41, %v4310_v41  ;;  %v721_v9 = vsel %vm470_vm1, %v643_v6, 0.0 }
 0x186   :  { %v708_v31 = vadd.f32 %v707_v13, %v706_v7  ;;  %v645_v7 = vmul.f32 %v4313_v45, %v4313_v45  ;;  %v723_v38 = vsel %vm470_vm1, %v644_v16, 0.0 }
 0x188   :  { %v710_v29 = vadd.f32 %v709_v36, %v708_v31  ;;  %v646_v31 = vmul.f32 %v4316_v59, %v4316_v59  ;;  %v725_v40 = vsel %vm470_vm1, %v645_v7, 0.0 }
 0x18a   :  { %v712_v48 = vadd.f32 %v711_v46, %v710_v29  ;;  %v647_v29 = vmul.f32 %v4319_v63, %v4319_v63  ;;  %v727_v52 = vsel %vm470_vm1, %v646_v31, 0.0 }
 0x18c   :  { %v714_v58 = vadd.f32 %v713_v56, %v712_v48  ;;  %v648_v48 = vmul.f32 %v4322_v57, %v4322_v57  ;;  %v729_v60 = vsel %vm470_vm1, %v647_v29, 0.0 }
 0x18e   :  { %v716_v0 = vadd.f32 %v715_v62, %v714_v58  ;;  %v649_v58 = vmul.f32 %v4325_v61, %v4325_v61  ;;  %v3097_v61 = vld [vmem:[%s6094_s2] ss:$0 sm:$0xff] }
 0x18f   :  { %v4462_v29 = vmul.f32 %v3097_v61, %v4205_v22  ;;  %v4483_v22 = vmul.f32 %v3097_v61, %v4232_v34  ;;  %v769_v34 = vmul.f32 %v3097_v61, %v4262_v1  ;;  %v4531_v1 = vmul.f32 %v3097_v61, %v4289_v51  ;;  %v4559_v51 = vld [vmem:[%s6095_s3] ss:$0 sm:$0xff]  ;;  %s3870_s3 = smov 16  }
 0x190   :  { %v718_v12 = vadd.f32 %v717_v8, %v716_v0  ;;  %v731_v0 = vsel %vm470_vm1, %v648_v48, 0.0  ;;  %v733_v8 = vsel %vm554_vm2, %v649_v58, 0.0  ;;  %v753_v48 = vmul.f32 %v3097_v61, %v4214_v32 }
 0x191   :  { %v4474_v58 = vmul.f32 %v3097_v61, %v4223_v26  ;;  %v4492_v32 = vmul.f32 %v3097_v61, %v4241_v37  ;;  %v4501_v26 = vmul.f32 %v3097_v61, %v4250_v49  ;;  %v4513_v37 = vmul.f32 %v3097_v61, %v4271_v27 }
 0x192   :  { %v720_v15 = vadd.f32 %v719_v11, %v718_v12  ;;  %v4522_v49 = vmul.f32 %v3097_v61, %v4280_v44  ;;  %v4540_v27 = vmul.f32 %v3097_v61, %v4298_v3  ;;  %v4549_v44 = vmul.f32 %v3097_v61, %v4307_v47 }
 0x193   :  { %v4568_v3 = vmul.f32 %v3097_v61, %v4319_v63 }
 0x194   :  { %v722_v13 = vadd.f32 %v721_v9, %v720_v15 }
 0x196   :  { %v724_v36 = vadd.f32 %v723_v38, %v722_v13  ;;  %v748_v38 = vmul.f32 %v3097_v61, %v4199_v19  ;;  %v4477_v19 = vmul.f32 %v3097_v61, %v4226_v23  ;;  %v4504_v23 = vmul.f32 %v3097_v61, %v4253_v53 }
 0x197   :  { %v4525_v53 = vmul.f32 %v3097_v61, %v4283_v54  ;;  %v4552_v54 = vmul.f32 %v3097_v61, %v4310_v41 }
 0x198   :  { %v726_v46 = vadd.f32 %v725_v40, %v724_v36  ;;  %v749_v36 = vmul.f32 %v3097_v61, %v4202_v20  ;;  %v4465_v40 = vmul.f32 %v3097_v61, %v4208_v28  ;;  %v4480_v20 = vmul.f32 %v3097_v61, %v4229_v25 }
 0x199   :  { %v4486_v28 = vmul.f32 %v3097_v61, %v4235_v39  ;;  %v4507_v25 = vmul.f32 %v3097_v61, %v4256_v2  ;;  %v770_v39 = vmul.f32 %v3097_v61, %v4265_v5  ;;  %v4528_v2 = vmul.f32 %v3097_v61, %v4286_v42 }
 0x19a   :  { %v728_v56 = vadd.f32 %v727_v52, %v726_v46  ;;  %v752_v46 = vmul.f32 %v3097_v61, %v4211_v30  ;;  %v754_v52 = vmul.f32 %v3097_v61, %v4217_v35  ;;  %v4489_v30 = vmul.f32 %v3097_v61, %v4238_v33 }
 0x19b   :  { %v4495_v35 = vmul.f32 %v3097_v61, %v4244_v50  ;;  %v771_v33 = vmul.f32 %v3097_v61, %v4268_v18  ;;  %v4516_v50 = vmul.f32 %v3097_v61, %v4274_v17  ;;  %v4534_v5 = vmul.f32 %v3097_v61, %v4292_v4 }
 0x19c   :  { %v730_v62 = vadd.f32 %v729_v60, %v728_v56  ;;  %v4471_v56 = vmul.f32 %v3097_v61, %v4220_v24  ;;  %v4498_v24 = vmul.f32 %v3097_v61, %v4247_v55  ;;  %v4519_v55 = vmul.f32 %v3097_v61, %v4277_v21 }
 0x19d   :  { %v4537_v18 = vmul.f32 %v3097_v61, %v4295_v14  ;;  %v4543_v17 = vmul.f32 %v3097_v61, %v4301_v10  ;;  %v4546_v21 = vmul.f32 %v3097_v61, %v4304_v43  ;;  %v4562_v4 = vmul.f32 %v3097_v61, %v4313_v45 }
 0x19e   :  { %v732_v6 = vadd.f32 %v731_v0, %v730_v62  ;;  %v4565_v14 = vmul.f32 %v3097_v61, %v4316_v59 }
 0x1a0   :  { %v734_v12 = vadd.f32 %v733_v8, %v732_v6 }
 0x1a2   :  { %v735_v16 = vrot.slane %v734_v12, 4 }
 0x1a4   :  { %v736_v11 = vadd.f32 %v735_v16, %v734_v12 }
 0x1a6   :  { %v737_v15 = vrot.slane %v736_v11, 2 }
 0x1a8   :  { %v738_v7 = vadd.f32 %v737_v15, %v736_v11 }
 0x1aa   :  { %v739_v57 = vrot.slane %v738_v7, 1 }
 0x1ac   :  { %v740_v9 = vadd.f32 %v739_v57, %v738_v7 }
 0x1ae   :  { %v741_v13 = vmul.f32 0.00295858, %v740_v9 }
 0x1b0   :  { %v791_v31 = vadd.f32 1e-05, %v741_v13 }
 0x1b2   :  { %3866 = vrsqrt.f32 %v791_v31 }
 0x1bc   :  { %v4554_v42 = vpop.eup %3866 }
 0x1bd   :  { %v797_v10 = vmul.f32 %v4554_v42, %v752_v46  ;;  %v798_v43 = vmul.f32 %v4554_v42, %v753_v48  ;;  %v799_v47 = vmul.f32 %v4554_v42, %v754_v52  ;;  %v814_v41 = vmul.f32 %v4554_v42, %v769_v34 }
 0x1be   :  { %v815_v60 = vmul.f32 %v4554_v42, %v770_v39  ;;  %v816_v62 = vmul.f32 %v4554_v42, %v771_v33  ;;  %v4577_v45 = vmul.f32 %v4554_v42, %v748_v38  ;;  %v4586_v16 = vmul.f32 %v4554_v42, %v749_v36 }
 0x1bf   :  { %v846_v59 = vadd.f32 %v4559_v51, %v797_v10  ;;  %v847_v63 = vadd.f32 %v4559_v51, %v798_v43  ;;  %v848_v0 = vadd.f32 %v4559_v51, %v799_v47  ;;  %v863_v6 = vadd.f32 %v4559_v51, %v814_v41 }
 0x1c0   :  { %v864_v8 = vadd.f32 %v4559_v51, %v815_v60  ;;  %v865_v12 = vadd.f32 %v4559_v51, %v816_v62  ;;  %v795_v61 = vmul.f32 %v4554_v42, %v4462_v29  ;;  %v796_v36 = vmul.f32 %v4554_v42, %v4465_v40 }
 0x1c1   :  { %vm889_vm3 = vcmp.ge.f32.partialorder %v846_v59, 0.0  ;;  %vm890_vm4 = vcmp.ge.f32.partialorder %v847_v63, 0.0  ;;  %vm891_vm5 = vcmp.ge.f32.partialorder %v848_v0, 0.0  ;;  %vm906_vm6 = vcmp.ge.f32.partialorder %v863_v6, 0.0 }
 0x1c2   :  { %vm907_vm7 = vcmp.ge.f32.partialorder %v864_v8, 0.0  ;;  %vm908_vm8 = vcmp.ge.f32.partialorder %v865_v12, 0.0  ;;  %v932_v11 = vmul.f32 0.2, %v846_v59  ;;  %v933_v15 = vmul.f32 0.2, %v847_v63 }
 0x1c3   :  { %v934_v7 = vmul.f32 0.2, %v848_v0  ;;  %v949_v57 = vmul.f32 0.2, %v863_v6  ;;  %v950_v9 = vmul.f32 0.2, %v864_v8  ;;  %v800_v39 = vmul.f32 %v4554_v42, %v4471_v56 }
 0x1c4   :  { %v951_v13 = vmul.f32 0.2, %v865_v12  ;;  %v975_v31 = vsel %vm889_vm3, %v846_v59, %v932_v11  ;;  %v976_v38 = vsel %vm890_vm4, %v847_v63, %v933_v15  ;;  %v801_v29 = vmul.f32 %v4554_v42, %v4474_v58 }
 0x1c5   :  { %v977_v46 = vsel %vm891_vm5, %v848_v0, %v934_v7  ;;  %v992_v48 = vsel %vm906_vm6, %v863_v6, %v949_v57  ;;  %v993_v52 = vsel %vm907_vm7, %v864_v8, %v950_v9  ;;  %1018 = vst.msk [vmem:[#allocation2 + $0x20] sm:$0xff] %vm470_vm1, %v975_v31  ;;  %1019 = vst.msk [vmem:[#allocation2 + $0x28] sm:$0xff] %vm470_vm1, %v976_v38 }
 0x1c6   :  { %v994_v34 = vsel %vm908_vm8, %v865_v12, %v951_v13  ;;  %1020 = vst.msk [vmem:[#allocation2 + $0x30] sm:$0xff] %vm470_vm1, %v977_v46  ;;  %1035 = vst.msk [vmem:[#allocation2 + $0xa8] sm:$0xff] %vm470_vm1, %v992_v48  ;;  %v802_v40 = vmul.f32 %v4554_v42, %v4477_v19  ;;  %v803_v33 = vmul.f32 %v4554_v42, %v4480_v20 }
 0x1c7   :  { %1036 = vst.msk [vmem:[#allocation2 + $0xb0] sm:$0xff] %vm470_vm1, %v993_v52  ;;  %1037 = vst.msk [vmem:[#allocation2 + $0xb8] sm:$0xff] %vm470_vm1, %v994_v34  ;;  %v804_v10 = vmul.f32 %v4554_v42, %v4483_v22  ;;  %v805_v56 = vmul.f32 %v4554_v42, %v4486_v28  ;;  %v806_v43 = vmul.f32 %v4554_v42, %v4489_v30 }
 0x1c8   :  { %v807_v47 = vmul.f32 %v4554_v42, %v4492_v32  ;;  %v808_v58 = vmul.f32 %v4554_v42, %v4495_v35  ;;  %v809_v19 = vmul.f32 %v4554_v42, %v4498_v24  ;;  %v810_v20 = vmul.f32 %v4554_v42, %v4501_v26 }
 0x1c9   :  { %v811_v22 = vmul.f32 %v4554_v42, %v4504_v23  ;;  %v812_v28 = vmul.f32 %v4554_v42, %v4507_v25  ;;  %v817_v30 = vmul.f32 %v4554_v42, %v4513_v37  ;;  %v818_v32 = vmul.f32 %v4554_v42, %v4516_v50 }
 0x1ca   :  { %v819_v35 = vmul.f32 %v4554_v42, %v4519_v55  ;;  %v820_v24 = vmul.f32 %v4554_v42, %v4522_v49  ;;  %v821_v26 = vmul.f32 %v4554_v42, %v4525_v53  ;;  %v822_v23 = vmul.f32 %v4554_v42, %v4528_v2 }
 0x1cb   :  { %v823_v25 = vmul.f32 %v4554_v42, %v4531_v1  ;;  %v824_v37 = vmul.f32 %v4554_v42, %v4534_v5  ;;  %v825_v50 = vmul.f32 %v4554_v42, %v4537_v18  ;;  %v826_v55 = vmul.f32 %v4554_v42, %v4540_v27 }
 0x1cc   :  { %v827_v49 = vmul.f32 %v4554_v42, %v4543_v17  ;;  %v828_v53 = vmul.f32 %v4554_v42, %v4546_v21  ;;  %v829_v2 = vmul.f32 %v4554_v42, %v4549_v44  ;;  %v830_v1 = vmul.f32 %v4554_v42, %v4552_v54  ;;  %v1077_v18 = vld [vmem:[#allocation2 + $0x21] ss:$2 sm:$0xff] }
 0x1cd   :  { %v1093_v41 = vld [vmem:[#allocation2 + $0x22] ss:$2 sm:$0xff]  ;;  %v831_v5 = vmul.f32 %v4554_v42, %v4562_v4  ;;  %v4656_v27 = vmul.f32 %v4554_v42, %v4565_v14  ;;  %v4660_v17 = vmul.f32 %v4554_v42, %v4568_v3  ;;  %v849_v44 = vadd.f32 %v4559_v51, %v800_v39 }
 0x1ce   :  { %v1907_v60 = vld [vmem:[#allocation2 + $0xab] ss:$2 sm:$0xff]  ;;  %v1891_v21 = vld [vmem:[#allocation2 + $0xaa] ss:$2 sm:$0xff]  ;;  %v866_v54 = vadd.f32 %v4559_v51, %v817_v30  ;;  %v867_v4 = vadd.f32 %v4559_v51, %v818_v32  ;;  %v4669_v14 = vadd.f32 %v4559_v51, %v4577_v45  ;;  %v4673_v42 = vadd.f32 %v4559_v51, %v4586_v16 }
 0x1cf   :  { %v3245_v62 = vpack.i.bf16 %v1093_v41, %v1907_v60  ;;  %v3235_v59 = vpack.i.bf16 %v1077_v18, %v1891_v21  ;;  %v4676_v3 = vadd.f32 %v4559_v51, %v795_v61  ;;  %v4679_v63 = vadd.f32 %v4559_v51, %v796_v36 }
 0x1d0   :  { %v4682_v0 = vadd.f32 %v4559_v51, %v801_v29  ;;  %v4685_v6 = vadd.f32 %v4559_v51, %v802_v40  ;;  %v4688_v8 = vadd.f32 %v4559_v51, %v803_v33  ;;  %vm892_vm9 = vcmp.ge.f32.partialorder %v849_v44, 0.0 }
 0x1d1   :  { %3246 = vrot.lane.b32.xlu1 %v3245_v62, %s3870_s3  ;;  %3236 = vrot.lane.b32.xlu0 %v3235_v59, %s3871_s13  ;;  %vm909_vm10 = vcmp.ge.f32.partialorder %v866_v54, 0.0  ;;  %v4691_v45 = vadd.f32 %v4559_v51, %v804_v10  ;;  %vm910_vm11 = vcmp.ge.f32.partialorder %v867_v4, 0.0  ;;  %v935_v12 = vmul.f32 0.2, %v849_v44 }
 0x1d2   :  { %v952_v16 = vmul.f32 0.2, %v866_v54  ;;  %v4694_v11 = vadd.f32 %v4559_v51, %v805_v56  ;;  %v4697_v15 = vadd.f32 %v4559_v51, %v806_v43  ;;  %v953_v7 = vmul.f32 0.2, %v867_v4 }
 0x1d3   :  { %vm885_vm12 = vcmp.ge.f32.partialorder %v4669_v14, 0.0  ;;  %v4701_v57 = vadd.f32 %v4559_v51, %v807_v47  ;;  %v4704_v9 = vadd.f32 %v4559_v51, %v808_v58  ;;  %v978_v13 = vsel %vm892_vm9, %v849_v44, %v935_v12 }
 0x1d4   :  { %v995_v61 = vsel %vm909_vm10, %v866_v54, %v952_v16  ;;  %v4707_v31 = vadd.f32 %v4559_v51, %v809_v19  ;;  %v4710_v38 = vadd.f32 %v4559_v51, %v810_v20  ;;  %v4713_v46 = vadd.f32 %v4559_v51, %v811_v22  ;;  %1021 = vst.msk [vmem:[#allocation2 + $0x38] sm:$0xff] %vm470_vm1, %v978_v13 }
 0x1d5   :  { %v996_v36 = vsel %vm910_vm11, %v867_v4, %v953_v7  ;;  %1038 = vst.msk [vmem:[#allocation2 + $0xc0] sm:$0xff] %vm470_vm1, %v995_v61  ;;  %v4718_v48 = vadd.f32 %v4559_v51, %v812_v28  ;;  %v4721_v52 = vadd.f32 %v4559_v51, %v819_v35  ;;  %v4724_v34 = vadd.f32 %v4559_v51, %v820_v24 }
 0x1d6   :  { %1039 = vst.msk [vmem:[#allocation2 + $0xc8] sm:$0xff] %vm470_vm1, %v996_v36  ;;  %v4728_v39 = vadd.f32 %v4559_v51, %v821_v26  ;;  %v4731_v29 = vadd.f32 %v4559_v51, %v822_v23  ;;  %v4734_v40 = vadd.f32 %v4559_v51, %v823_v25  ;;  %v4737_v33 = vadd.f32 %v4559_v51, %v824_v37 }
 0x1d7   :  { %v4740_v10 = vadd.f32 %v4559_v51, %v825_v50  ;;  %v4743_v56 = vadd.f32 %v4559_v51, %v826_v55  ;;  %v4746_v43 = vadd.f32 %v4559_v51, %v827_v49  ;;  %v4749_v47 = vadd.f32 %v4559_v51, %v828_v53 }
 0x1d8   :  { %v4752_v58 = vadd.f32 %v4559_v51, %v829_v2  ;;  %v4755_v19 = vadd.f32 %v4559_v51, %v830_v1  ;;  %v4758_v20 = vadd.f32 %v4559_v51, %v831_v5  ;;  %vm886_vm13 = vcmp.ge.f32.partialorder %v4673_v42, 0.0 }
 0x1d9   :  { %vm887_vm14 = vcmp.ge.f32.partialorder %v4676_v3, 0.0  ;;  %vm888_vm15 = vcmp.ge.f32.partialorder %v4679_v63, 0.0  ;;  %vm893_vm2 = vcmp.ge.f32.partialorder %v4682_v0, 0.0  ;;  %vm894_vm3 = vcmp.ge.f32.partialorder %v4685_v6, 0.0 }
 0x1da   :  { %vm895_vm4 = vcmp.ge.f32.partialorder %v4688_v8, 0.0  ;;  %vm896_vm5 = vcmp.ge.f32.partialorder %v4691_v45, 0.0  ;;  %v928_v22 = vmul.f32 0.2, %v4669_v14  ;;  %v4771_v28 = vadd.f32 %v4559_v51, %v4656_v27 }
 0x1db   :  { %v4775_v30 = vadd.f32 %v4559_v51, %v4660_v17  ;;  %v1079_v32 = vld [vmem:[#allocation2 + $0x31] ss:$2 sm:$0xff]  ;;  %vm898_vm7 = vcmp.ge.f32.partialorder %v4697_v15, 0.0  ;;  %v929_v35 = vmul.f32 0.2, %v4673_v42  ;;  %vm902_vm11 = vcmp.ge.f32.partialorder %v4710_v38, 0.0 }
 0x1dc   :  { %v930_v24 = vmul.f32 0.2, %v4676_v3  ;;  %v931_v51 = vmul.f32 0.2, %v4679_v63  ;;  %v936_v23 = vmul.f32 0.2, %v4682_v0  ;;  %v971_v25 = vsel %vm885_vm12, %v4669_v14, %v928_v22 }
 0x1dd   :  { %v1893_v26 = vld [vmem:[#allocation2 + $0xba] ss:$2 sm:$0xff]  ;;  %vm911_vm9 = vcmp.ge.f32.partialorder %v4721_v52, 0.0  ;;  %vm912_vm8 = vcmp.ge.f32.partialorder %v4724_v34, 0.0  ;;  %v937_v50 = vmul.f32 0.2, %v4685_v6  ;;  %v972_v1 = vsel %vm886_vm13, %v4673_v42, %v929_v35 }
 0x1de   :  { %v3240_v37 = vpack.i.bf16 %v1893_v26, %v1079_v32  ;;  %v938_v55 = vmul.f32 0.2, %v4688_v8  ;;  %v939_v49 = vmul.f32 0.2, %v4691_v45  ;;  %1014 = vst.msk [vmem:[#allocation2] sm:$0xff] %vm470_vm1, %v971_v25  ;;  %vm917_vm10 = vcmp.ge.f32.partialorder %v4740_v10, 0.0 }
 0x1df   :  { %v940_v41 = vmul.f32 0.2, %v4694_v11  ;;  %v941_v53 = vmul.f32 0.2, %v4697_v15  ;;  %v942_v2 = vmul.f32 0.2, %v4701_v57  ;;  %v973_v27 = vsel %vm887_vm14, %v4676_v3, %v930_v24 }
 0x1e0   :  { %3241 = vrot.lane.b32.xlu0 %v3240_v37, %s3871_s13  ;;  %v943_v5 = vmul.f32 0.2, %v4704_v9  ;;  %v944_v18 = vmul.f32 0.2, %v4707_v31  ;;  %v945_v60 = vmul.f32 0.2, %v4710_v38  ;;  %v974_v62 = vsel %vm888_vm15, %v4679_v63, %v931_v51 }
 0x1e1   :  { %1015 = vst.msk [vmem:[#allocation2 + $0x8] sm:$0xff] %vm470_vm1, %v972_v1  ;;  %vm921_vm13 = vcmp.ge.f32.partialorder %v4752_v58, 0.0  ;;  %vm922_vm6 = vcmp.ge.f32.partialorder %v4755_v19, 0.0  ;;  %vm923_vm0 = vcmp.ge.f32.partialorder %v4758_v20, 0.0  ;;  %vm924_vm12 = vcmp.ge.f32.partialorder %v4771_v28, 0.0  ;;  %1016 = vst.msk [vmem:[#allocation2 + $0x10] sm:$0xff] %vm470_vm1, %v973_v27 }
 0x1e2   :  { %v946_v17 = vmul.f32 0.2, %v4713_v46  ;;  %v947_v21 = vmul.f32 0.2, %v4718_v48  ;;  %vm925_vm14 = vcmp.ge.f32.partialorder %v4775_v30, 0.0  ;;  %1017 = vst.msk [vmem:[#allocation2 + $0x18] sm:$0xff] %vm470_vm1, %v974_v62  ;;  %v979_v4 = vsel %vm893_vm2, %v4682_v0, %v936_v23 }
 0x1e3   :  { %v954_v59 = vmul.f32 0.2, %v4721_v52  ;;  %v955_v44 = vmul.f32 0.2, %v4724_v34  ;;  %v956_v54 = vmul.f32 0.2, %v4728_v39  ;;  %v980_v63 = vsel %vm894_vm3, %v4685_v6, %v937_v50 }
 0x1e4   :  { %v957_v14 = vmul.f32 0.2, %v4731_v29  ;;  %v958_v42 = vmul.f32 0.2, %v4734_v40  ;;  %v959_v3 = vmul.f32 0.2, %v4737_v33  ;;  %v981_v0 = vsel %vm895_vm4, %v4688_v8, %v938_v55 }
 0x1e5   :  { %1022 = vst.msk [vmem:[#allocation2 + $0x40] sm:$0xff] %vm470_vm1, %v979_v4  ;;  %v960_v12 = vmul.f32 0.2, %v4740_v10  ;;  %v961_v16 = vmul.f32 0.2, %v4743_v56  ;;  %1023 = vst.msk [vmem:[#allocation2 + $0x48] sm:$0xff] %vm470_vm1, %v980_v63  ;;  %v982_v36 = vsel %vm896_vm5, %v4691_v45, %v939_v49  ;;  %v984_v26 = vsel %vm898_vm7, %v4697_v15, %v941_v53 }
 0x1e6   :  { %v962_v7 = vmul.f32 0.2, %v4746_v43  ;;  %v963_v13 = vmul.f32 0.2, %v4749_v47  ;;  %v964_v61 = vmul.f32 0.2, %v4752_v58  ;;  %v988_v23 = vsel %vm902_vm11, %v4710_v38, %v945_v60 }
 0x1e7   :  { %v965_v6 = vmul.f32 0.2, %v4755_v19  ;;  %1024 = vst.msk [vmem:[#allocation2 + $0x50] sm:$0xff] %vm470_vm1, %v981_v0  ;;  %v966_v22 = vmul.f32 0.2, %v4758_v20  ;;  %vm6120_vm15 = vcmp.ge.f32.partialorder %v4694_v11, 0.0  ;;  %v998_v38 = vsel %vm912_vm8, %v4724_v34, %v955_v44 }
 0x1e8   :  { %v967_v32 = vmul.f32 0.2, %v4771_v28  ;;  %v968_v8 = vmul.f32 0.2, %v4775_v30  ;;  %v983_v35 = vsel %vm6120_vm15, %v4694_v11, %v940_v41  ;;  %1025 = vst.msk [vmem:[#allocation2 + $0x58] sm:$0xff] %vm470_vm1, %v982_v36  ;;  %vm6121_vm2 = vcmp.ge.f32.partialorder %v4701_v57, 0.0 }
 0x1e9   :  { %v1073_v24 = vld [vmem:[#allocation2 + $0x1] ss:$2 sm:$0xff]  ;;  %v985_v45 = vsel %vm6121_vm2, %v4701_v57, %v942_v2  ;;  %vm6122_vm3 = vcmp.ge.f32.partialorder %v4704_v9, 0.0  ;;  %1026 = vst.msk [vmem:[#allocation2 + $0x60] sm:$0xff] %vm470_vm1, %v983_v35  ;;  %vm6123_vm4 = vcmp.ge.f32.partialorder %v4707_v31, 0.0  ;;  %vm6124_vm5 = vcmp.ge.f32.partialorder %v4713_v46, 0.0 }
 0x1ea   :  { %v986_v51 = vsel %vm6122_vm3, %v4704_v9, %v943_v5  ;;  %v987_v11 = vsel %vm6123_vm4, %v4707_v31, %v944_v18  ;;  %v989_v15 = vsel %vm6124_vm5, %v4713_v46, %v946_v17  ;;  %vm6125_vm7 = vcmp.ge.f32.partialorder %v4718_v48, 0.0  ;;  %1028 = vst.msk [vmem:[#allocation2 + $0x70] sm:$0xff] %vm470_vm1, %v985_v45  ;;  %1027 = vst.msk [vmem:[#allocation2 + $0x68] sm:$0xff] %vm470_vm1, %v984_v26  ;;  %v1075_v9 = vld [vmem:[#allocation2 + $0x11] ss:$2 sm:$0xff] }
 0x1eb   :  { %v990_v57 = vsel %vm6125_vm7, %v4718_v48, %v947_v21  ;;  %1029 = vst.msk [vmem:[#allocation2 + $0x78] sm:$0xff] %vm470_vm1, %v986_v51  ;;  %v997_v31 = vsel %vm911_vm9, %v4721_v52, %v954_v59  ;;  %vm6126_vm11 = vcmp.ge.f32.partialorder %v4728_v39, 0.0  ;;  %1030 = vst.msk [vmem:[#allocation2 + $0x80] sm:$0xff] %vm470_vm1, %v987_v11  ;;  %v3250_v48 = vpack.i.bf16 %v1075_v9, %v1073_v24  ;;  %v4959_v41 = vld [vmem:[#allocation2 + $0x1d] ss:$2 sm:$0xff] }
 0x1ec   :  { %v999_v46 = vsel %vm6126_vm11, %v4728_v39, %v956_v54  ;;  %1031 = vst.msk [vmem:[#allocation2 + $0x88] sm:$0xff] %vm470_vm1, %v988_v23  ;;  %1032 = vst.msk [vmem:[#allocation2 + $0x90] sm:$0xff] %vm470_vm1, %v989_v15  ;;  %vm6127_vm9 = vcmp.ge.f32.partialorder %v4731_v29, 0.0  ;;  %vm6128_vm8 = vcmp.ge.f32.partialorder %v4734_v40, 0.0  ;;  %vm6129_vm15 = vcmp.ge.f32.partialorder %v4737_v33, 0.0 }
 0x1ed   :  { %1033 = vst.msk [vmem:[#allocation2 + $0x98] sm:$0xff] %vm470_vm1, %v990_v57  ;;  %v1000_v52 = vsel %vm6127_vm9, %v4731_v29, %v957_v14  ;;  %v1001_v34 = vsel %vm6128_vm8, %v4734_v40, %v958_v42  ;;  %v1002_v39 = vsel %vm6129_vm15, %v4737_v33, %v959_v3  ;;  %1040 = vst.msk [vmem:[#allocation2 + $0xd0] sm:$0xff] %vm470_vm1, %v997_v31  ;;  %vm6130_vm2 = vcmp.ge.f32.partialorder %v4743_v56, 0.0  ;;  %v1095_v37 = vld [vmem:[#allocation2 + $0x32] ss:$2 sm:$0xff] }
 0x1ee   :  { %1041 = vst.msk [vmem:[#allocation2 + $0xd8] sm:$0xff] %vm470_vm1, %v998_v38  ;;  %1042 = vst.msk [vmem:[#allocation2 + $0xe0] sm:$0xff] %vm470_vm1, %v999_v46  ;;  %v1003_v25 = vsel %vm917_vm10, %v4740_v10, %v960_v12  ;;  %v1004_v29 = vsel %vm6130_vm2, %v4743_v56, %v961_v16  ;;  %vm6131_vm3 = vcmp.ge.f32.partialorder %v4746_v43, 0.0  ;;  %vm6132_vm4 = vcmp.ge.f32.partialorder %v4749_v47, 0.0  ;;  %v1909_v10 = vld [vmem:[#allocation2 + $0xbb] ss:$2 sm:$0xff]  ;;  %3251 = vrot.lane.b32.xlu1 %v3250_v48, %s3871_s13 }
 0x1ef   :  { %v1005_v40 = vsel %vm6131_vm3, %v4746_v43, %v962_v7  ;;  %v1006_v33 = vsel %vm6132_vm4, %v4749_v47, %v963_v13  ;;  %1043 = vst.msk [vmem:[#allocation2 + $0xe8] sm:$0xff] %vm470_vm1, %v1000_v52  ;;  %1044 = vst.msk [vmem:[#allocation2 + $0xf0] sm:$0xff] %vm470_vm1, %v1001_v34  ;;  %v1007_v56 = vsel %vm921_vm13, %v4752_v58, %v964_v61  ;;  %v4947_v58 = vld [vmem:[#allocation2 + $0x2d] ss:$2 sm:$0xff]  ;;  %v4957_v49 = vld [vmem:[#allocation2 + $0x3d] ss:$2 sm:$0xff] }
 0x1f0   :  { %1045 = vst.msk [vmem:[#allocation2 + $0xf8] sm:$0xff] %vm470_vm1, %v1002_v39  ;;  %v1008_v43 = vsel %vm922_vm6, %v4755_v19, %v965_v6  ;;  %v1009_v47 = vsel %vm923_vm0, %v4758_v20, %v966_v22  ;;  %v1010_v50 = vsel %vm924_vm12, %v4771_v28, %v967_v32  ;;  %1046 = vst.msk [vmem:[#allocation2 + $0x100] sm:$0xff] %vm470_vm1, %v1003_v25  ;;  %v1081_v55 = vld [vmem:[#allocation2 + $0x41] ss:$2 sm:$0xff]  ;;  %v1083_v28 = vld [vmem:[#allocation2 + $0x51] ss:$2 sm:$0xff] }
 0x1f1   :  { %1047 = vst.msk [vmem:[#allocation2 + $0x108] sm:$0xff] %vm470_vm1, %v1004_v29  ;;  %1048 = vst.msk [vmem:[#allocation2 + $0x110] sm:$0xff] %vm470_vm1, %v1005_v40  ;;  %v1011_v19 = vsel %vm925_vm14, %v4775_v30, %v968_v8  ;;  %v3260_v20 = vpack.i.bf16 %v1909_v10, %v1095_v37  ;;  %v1087_v53 = vld [vmem:[#allocation2 + $0x71] ss:$2 sm:$0x1]  ;;  %v3570_v30 = vpack.i.bf16 %v4947_v58, %v4959_v41  ;;  %vm1757_vm0 = vcmask 195584  }
 0x1f2   :  { %1049 = vst.msk [vmem:[#allocation2 + $0x118] sm:$0xff] %vm470_vm1, %v1006_v33  ;;  %1050 = vst.msk [vmem:[#allocation2 + $0x120] sm:$0xff] %vm470_vm1, %v1007_v56  ;;  %v1085_v2 = vld [vmem:[#allocation2 + $0x61] ss:$2 sm:$0xff]  ;;  %v3255_v1 = vpack.i.bf16 %v1087_v53, %v1081_v55  ;;  %v1923_v18 = vld [vmem:[#allocation2 + $0xac] ss:$2 sm:$0xff] }
 0x1f3   :  { %1051 = vst.msk [vmem:[#allocation2 + $0x128] sm:$0xff] %vm470_vm1, %v1008_v43  ;;  %1052 = vst.msk [vmem:[#allocation2 + $0x130] sm:$0xff] %vm470_vm1, %v1009_v47  ;;  %3261 = vrot.lane.b32.xlu1 %v3260_v20, %s3870_s3  ;;  %v1109_v5 = vld [vmem:[#allocation2 + $0x23] ss:$2 sm:$0xff]  ;;  %v3270_v27 = vpack.i.bf16 %v1085_v2, %v1083_v28  ;;  %v1097_v21 = vld [vmem:[#allocation2 + $0x42] ss:$2 sm:$0xff] }
 0x1f4   :  { %1053 = vst.msk [vmem:[#allocation2 + $0x138] sm:$0xff] %vm470_vm1, %v1010_v50  ;;  %1054 = vst.msk [vmem:[#allocation2 + $0x140] sm:$0xff] %vm470_vm1, %v1011_v19  ;;  %v4964_v60 = vld [vmem:[#allocation2 + $0xc6] ss:$2 sm:$0xff]  ;;  %3256 = vrot.lane.b32.xlu0 %v3255_v1, %s3871_s13  ;;  %v3265_v59 = vpack.i.bf16 %v1109_v5, %v1923_v18  ;;  %v1939_v14 = vld [vmem:[#allocation2 + $0xb6] ss:$2 sm:$0xff] }
 0x1f5   :  { %v3520_v17 = vpack.i.bf16 %v4957_v49, %v4964_v60  ;;  %v1103_v62 = vld [vmem:[#allocation2 + $0x72] ss:$2 sm:$0x1]  ;;  %v1089_v44 = vld [vmem:[#allocation2 + $0x2] ss:$2 sm:$0xff]  ;;  %v3290_v12 = vpack.i.bf16 %v4947_v58, %v1939_v14  ;;  %v3310_v45 = vpack.i.bf16 %v4964_v60, %v4957_v49  ;;  %vm1766_vm6 = vcmask 261120  }
 0x1f6   :  { %v1091_v54 = vld [vmem:[#allocation2 + $0x12] ss:$2 sm:$0xff]  ;;  %v3280_v4 = vpack.i.bf16 %v1103_v62, %v1097_v21  ;;  %v1111_v3 = vld [vmem:[#allocation2 + $0x33] ss:$2 sm:$0xff]  ;;  %v1105_v16 = vld [vmem:[#allocation2 + $0x3] ss:$2 sm:$0xff] }
 0x1f7   :  { %3271 = vrot.lane.b32.xlu1 %v3270_v27, %s3871_s13  ;;  %v3275_v42 = vpack.i.bf16 %v1091_v54, %v1089_v44  ;;  %v1925_v63 = vld [vmem:[#allocation2 + $0xbc] ss:$2 sm:$0xff]  ;;  %v1107_v7 = vld [vmem:[#allocation2 + $0x13] ss:$2 sm:$0xff]  ;;  %v1113_v8 = vld [vmem:[#allocation2 + $0x43] ss:$2 sm:$0xff] }
 0x1f8   :  { %3266 = vrot.lane.b32.xlu0 %v3265_v59, %s3872_s14  ;;  %v3285_v0 = vpack.i.bf16 %v1925_v63, %v1111_v3  ;;  %v1099_v13 = vld [vmem:[#allocation2 + $0x52] ss:$2 sm:$0xff]  ;;  %v1101_v61 = vld [vmem:[#allocation2 + $0x62] ss:$2 sm:$0xff]  ;;  %v3300_v6 = vpack.i.bf16 %v1107_v7, %v1105_v16  ;;  %v4978_v22 = vld [vmem:[#allocation2 + $0xd3] ss:$2 sm:$0xff] }
 0x1f9   :  { %v4976_v36 = vld [vmem:[#allocation2 + $0x4a] ss:$2 sm:$0xff]  ;;  %6134 = vst [vmem:[#allocation5_spill] sm:$0xff] %v4978_v22  ;;  %v3295_v32 = vpack.i.bf16 %v1101_v61, %v1099_v13  ;;  %v1119_v24 = vld [vmem:[#allocation2 + $0x73] ss:$2 sm:$0x1] }
 0x1fa   :  { %6133 = vst [vmem:[#allocation4_spill] sm:$0xff] %v4976_v36  ;;  %v4983_v26 = vld [vmem:[#allocation2 + $0x3a] ss:$2 sm:$0xff]  ;;  %v1115_v51 = vld [vmem:[#allocation2 + $0x53] ss:$2 sm:$0xff]  ;;  %v3305_v15 = vpack.i.bf16 %v1119_v24, %v1113_v8  ;;  %vm6150_vm10 = vcmask 130048  }
 0x1fb   :  { %3281 = vrot.lane.b32.xlu1 %v3280_v4, %s3870_s3  ;;  %6135 = vst [vmem:[#allocation6_spill] sm:$0xff] %v4983_v26  ;;  %v1117_v11 = vld [vmem:[#allocation2 + $0x63] ss:$2 sm:$0xff]  ;;  %v4988_v23 = vld [vmem:[#allocation2 + $0x2a] ss:$2 sm:$0xff]  ;;  %vm6151_vm12 = vmmov %vm6150_vm10  ;;  %vm1775_vm13 = vcmask 326656  }
 0x1fc   :  { %3276 = vrot.lane.b32.xlu0 %v3275_v42, %s3870_s3  ;;  %6136 = vst [vmem:[#allocation7_spill] sm:$0xff] %v4988_v23  ;;  %v1141_v9 = vld [vmem:[#allocation2 + $0x2e] ss:$2 sm:$0xff]  ;;  %v1955_v31 = vld [vmem:[#allocation2 + $0xb7] ss:$2 sm:$0xff]  ;;  %v3320_v38 = vpack.i.bf16 %v1117_v11, %v1115_v51  ;;  %vm6152_vm14 = vmmov %vm6150_vm10  ;;  %vm1784_vm7 = vcmask 392192  }
 0x1fd   :  { %v4994_v46 = vld [vmem:[#allocation2 + $0x4d] ss:$2 sm:$0xff]  ;;  %v1135_v48 = vld [vmem:[#allocation2 + $0x7d] ss:$2 sm:$0x1]  ;;  %v3315_v52 = vpack.i.bf16 %v1141_v9, %v1955_v31  ;;  %vm6153_vm5 = vmmov %vm6150_vm10  ;;  %vm1793_vm11 = vcmask 457728  }
 0x1fe   :  { %v1121_v34 = vld [vmem:[#allocation2 + $0xd] ss:$2 sm:$0xff]  ;;  %v3330_v39 = vpack.i.bf16 %v1135_v48, %v4994_v46  ;;  %v1971_v29 = vld [vmem:[#allocation2 + $0xb8] ss:$2 sm:$0xff]  ;;  %v5011_v28 = vld [vmem:[#allocation2 + $0x5d] ss:$2 sm:$0xff] }
 0x1ff   :  { %3291 = vrot.lane.b32.xlu1 %v3290_v12, %s3873_s15  ;;  %v1157_v25 = vld [vmem:[#allocation2 + $0x2f] ss:$2 sm:$0xff]  ;;  %v3325_v40 = vpack.i.bf16 %v4959_v41, %v1121_v34  ;;  %v1143_v33 = vld [vmem:[#allocation2 + $0x3e] ss:$2 sm:$0xff]  ;;  %v1137_v43 = vld [vmem:[#allocation2 + $0xe] ss:$2 sm:$0xff] }
 0x200   :  { %3286 = vrot.lane.b32.xlu0 %v3285_v0, %s3872_s14  ;;  %v1957_v37 = vld [vmem:[#allocation2 + $0xc7] ss:$2 sm:$0xff]  ;;  %v3340_v10 = vpack.i.bf16 %v1157_v25, %v1971_v29  ;;  %v5002_v56 = vld [vmem:[#allocation2 + $0xe6] ss:$2 sm:$0xff]  ;;  %v5007_v55 = vld [vmem:[#allocation2 + $0xf6] ss:$2 sm:$0xff] }
 0x201   :  { %6137 = vst [vmem:[#allocation8_spill] sm:$0xff] %v5002_v56  ;;  %v1139_v47 = vld [vmem:[#allocation2 + $0x1e] ss:$2 sm:$0xff]  ;;  %v3335_v19 = vpack.i.bf16 %v1957_v37, %v1143_v33  ;;  %6139 = vst [vmem:[#allocation10_spill] sm:$0xff] %v5007_v55  ;;  %v5013_v53 = vld [vmem:[#allocation2 + $0x6d] ss:$2 sm:$0xff] }
 0x202   :  { %v5004_v50 = vld [vmem:[#allocation2 + $0x106] ss:$2 sm:$0xff]  ;;  %v3350_v2 = vpack.i.bf16 %v1139_v47, %v1137_v43  ;;  %v5016_v1 = vld [vmem:[#allocation2 + $0x116] ss:$2 sm:$0xff]  ;;  %v1159_v5 = vld [vmem:[#allocation2 + $0x3f] ss:$2 sm:$0xff]  ;;  %v3345_v21 = vpack.i.bf16 %v5013_v53, %v5011_v28 }
 0x203   :  { %3301 = vrot.lane.b32.xlu1 %v3300_v6, %s3872_s14  ;;  %6138 = vst [vmem:[#allocation9_spill] sm:$0xff] %v5004_v50  ;;  %6140 = vst [vmem:[#allocation11_spill] sm:$0xff] %v5016_v1  ;;  %v1973_v18 = vld [vmem:[#allocation2 + $0xc8] ss:$2 sm:$0xff]  ;;  %v5027_v3 = vld [vmem:[#allocation2 + $0xb9] ss:$2 sm:$0xff] }
 0x204   :  { %3296 = vrot.lane.b32.xlu0 %v3295_v32, %s3870_s3  ;;  %v1145_v62 = vld [vmem:[#allocation2 + $0x4e] ss:$2 sm:$0xff]  ;;  %v1151_v59 = vld [vmem:[#allocation2 + $0x7e] ss:$2 sm:$0x1]  ;;  %v3360_v44 = vpack.i.bf16 %v1973_v18, %v1159_v5  ;;  %vm6156_vm9 = vmmov %vm6153_vm5  ;;  %vm1802_vm4 = vcmask 523264  }
 0x205   :  { %v1147_v54 = vld [vmem:[#allocation2 + $0x5e] ss:$2 sm:$0xff]  ;;  %v1149_v4 = vld [vmem:[#allocation2 + $0x6e] ss:$2 sm:$0xff]  ;;  %v3355_v14 = vpack.i.bf16 %v1151_v59, %v1145_v62  ;;  %v1161_v12 = vld [vmem:[#allocation2 + $0x4f] ss:$2 sm:$0xff] }
 0x206   :  { %v5025_v42 = vld [vmem:[#allocation2 + $0x30] ss:$2 sm:$0xff]  ;;  %v3370_v63 = vpack.i.bf16 %v1149_v4, %v1147_v54  ;;  %v1167_v16 = vld [vmem:[#allocation2 + $0x7f] ss:$2 sm:$0x1]  ;;  %vm6157_vm8 = vmmov %vm6153_vm5 }
 0x207   :  { %3311 = vrot.lane.b32.xlu1 %v3310_v45, %s3873_s15  ;;  %v3365_v7 = vpack.i.bf16 %v5025_v42, %v5027_v3  ;;  %v1153_v0 = vld [vmem:[#allocation2 + $0xf] ss:$2 sm:$0xff]  ;;  %v1155_v13 = vld [vmem:[#allocation2 + $0x1f] ss:$2 sm:$0xff]  ;;  %v3380_v61 = vpack.i.bf16 %v1167_v16, %v1161_v12  ;;  %v1895_v6 = vld [vmem:[#allocation2 + $0xca] ss:$2 sm:$0xff] }
 0x208   :  { %3306 = vrot.lane.b32.xlu0 %v3305_v15, %s3872_s14  ;;  %v1899_v32 = vld [vmem:[#allocation2 + $0xea] ss:$2 sm:$0xff]  ;;  %v3375_v8 = vpack.i.bf16 %v1155_v13, %v1153_v0  ;;  %v5037_v45 = vld [vmem:[#allocation2 + $0xc9] ss:$2 sm:$0xff]  ;;  %v1897_v9 = vld [vmem:[#allocation2 + $0xda] ss:$2 sm:$0xff] }
 0x209   :  { %v5035_v24 = vld [vmem:[#allocation2 + $0x40] ss:$2 sm:$0xff]  ;;  %6141 = vst [vmem:[#allocation12_spill] sm:$0xff] %v5037_v45  ;;  %v3390_v51 = vpack.i.bf16 %v1899_v32, %v1895_v6  ;;  %v1990_v11 = vld [vmem:[#allocation2 + $0xc3] ss:$2 sm:$0xff]  ;;  %vm6158_vm15 = vmmov %vm6153_vm5 }
 0x20a   :  { %v3385_v15 = vpack.i.bf16 %v5037_v45, %v5035_v24  ;;  %v1901_v31 = vld [vmem:[#allocation2 + $0xfa] ss:$2 sm:$0xff]  ;;  %v1165_v25 = vld [vmem:[#allocation2 + $0x6f] ss:$2 sm:$0xff]  ;;  %vm6159_vm2 = vmmov %vm6153_vm5 }
 0x20b   :  { %3321 = vrot.lane.b32.xlu1 %v3320_v38, %s3872_s14  ;;  %v3400_v38 = vpack.i.bf16 %v4983_v26, %v1990_v11  ;;  %v5045_v48 = vld [vmem:[#allocation2 + $0x10] ss:$2 sm:$0xff]  ;;  %v3395_v34 = vpack.i.bf16 %v1897_v9, %v1901_v31  ;;  %v1170_v37 = vld [vmem:[#allocation2 + $0x80] ss:$2 sm:$0x1]  ;;  %vm6162_vm3 = vmmov %vm6159_vm2 }
 0x20c   :  { %3316 = vrot.lane.b32.xlu0 %v3315_v52, %s3874_s16  ;;  %v5047_v52 = vld [vmem:[#allocation2 + $0x20] ss:$2 sm:$0xff]  ;;  %v5054_v33 = vld [vmem:[#allocation2 + $0x50] ss:$2 sm:$0xff]  ;;  %v1911_v43 = vld [vmem:[#allocation2 + $0xcb] ss:$2 sm:$0xff] }
 0x20d   :  { %v3410_v29 = vpack.i.bf16 %v5047_v52, %v5045_v48  ;;  %v1915_v47 = vld [vmem:[#allocation2 + $0xeb] ss:$2 sm:$0xff]  ;;  %v1905_v5 = vld [vmem:[#allocation2 + $0x11a] ss:$2 sm:$0x1] }
 0x20e   :  { %v3430_v18 = vpack.i.bf16 %v1915_v47, %v1911_v43  ;;  %v2006_v62 = vld [vmem:[#allocation2 + $0xc4] ss:$2 sm:$0xff]  ;;  %v1917_v54 = vld [vmem:[#allocation2 + $0xfb] ss:$2 sm:$0xff]  ;;  %v1194_v0 = vld [vmem:[#allocation2 + $0x4b] ss:$2 sm:$0xff] }
 0x20f   :  { %3331 = vrot.lane.b32.xlu1 %v3330_v39, %s3873_s15  ;;  %v1163_v39 = vld [vmem:[#allocation2 + $0x5f] ss:$2 sm:$0xff]  ;;  %v5065_v12 = vld [vmem:[#allocation2 + $0x60] ss:$2 sm:$0xff]  ;;  %v1168_v16 = vld [vmem:[#allocation2 + $0x70] ss:$2 sm:$0xff] }
 0x210   :  { %3326 = vrot.lane.b32.xlu0 %v3325_v40, %s3873_s15  ;;  %v3405_v40 = vpack.i.bf16 %v1165_v25, %v1163_v39  ;;  %v2008_v13 = vld [vmem:[#allocation2 + $0xd4] ss:$2 sm:$0xff]  ;;  %v1186_v32 = vld [vmem:[#allocation2 + $0x8a] ss:$2 sm:$0x1] }
 0x211   :  { %v5071_v6 = vld [vmem:[#allocation2 + $0x5a] ss:$2 sm:$0xff]  ;;  %v1919_v9 = vld [vmem:[#allocation2 + $0x10b] ss:$2 sm:$0xff] }
 0x212   :  { %v1931_v11 = vld [vmem:[#allocation2 + $0xec] ss:$2 sm:$0xff]  ;;  %v1921_v31 = vld [vmem:[#allocation2 + $0x11b] ss:$2 sm:$0x1] }
 0x213   :  { %3341 = vrot.lane.b32.xlu1 %v3340_v10, %s3875_s1  ;;  %v3420_v10 = vpack.i.bf16 %v4978_v22, %v4976_v36  ;;  %v2022_v39 = vld [vmem:[#allocation2 + $0xc5] ss:$2 sm:$0xff]  ;;  %v3465_v25 = vpack.i.bf16 %v1921_v31, %v1919_v9  ;;  %v5191_v20 = vld [vmem:[#allocation2 + $0xe2] ss:$2 sm:$0xff] }
 0x214   :  { %3336 = vrot.lane.b32.xlu0 %v3335_v19, %s3874_s16  ;;  %v3415_v19 = vpack.i.bf16 %v1170_v37, %v5054_v33  ;;  %v1190_v43 = vld [vmem:[#allocation2 + $0x2b] ss:$2 sm:$0xff]  ;;  %v5238_v26 = vld [vmem:[#allocation2 + $0x88] ss:$2 sm:$0xff] }
 0x215   :  { %v5189_v27 = vld [vmem:[#allocation2 + $0x59] ss:$2 sm:$0xff] }
 0x217   :  { %3351 = vrot.lane.b32.xlu1 %v3350_v2, %s3874_s16  ;;  %v1903_v2 = vld [vmem:[#allocation2 + $0x10a] ss:$2 sm:$0xff] }
 0x218   :  { %3346 = vrot.lane.b32.xlu0 %v3345_v21, %s3873_s15  ;;  %v1192_v21 = vld [vmem:[#allocation2 + $0x3b] ss:$2 sm:$0xff]  ;;  %v3425_v59 = vpack.i.bf16 %v1905_v5, %v1903_v2  ;;  %v5082_v2 = vld [vmem:[#allocation2 + $0x6a] ss:$2 sm:$0xff] }
 0x219   :  { %v3440_v4 = vpack.i.bf16 %v1192_v21, %v2006_v62  ;;  %6143 = vst [vmem:[#allocation14_spill] sm:$0xff] %v5082_v2  ;;  %v2024_v21 = vld [vmem:[#allocation2 + $0xd5] ss:$2 sm:$0xff] }
 0x21b   :  { %3361 = vrot.lane.b32.xlu1 %v3360_v44, %s3875_s1  ;;  %v1913_v44 = vld [vmem:[#allocation2 + $0xdb] ss:$2 sm:$0xff] }
 0x21c   :  { %3356 = vrot.lane.b32.xlu0 %v3355_v14, %s3874_s16  ;;  %v1172_v14 = vld [vmem:[#allocation2 + $0x1a] ss:$2 sm:$0xff] }
 0x21f   :  { %3371 = vrot.lane.b32.xlu1 %v3370_v63, %s3874_s16  ;;  %v3435_v63 = vpack.i.bf16 %v1913_v44, %v1917_v54  ;;  %v1202_v44 = vld [vmem:[#allocation2 + $0x8b] ss:$2 sm:$0x1] }
 0x220   :  { %3366 = vrot.lane.b32.xlu0 %v3365_v7, %s3876_s17  ;;  %v3450_v7 = vpack.i.bf16 %v4988_v23, %v1172_v14  ;;  %v5236_v23 = vld [vmem:[#allocation2 + $0x78] ss:$2 sm:$0xff] }
 0x223   :  { %3381 = vrot.lane.b32.xlu1 %v3380_v61, %s3875_s1  ;;  %v3445_v61 = vpack.i.bf16 %v1168_v16, %v5065_v12  ;;  %v1937_v16 = vld [vmem:[#allocation2 + $0x11c] ss:$2 sm:$0x1] }
 0x224   :  { %3376 = vrot.lane.b32.xlu0 %v3375_v8, %s3875_s1  ;;  %v3460_v8 = vpack.i.bf16 %v2008_v13, %v1194_v0  ;;  %v1204_v13 = vld [vmem:[#allocation2 + $0x1c] ss:$2 sm:$0xff] }
 0x227   :  { %3391 = vrot.lane.b32.xlu1 %v3390_v51, %s3871_s13  ;;  %v1927_v51 = vld [vmem:[#allocation2 + $0xcc] ss:$2 sm:$0xff] }
 0x228   :  { %3386 = vrot.lane.b32.xlu0 %v3385_v15, %s3876_s17  ;;  %v3455_v15 = vpack.i.bf16 %v1186_v32, %v5071_v6  ;;  %v3515_v32 = vpack.i.bf16 %v5002_v56, %v5004_v50 }
 0x22b   :  { %3401 = vrot.lane.b32.xlu1 %v3400_v38, %s3877_s18  ;;  %v3470_v38 = vpack.i.bf16 %v1931_v11, %v1927_v51  ;;  %v1198_v11 = vld [vmem:[#allocation2 + $0x6b] ss:$2 sm:$0xff] }
 0x22c   :  { %3396 = vrot.lane.b32.xlu0 %v3395_v34, %s3871_s13  ;;  %v1208_v34 = vld [vmem:[#allocation2 + $0x3c] ss:$2 sm:$0xff] }
 0x22d   :  { %v3480_v37 = vpack.i.bf16 %v1208_v34, %v2022_v39  ;;  %v1218_v34 = vld [vmem:[#allocation2 + $0x8c] ss:$2 sm:$0x1] }
 0x22f   :  { %3411 = vrot.lane.b32.xlu1 %v3410_v29, %s3876_s17  ;;  %v1929_v29 = vld [vmem:[#allocation2 + $0xdc] ss:$2 sm:$0xff] }
 0x230   :  { %3406 = vrot.lane.b32.xlu0 %v3405_v40, %s3875_s1  ;;  %v1933_v40 = vld [vmem:[#allocation2 + $0xfc] ss:$2 sm:$0xff] }
 0x231   :  { %v3475_v47 = vpack.i.bf16 %v1929_v29, %v1933_v40  ;;  %v1953_v40 = vld [vmem:[#allocation2 + $0x126] ss:$2 sm:$0x1] }
 0x233   :  { %3421 = vrot.lane.b32.xlu1 %v3420_v10, %s3877_s18  ;;  %v1188_v10 = vld [vmem:[#allocation2 + $0x1b] ss:$2 sm:$0xff] }
 0x234   :  { %3416 = vrot.lane.b32.xlu0 %v3415_v19, %s3876_s17  ;;  %v5080_v19 = vld [vmem:[#allocation2 + $0x7a] ss:$2 sm:$0xff]  ;;  %v3490_v5 = vpack.i.bf16 %v1190_v43, %v1188_v10  ;;  %v1227_v43 = vld [vmem:[#allocation2 + $0x47] ss:$2 sm:$0xff] }
 0x235   :  { %6142 = vst [vmem:[#allocation13_spill] sm:$0xff] %v5080_v19  ;;  %v3485_v62 = vpack.i.bf16 %v5080_v19, %v5082_v2  ;;  %v5207_v19 = vld [vmem:[#allocation2 + $0xe3] ss:$2 sm:$0xff] }
 0x237   :  { %3431 = vrot.lane.b32.xlu1 %v3430_v18, %s3870_s3  ;;  %v1210_v18 = vld [vmem:[#allocation2 + $0x4c] ss:$2 sm:$0xff] }
 0x238   :  { %3426 = vrot.lane.b32.xlu0 %v3425_v59, %s3871_s13  ;;  %v1196_v59 = vld [vmem:[#allocation2 + $0x5b] ss:$2 sm:$0xff]  ;;  %v3500_v54 = vpack.i.bf16 %v2024_v21, %v1210_v18  ;;  %v3545_v18 = vpack.i.bf16 %v1953_v40, %v5016_v1  ;;  %v1977_v40 = vld [vmem:[#allocation2 + $0xe8] ss:$2 sm:$0xff] }
 0x239   :  { %v3495_v14 = vpack.i.bf16 %v1202_v44, %v1196_v59  ;;  %v1965_v21 = vld [vmem:[#allocation2 + $0x107] ss:$2 sm:$0xff] }
 0x23b   :  { %3441 = vrot.lane.b32.xlu1 %v3440_v4, %s3878_s19  ;;  %v1943_v4 = vld [vmem:[#allocation2 + $0xd6] ss:$2 sm:$0xff] }
 0x23c   :  { %3436 = vrot.lane.b32.xlu0 %v3435_v63, %s3870_s3  ;;  %v1935_v63 = vld [vmem:[#allocation2 + $0x10c] ss:$2 sm:$0xff]  ;;  %v3540_v60 = vpack.i.bf16 %v1943_v4, %v4994_v46  ;;  %v1961_v46 = vld [vmem:[#allocation2 + $0xe7] ss:$2 sm:$0xff] }
 0x23d   :  { %v3505_v0 = vpack.i.bf16 %v1937_v16, %v1935_v63  ;;  %v1229_v16 = vld [vmem:[#allocation2 + $0x57] ss:$2 sm:$0xff] }
 0x23f   :  { %3451 = vrot.lane.b32.xlu1 %v3450_v7, %s3877_s18  ;;  %v3510_v7 = vpack.i.bf16 %v5007_v55, %v1943_v4  ;;  %v1214_v4 = vld [vmem:[#allocation2 + $0x6c] ss:$2 sm:$0xff] }
 0x240   :  { %3446 = vrot.lane.b32.xlu0 %v3445_v61, %s3876_s17  ;;  %v1206_v61 = vld [vmem:[#allocation2 + $0x2c] ss:$2 sm:$0xff] }
 0x241   :  { %v3530_v9 = vpack.i.bf16 %v1206_v61, %v1204_v13  ;;  %v1221_v61 = vld [vmem:[#allocation2 + $0x8d] ss:$2 sm:$0x1] }
 0x243   :  { %3461 = vrot.lane.b32.xlu1 %v3460_v8, %s3878_s19  ;;  %v5100_v8 = vpop.permute.xlu1 %3246  ;;  %v5102_v51 = vpop.permute.xlu0 %3236 }
 0x244   :  { %3456 = vrot.lane.b32.xlu0 %v3455_v15, %s3877_s18  ;;  %v1200_v15 = vld [vmem:[#allocation2 + $0x7b] ss:$2 sm:$0xff]  ;;  %v3239_v1 = vunpack.i.h.bf16 %v5102_v51  ;;  %v3238_v55 = vunpack.i.l.bf16 %v5102_v51  ;;  %v3248_v2 = vunpack.i.l.bf16 %v5100_v8  ;;  %v5250_v51 = vld [vmem:[#allocation2 + $0x99] ss:$2 sm:$0x1] }
 0x245   :  { %v3525_v31 = vpack.i.bf16 %v1200_v15, %v1198_v11  ;;  %v1975_v15 = vld [vmem:[#allocation2 + $0xd8] ss:$2 sm:$0xff] }
 0x246   :  { %v1743_v22 = vsel %vm470_vm1, %v5047_v52, %v3239_v1 }
 0x247   :  { %3471 = vrot.lane.b32.xlu1 %v3470_v38, %s3872_s14  ;;  %v1212_v38 = vld [vmem:[#allocation2 + $0x5c] ss:$2 sm:$0xff] }
 0x248   :  { %3466 = vrot.lane.b32.xlu0 %v3465_v25, %s3870_s3  ;;  %v1963_v25 = vld [vmem:[#allocation2 + $0xf7] ss:$2 sm:$0xff]  ;;  %v3535_v29 = vpack.i.bf16 %v1218_v34, %v1212_v38  ;;  %v3575_v38 = vpack.i.bf16 %v1221_v61, %v5011_v28 }
 0x249   :  { %v1967_v34 = vld [vmem:[#allocation2 + $0x117] ss:$2 sm:$0xff] }
 0x24a   :  { %v5162_v61 = vld [vmem:[#allocation2 + $0xd9] ss:$2 sm:$0xff] }
 0x24b   :  { %3481 = vrot.lane.b32.xlu1 %v3480_v37, %s3879_s20  ;;  %6144 = vst [vmem:[#allocation15_spill] sm:$0xff] %v5162_v61 }
 0x24c   :  { %3476 = vrot.lane.b32.xlu0 %v3475_v47, %s3872_s14  ;;  %v2041_v47 = vld [vmem:[#allocation2 + $0xd0] ss:$2 sm:$0xff] }
 0x24d   :  { %v3560_v59 = vpack.i.bf16 %v1227_v43, %v2041_v47  ;;  %v1223_v47 = vld [vmem:[#allocation2 + $0x27] ss:$2 sm:$0xff] }
 0x24f   :  { %3491 = vrot.lane.b32.xlu1 %v3490_v5, %s3878_s19 }
 0x250   :  { %3486 = vrot.lane.b32.xlu0 %v3485_v62, %s3877_s18 }
 0x252   :  { %v5107_v39 = vpop.permute.xlu0 %3241 }
 0x253   :  { %3501 = vrot.lane.b32.xlu1 %v3500_v54, %s3879_s20  ;;  %v3555_v54 = vpack.i.bf16 %v1961_v46, %v1965_v21  ;;  %v1219_v46 = vld [vmem:[#allocation2 + $0x7d] ss:$2 sm:$0xff] }
 0x254   :  { %3496 = vrot.lane.b32.xlu0 %v3495_v14, %s3878_s19  ;;  %v1216_v14 = vld [vmem:[#allocation2 + $0x7c] ss:$2 sm:$0xff]  ;;  %v5151_v21 = vld [vmem:[#allocation2 + $0x67] ss:$2 sm:$0xff]  ;;  %v3605_v35 = vpack.i.bf16 %v1219_v46, %v5013_v53 }
 0x255   :  { %v3565_v13 = vpack.i.bf16 %v1216_v14, %v1214_v4  ;;  %v1245_v14 = vld [vmem:[#allocation2 + $0x58] ss:$2 sm:$0xff]  ;;  %v1875_v53 = vld [vmem:[#allocation2 + $0xa9] ss:$2 sm:$0xff] }
 0x256   :  { %v2559_v36 = vsel %vm470_vm1, %v1875_v53, %v3238_v55 }
 0x257   :  { %3511 = vrot.lane.b32.xlu1 %v3510_v7, %s3873_s15  ;;  %v2043_v7 = vld [vmem:[#allocation2 + $0xe0] ss:$2 sm:$0xff] }
 0x258   :  { %3506 = vrot.lane.b32.xlu0 %v3505_v0, %s3872_s14  ;;  %v3580_v11 = vpack.i.bf16 %v2043_v7, %v1229_v16  ;;  %v2059_v16 = vld [vmem:[#allocation2 + $0xe1] ss:$2 sm:$0xff]  ;;  %v5158_v7 = vld [vmem:[#allocation2 + $0x118] ss:$2 sm:$0xff] }
 0x259   :  { %v3620_v56 = vpack.i.bf16 %v2059_v16, %v1245_v14  ;;  %v5220_v16 = vld [vmem:[#allocation2 + $0x103] ss:$2 sm:$0xff] }
 0x25b   :  { %3521 = vrot.lane.b32.xlu1 %v3520_v17, %s3880_s21  ;;  %v1959_v17 = vld [vmem:[#allocation2 + $0xd7] ss:$2 sm:$0xff] }
 0x25c   :  { %3516 = vrot.lane.b32.xlu0 %v3515_v32, %s3873_s15  ;;  %v3550_v10 = vpack.i.bf16 %v1963_v25, %v1959_v17  ;;  %v2057_v17 = vld [vmem:[#allocation2 + $0xd1] ss:$2 sm:$0xff] }
 0x25f   :  { %3531 = vrot.lane.b32.xlu1 %v3530_v9, %s3879_s20  ;;  %v1979_v9 = vld [vmem:[#allocation2 + $0xf8] ss:$2 sm:$0xff] }
 0x260   :  { %3526 = vrot.lane.b32.xlu0 %v3525_v31, %s3878_s19  ;;  %v5109_v49 = vpop.permute.xlu1 %3251  ;;  %v3590_v41 = vpack.i.bf16 %v1979_v9, %v1975_v15  ;;  %v5166_v15 = vld [vmem:[#allocation2 + $0xe9] ss:$2 sm:$0xff] }
 0x261   :  { %v5168_v9 = vld [vmem:[#allocation2 + $0x109] ss:$2 sm:$0xff] }
 0x263   :  { %3541 = vrot.lane.b32.xlu1 %v3540_v60, %s3880_s21  ;;  %v1969_v60 = vld [vmem:[#allocation2 + $0x127] ss:$2 sm:$0x1] }
 0x264   :  { %3536 = vrot.lane.b32.xlu0 %v3535_v29, %s3879_s20  ;;  %v3585_v29 = vpack.i.bf16 %v1969_v60, %v1967_v34  ;;  %v5172_v34 = vld [vmem:[#allocation2 + $0xd2] ss:$2 sm:$0xff]  ;;  %v5174_v60 = vld [vmem:[#allocation2 + $0x77] ss:$2 sm:$0xff] }
 0x265   :  { %v5114_v37 = vpop.permute.xlu1 %3261 }
 0x266   :  { %v5116_v5 = vpop.permute.xlu0 %3256  ;;  %v3264_v1 = vunpack.i.h.bf16 %v5114_v37  ;;  %v3263_v52 = vunpack.i.l.bf16 %v5114_v37 }
 0x267   :  { %3551 = vrot.lane.b32.xlu1 %v3550_v10, %s3874_s16  ;;  %v1981_v10 = vld [vmem:[#allocation2 + $0x108] ss:$2 sm:$0xff]  ;;  %v3259_v53 = vunpack.i.h.bf16 %v5116_v5 }
 0x268   :  { %3546 = vrot.lane.b32.xlu0 %v3545_v18, %s3873_s15  ;;  %v1225_v18 = vld [vmem:[#allocation2 + $0x37] ss:$2 sm:$0xff]  ;;  %v3595_v4 = vpack.i.bf16 %v1977_v40, %v1981_v10  ;;  %v5183_v40 = vld [vmem:[#allocation2 + $0x38] ss:$2 sm:$0xff] }
 0x269   :  { %v5121_v62 = vpop.permute.xlu1 %3271  ;;  %v5185_v10 = vld [vmem:[#allocation2 + $0x98] ss:$2 sm:$0x1] }
 0x26a   :  { %v5123_v44 = vpop.permute.xlu0 %3266 }
 0x26b   :  { %3561 = vrot.lane.b32.xlu1 %v3560_v59, %s3881_s22  ;;  %v5153_v59 = vld [vmem:[#allocation2 + $0x97] ss:$2 sm:$0x1] }
 0x26c   :  { %3556 = vrot.lane.b32.xlu0 %v3555_v54, %s3874_s16 }
 0x26d   :  { %v5127_v63 = vpop.permute.xlu1 %3281 }
 0x26e   :  { %v5129_v0 = vpop.permute.xlu0 %3276 }
 0x26f   :  { %3571 = vrot.lane.b32.xlu1 %v3570_v30, %s3880_s21  ;;  %v1243_v30 = vld [vmem:[#allocation2 + $0x48] ss:$2 sm:$0xff] }
 0x270   :  { %3566 = vrot.lane.b32.xlu0 %v3565_v13, %s3879_s20  ;;  %v3600_v43 = vpack.i.bf16 %v1243_v30, %v2057_v17  ;;  %v5160_v13 = vld [vmem:[#allocation2 + $0x128] ss:$2 sm:$0x1]  ;;  %v3610_v17 = vpack.i.bf16 %v1225_v18, %v1223_v47  ;;  %v3615_v47 = vpack.i.bf16 %v5153_v59, %v5151_v21  ;;  %v5199_v18 = vld [vmem:[#allocation2 + $0x119] ss:$2 sm:$0xff] }
 0x271   :  { %v5136_v32 = vpop.permute.xlu1 %3291  ;;  %6147 = vst [vmem:[#allocation18_spill] sm:$0xff] %v5199_v18  ;;  %v3625_v50 = vpack.i.bf16 %v5160_v13, %v5158_v7  ;;  %v5222_v7 = vld [vmem:[#allocation2 + $0xf3] ss:$2 sm:$0xff]  ;;  %v2567_v18 = vsel %vm6151_vm12, %v2559_v36, %v3248_v2  ;;  %v3268_v36 = vunpack.i.l.bf16 %v5123_v44  ;;  %v3273_v2 = vunpack.i.l.bf16 %v5121_v62  ;;  %vm6181_vm12 = vmmov %vm6159_vm2 }
 0x272   :  { %v5138_v31 = vpop.permute.xlu0 %3286  ;;  %v5224_v13 = vld [vmem:[#allocation2 + $0x113] ss:$2 sm:$0xff] }
 0x273   :  { %3581 = vrot.lane.b32.xlu1 %v3580_v11, %s3881_s22  ;;  %v5164_v11 = vld [vmem:[#allocation2 + $0xf9] ss:$2 sm:$0xff]  ;;  %v5248_v59 = vld [vmem:[#allocation2 + $0x69] ss:$2 sm:$0xff] }
 0x274   :  { %3576 = vrot.lane.b32.xlu0 %v3575_v38, %s3880_s21  ;;  %6145 = vst [vmem:[#allocation16_spill] sm:$0xff] %v5164_v11  ;;  %v5170_v38 = vld [vmem:[#allocation2 + $0x49] ss:$2 sm:$0xff]  ;;  %v3630_v21 = vpack.i.bf16 %v5164_v11, %v5162_v61  ;;  %v5240_v11 = vld [vmem:[#allocation2 + $0x39] ss:$2 sm:$0xff]  ;;  %v3249_v61 = vunpack.i.h.bf16 %v5100_v8  ;;  %6149 = vst [vmem:[#allocation20_spill] sm:$0xff] %v5248_v59  ;;  %v3243_v8 = vunpack.i.l.bf16 %v5107_v39  ;;  %v3258_v59 = vunpack.i.l.bf16 %v5116_v5 }
 0x275   :  { %v5143_v58 = vpop.permute.xlu1 %3301 }
 0x276   :  { %v5145_v25 = vpop.permute.xlu0 %3296  ;;  %v1751_v14 = vsel %vm6150_vm10, %v1743_v22, %v3249_v61  ;;  %v1744_v37 = vsel %vm470_vm1, %v5025_v42, %v3243_v8  ;;  %v3269_v22 = vunpack.i.h.bf16 %v5123_v44  ;;  %v1071_v61 = vld [vmem:[#allocation2 + $0x70] ss:$2 sm:$0x1]  ;;  %v3279_v44 = vunpack.i.h.bf16 %v5129_v0  ;;  %vm6166_vm10 = vmmov %vm6159_vm2 }
 0x277   :  { %3591 = vrot.lane.b32.xlu1 %v3590_v41, %s3875_s1  ;;  %v5176_v41 = vld [vmem:[#allocation2 + $0x87] ss:$2 sm:$0xff]  ;;  %v1752_v5 = vsel %vm6153_vm5, %v1744_v37, %v3263_v52  ;;  %vm1811_vm5 = vcmask 588800  }
 0x278   :  { %3586 = vrot.lane.b32.xlu0 %v3585_v29, %s3874_s16  ;;  %v5181_v29 = vld [vmem:[#allocation2 + $0x28] ss:$2 sm:$0xff] }
 0x279   :  { %v5149_v28 = vpop.permute.xlu1 %3311 }
 0x27a   :  { %v5155_v54 = vpop.permute.xlu0 %3306 }
 0x27b   :  { %3601 = vrot.lane.b32.xlu1 %v3600_v43, %s3882_s23  ;;  %v5187_v43 = vld [vmem:[#allocation2 + $0x68] ss:$2 sm:$0xff] }
 0x27c   :  { %3596 = vrot.lane.b32.xlu0 %v3595_v4, %s3875_s1  ;;  %v5201_v4 = vld [vmem:[#allocation2 + $0x129] ss:$2 sm:$0x1] }
 0x27d   :  { %v5179_v30 = vpop.permute.xlu1 %3321 }
 0x27e   :  { %6146 = vst [vmem:[#allocation17_spill] sm:$0xff] %v5179_v30  ;;  %v5193_v57 = vpop.permute.xlu0 %3316  ;;  %v3254_v30 = vunpack.i.h.bf16 %v5109_v49 }
 0x27f   :  { %3611 = vrot.lane.b32.xlu1 %v3610_v17, %s3881_s22  ;;  %v3244_v17 = vunpack.i.h.bf16 %v5107_v39 }
 0x280   :  { %3606 = vrot.lane.b32.xlu0 %v3605_v35, %s3880_s21  ;;  %v5226_v35 = vld [vmem:[#allocation2 + $0x29] ss:$2 sm:$0xff]  ;;  %v1742_v39 = vsel %vm470_vm1, %v5045_v48, %v3254_v30  ;;  %v3284_v30 = vunpack.i.h.bf16 %v5127_v63 }
 0x281   :  { %v5210_v46 = vpop.permute.xlu1 %3331 }
 0x282   :  { %v5245_v45 = vpop.permute.xlu0 %3326 }
 0x283   :  { %6148 = vst [vmem:[#allocation19_spill] sm:$0xff] %v5245_v45  ;;  %3621 = vrot.lane.b32.xlu1 %v3620_v56, %s3882_s23  ;;  %v3253_v45 = vunpack.i.l.bf16 %v5109_v49  ;;  %v1057_v49 = vld [vmem:[#allocation2] ss:$2 sm:$0xff] }
 0x284   :  { %3616 = vrot.lane.b32.xlu0 %v3615_v47, %s3881_s22  ;;  %v2560_v47 = vsel %vm470_vm1, %v5027_v3, %v3244_v17  ;;  %v3274_v3 = vunpack.i.h.bf16 %v5121_v62  ;;  %v3278_v62 = vunpack.i.l.bf16 %v5129_v0  ;;  %v3288_v0 = vunpack.i.l.bf16 %v5138_v31 }
 0x285   :  { %v5261_v56 = vpop.permute.xlu1 %3341  ;;  %v1741_v17 = vsel %vm470_vm1, %v1057_v49, %v3253_v45  ;;  %v2568_v48 = vsel %vm6152_vm14, %v2560_v47, %v3264_v1  ;;  %v3283_v45 = vunpack.i.l.bf16 %v5127_v63  ;;  %v6154_v1 = vpack.i.bf16 %v5170_v38, %v5172_v34  ;;  %vm6182_vm14 = vmmov %vm6159_vm2 }
 0x286   :  { %v5280_v55 = vpop.permute.xlu0 %3336  ;;  %v1745_v63 = vsel %vm470_vm1, %v5035_v24, %v3258_v59  ;;  %v5314_v52 = vsel %vm470_vm1, %v5065_v12, %v3274_v3  ;;  %v3293_v49 = vunpack.i.l.bf16 %v5136_v32  ;;  %v1760_v47 = vsel %vm1757_vm0, %v1751_v14, %v3269_v22 }
 0x287   :  { %3631 = vrot.lane.b32.xlu1 %v3630_v21, %s3876_s17  ;;  %v1748_v21 = vsel %vm470_vm1, %v1071_v61, %v3259_v53  ;;  %v2575_v53 = vsel %vm1757_vm0, %v2567_v18, %v3268_v36  ;;  %v1746_v38 = vsel %vm470_vm1, %v5054_v33, %v3273_v2  ;;  %v3289_v34 = vunpack.i.h.bf16 %v5138_v31 }
 0x288   :  { %3626 = vrot.lane.b32.xlu0 %v3625_v50, %s3875_s1  ;;  %v3294_v50 = vunpack.i.h.bf16 %v5136_v32  ;;  %v6155_v24 = vpack.i.bf16 %v5166_v15, %v5168_v9  ;;  %v1756_v59 = vsel %vm6156_vm9, %v1748_v21, %v3284_v30  ;;  %v1753_v32 = vsel %vm6157_vm8, %v1745_v63, %v3283_v45  ;;  %v3858_v63 = vld [vmem:[%s6096_s4] sm:$0xff]   ;;  %vm6189_vm9 = vmmov %vm6159_vm2 }
 0x289   :  { %v5294_v42 = vpop.permute.xlu1 %3351  ;;  %v3304_v14 = vunpack.i.h.bf16 %v5143_v58  ;;  %v3303_v18 = vunpack.i.l.bf16 %v5143_v58  ;;  %v1749_v37 = vsel %vm6158_vm15, %v1741_v17, %v3278_v62  ;;  %v1750_v33 = vsel %vm6159_vm2, %v1742_v39, %v3279_v44  ;;  %3190 = vmatprep.subr.bf16.mxu1 %v3858_v63  ;;  %vm6190_vm8 = vmmov %vm6159_vm2 }
 0x28a   :  { %v5304_v8 = vpop.permute.xlu0 %3346  ;;  %v1769_v31 = vsel %vm1766_vm6, %v1760_v47, %v3294_v50  ;;  %v3298_v3 = vunpack.i.l.bf16 %v5145_v25  ;;  %v6160_v36 = vpack.i.bf16 %v5183_v40, %v5181_v29  ;;  %v1761_v2 = vsel %vm1757_vm0, %v1752_v5, %v3288_v0  ;;  %3191 = vmatpush3.bf16.msra.mxu1 %v3858_v63  ;;  %v6171_v63 = vld [vmem:[#allocation4_spill] sm:$0xff] }
 0x28b   :  { %3641 = vrot.lane.b32.xlu1 %v6154_v1, %s3883_s24  ;;  %v2583_v61 = vsel %vm1766_vm6, %v2575_v53, %v3293_v49  ;;  %v3308_v58 = vunpack.i.l.bf16 %v5155_v54  ;;  %v3319_v17 = vunpack.i.h.bf16 %v5193_v57  ;;  %v2576_v39 = vsel %vm1757_vm0, %v2568_v48, %v3289_v34 }
 0x28c   :  { %3636 = vrot.lane.b32.xlu0 %v6155_v24, %s3876_s17  ;;  %v3309_v30 = vunpack.i.h.bf16 %v5155_v54  ;;  %v3333_v45 = vunpack.i.l.bf16 %v5210_v46  ;;  %v3344_v21 = vunpack.i.h.bf16 %v5261_v56  ;;  %v6161_v29 = vpack.i.bf16 %v5176_v41, %v5174_v60 }
 0x28d   :  { %v5327_v12 = vpop.permute.xlu1 %3361  ;;  %v3299_v5 = vunpack.i.h.bf16 %v5145_v25  ;;  %v5357_v44 = vsel %vm1757_vm0, %v1749_v37, %v3303_v18  ;;  %v5360_v48 = vsel %vm1757_vm0, %v1750_v33, %v3304_v14  ;;  %v3334_v54 = vunpack.i.h.bf16 %v5210_v46 }
 0x28e   :  { %v3357_v22 = vpop.permute.xlu0 %3356  ;;  %v5364_v62 = vsel %vm6162_vm3, %v1746_v38, %v3298_v3  ;;  %v3314_v50 = vunpack.i.h.bf16 %v5149_v28  ;;  %v6163_v25 = vpack.i.bf16 %v5191_v20, %v5189_v27  ;;  %v1762_v46 = vsel %vm1757_vm0, %v1753_v32, %v3308_v58  ;;  %vm6195_vm3 = vmmov %vm6159_vm2 }
 0x28f   :  { %3651 = vrot.lane.b32.xlu1 %v6160_v36, %s3882_s23  ;;  %v3359_v1 = vunpack.i.h.bf16 %v3357_v22  ;;  %v3358_v60 = vunpack.i.l.bf16 %v3357_v22  ;;  %v3313_v0 = vunpack.i.l.bf16 %v5149_v28  ;;  %v1778_v49 = vsel %vm1775_vm13, %v1769_v31, %v3319_v17 }
 0x290   :  { %3646 = vrot.lane.b32.xlu0 %v6161_v29, %s3881_s22  ;;  %v1765_v53 = vsel %vm1757_vm0, %v1756_v59, %v3309_v30  ;;  %v3318_v38 = vunpack.i.l.bf16 %v5193_v57  ;;  %v1771_v34 = vsel %vm1766_vm6, %v1762_v46, %v3333_v45  ;;  %v1787_v20 = vsel %vm1784_vm7, %v1778_v49, %v3344_v21  ;;  %v3859_v57 = vld [vmem:[%s6096_s4 + $0x8] sm:$0xff]   ;;  %v6172_v46 = vld [vmem:[#allocation5_spill] sm:$0xff] }
 0x291   :  { %v5353_v40 = vpop.permute.xlu1 %3371  ;;  %v6164_v27 = vpack.i.bf16 %v5185_v10, %v5187_v43  ;;  %v1774_v28 = vsel %vm1766_vm6, %v1765_v53, %v3334_v54  ;;  %v3338_v18 = vunpack.i.l.bf16 %v5280_v55  ;;  %v3343_v37 = vunpack.i.l.bf16 %v5261_v56  ;;  %3192 = vmatprep.subr.bf16.mxu1 %v3859_v57 }
 0x292   :  { %v5367_v41 = vpop.permute.xlu0 %3366  ;;  %v1780_v10 = vsel %vm1775_vm13, %v1771_v34, %v3358_v60  ;;  %v1783_v43 = vsel %vm1775_vm13, %v1774_v28, %v3359_v1  ;;  %v6165_v31 = vpack.i.bf16 %v5220_v16, %v5207_v19  ;;  %v1755_v3 = vsel %vm6166_vm10, %v5314_v52, %v3299_v5  ;;  %v6167_v52 = vld [vmem:[#allocation18_spill] sm:$0xff]  ;;  %v6169_v5 = vld [vmem:[#allocation17_spill] sm:$0xff]  ;;  %3193 = vmatpush3.bf16.msra.mxu1 %v3859_v57 }
 0x293   :  { %3661 = vrot.lane.b32.xlu1 %v6163_v25, %s3883_s24  ;;  %v3369_v47 = vunpack.i.h.bf16 %v5367_v41  ;;  %v3339_v22 = vunpack.i.h.bf16 %v5280_v55  ;;  %v1770_v58 = vsel %vm1766_vm6, %v1761_v2, %v3313_v0  ;;  %v2584_v17 = vsel %vm1766_vm6, %v2576_v39, %v3314_v50  ;;  %v6170_v2 = vld [vmem:[#allocation19_spill] sm:$0xff] }
 0x294   :  { %3656 = vrot.lane.b32.xlu0 %v6164_v27, %s3882_s23  ;;  %v3364_v30 = vunpack.i.h.bf16 %v5327_v12  ;;  %v3363_v45 = vunpack.i.l.bf16 %v5327_v12  ;;  %v6168_v21 = vpack.i.bf16 %v5201_v4, %v6167_v52  ;;  %v2591_v29 = vsel %vm1775_vm13, %v2583_v61, %v3318_v38  ;;  %v3860_v12 = vld [vmem:[%s6096_s4 + $0x10] sm:$0xff]  }
 0x295   :  { %v3382_v24 = vpop.permute.xlu1 %3381  ;;  %v1796_v32 = vsel %vm1793_vm11, %v1787_v20, %v3369_v47  ;;  %v3324_v54 = vunpack.i.h.bf16 %v6169_v5  ;;  %v3323_v1 = vunpack.i.l.bf16 %v6169_v5  ;;  %v3329_v60 = vunpack.i.h.bf16 %v6170_v2  ;;  %3194 = vmatprep.subr.bf16.mxu1 %v3860_v12 }
 0x296   :  { %v3384_v14 = vunpack.i.h.bf16 %v3382_v24  ;;  %v3383_v59 = vunpack.i.l.bf16 %v3382_v24  ;;  %v5397_v33 = vpop.permute.xlu0 %3376  ;;  %v3328_v39 = vunpack.i.l.bf16 %v6170_v2  ;;  %v1779_v4 = vsel %vm1775_vm13, %v1770_v58, %v3338_v18  ;;  %3195 = vmatpush3.bf16.msra.mxu1 %v3860_v12 }
 0x297   :  { %3671 = vrot.lane.b32.xlu1 %v6165_v31, %s3877_s18  ;;  %v2599_v50 = vsel %vm1784_vm7, %v2591_v29, %v3343_v37  ;;  %v3368_v25 = vunpack.i.l.bf16 %v5367_v41  ;;  %v6173_v0 = vpack.i.bf16 %v6171_v63, %v6172_v46  ;;  %v2592_v49 = vsel %vm1775_vm13, %v2584_v17, %v3339_v22 }
 0x298   :  { %v5407_v36 = vsel %vm1784_vm7, %v1780_v10, %v3383_v59  ;;  %v5410_v56 = vsel %vm1784_vm7, %v1783_v43, %v3384_v14  ;;  %3666 = vrot.lane.b32.xlu0 %v6168_v21, %s3876_s17  ;;  %v3354_v47 = vunpack.i.h.bf16 %v5294_v42  ;;  %v3349_v34 = vunpack.i.h.bf16 %v5304_v8 }
 0x299   :  { %v5420_v55 = vpop.permute.xlu1 %3391  ;;  %v3353_v20 = vunpack.i.l.bf16 %v5294_v42  ;;  %v1788_v41 = vsel %vm1784_vm7, %v1779_v4, %v3363_v45  ;;  %v2600_v27 = vsel %vm1784_vm7, %v2592_v49, %v3364_v30  ;;  %v6174_v24 = vpack.i.bf16 %v5222_v7, %v5224_v13  ;;  %v3861_v42 = vld [vmem:[%s6096_s4 + $0x18] sm:$0xff]  }
 0x29a   :  { %v3387_v61 = vpop.permute.xlu0 %3386  ;;  %v3348_v37 = vunpack.i.l.bf16 %v5304_v8  ;;  %v2607_v10 = vsel %vm1793_vm11, %v2599_v50, %v3368_v25  ;;  %v3379_v43 = vunpack.i.h.bf16 %v5397_v33  ;;  %v3378_v31 = vunpack.i.l.bf16 %v5397_v33  ;;  %3196 = vmatprep.subr.bf16.mxu1 %v3861_v42  ;;  %v5504_v25 = vld [vmem:[#allocation2 + $0x123] ss:$2 sm:$0xff] }
 0x29b   :  { %3681 = vrot.lane.b32.xlu1 %v6173_v0, %s3884_s10  ;;  %v3389_v53 = vunpack.i.h.bf16 %v3387_v61  ;;  %v3388_v38 = vunpack.i.l.bf16 %v3387_v61  ;;  %v6175_v58 = vpack.i.bf16 %v5240_v11, %v5226_v35  ;;  %v1763_v17 = vsel %vm1757_vm0, %v5364_v62, %v3323_v1  ;;  %3197 = vmatpush3.bf16.msra.mxu1 %v3861_v42  ;;  %v2004_v61 = vld [vmem:[#allocation2 + $0x133] ss:$2 sm:$0x1] }
 0x29c   :  { %3676 = vrot.lane.b32.xlu0 %v6174_v24, %s3877_s18  ;;  %v1764_v30 = vsel %vm1757_vm0, %v1755_v3, %v3324_v54  ;;  %v1767_v33 = vsel %vm1766_vm6, %v5357_v44, %v3328_v39  ;;  %v1768_v52 = vsel %vm1766_vm6, %v5360_v48, %v3329_v60  ;;  %v3374_v11 = vunpack.i.h.bf16 %v5353_v40  ;;  %v2010_v44 = vld [vmem:[#allocation2 + $0xe4] ss:$2 sm:$0xff] }
 0x29d   :  { %v3402_v28 = vpop.permute.xlu1 %3401  ;;  %v5448_v14 = vsel %vm1793_vm11, %v1788_v41, %v3388_v38  ;;  %v5451_v59 = vsel %vm1793_vm11, %v2600_v27, %v3389_v53  ;;  %v3373_v35 = vunpack.i.l.bf16 %v5353_v40  ;;  %v6176_v62 = vpack.i.bf16 %v5238_v26, %v5236_v23  ;;  %v2014_v54 = vld [vmem:[#allocation2 + $0x104] ss:$2 sm:$0xff]  ;;  %v1267_v41 = vld [vmem:[#allocation2 + $0x89] ss:$2 sm:$0xff] }
 0x29e   :  { %v3404_v57 = vunpack.i.h.bf16 %v3402_v28  ;;  %v3403_v18 = vunpack.i.l.bf16 %v3402_v28  ;;  %v5460_v22 = vpop.permute.xlu0 %3396  ;;  %v1776_v3 = vsel %vm1775_vm13, %v1767_v33, %v3353_v20  ;;  %v1777_v21 = vsel %vm1775_vm13, %v1768_v52, %v3354_v47  ;;  %v3862_v48 = vld [vmem:[%s6096_s4 + $0x20] sm:$0xff]   ;;  %v3863_v27 = vld [vmem:[%s6096_s4 + $0x28] sm:$0xff]  }
 0x29f   :  { %3691 = vrot.lane.b32.xlu1 %v6175_v58, %s3883_s24  ;;  %v1772_v40 = vsel %vm1766_vm6, %v1763_v17, %v3348_v37  ;;  %v1773_v1 = vsel %vm1766_vm6, %v1764_v30, %v3349_v34  ;;  %v1785_v26 = vsel %vm1784_vm7, %v1776_v3, %v3378_v31  ;;  %v1786_v23 = vsel %vm1784_vm7, %v1777_v21, %v3379_v43  ;;  %v1265_v20 = vld [vmem:[#allocation2 + $0x79] ss:$2 sm:$0xff]  ;;  %v2012_v43 = vld [vmem:[#allocation2 + $0xf4] ss:$2 sm:$0xff]  ;;  %v6183_v21 = vld [vmem:[#allocation14_spill] sm:$0xff] }
 0x2a0   :  { %v5470_v8 = vsel %vm1802_vm4, %v1796_v32, %v3404_v57  ;;  %v5473_v45 = vsel %vm1802_vm4, %v2607_v10, %v3403_v18  ;;  %3686 = vrot.lane.b32.xlu0 %v6176_v62, %s3882_s23  ;;  %v6177_v60 = vpack.i.bf16 %v5207_v19, %v5071_v6  ;;  %3198 = vmatprep.subr.bf16.mxu1 %v3862_v48  ;;  %v6178_v6 = vld [vmem:[#allocation20_spill] sm:$0xff]  ;;  %v3393_v24 = vunpack.i.l.bf16 %v5420_v55 }
 0x2a1   :  { %v3412_v32 = vpop.permute.xlu1 %3411  ;;  %v1781_v63 = vsel %vm1775_vm13, %v1772_v40, %v3373_v35  ;;  %v1782_v46 = vsel %vm1775_vm13, %v1773_v1, %v3374_v11  ;;  %v6179_v19 = vpack.i.bf16 %v5250_v51, %v6178_v6  ;;  %v3710_v49 = vpack.i.bf16 %v2014_v54, %v2010_v44  ;;  %3199 = vmatpush3.bf16.msra.mxu1 %v3862_v48  ;;  %v2016_v31 = vld [vmem:[#allocation2 + $0x114] ss:$2 sm:$0xff]  ;;  %v2026_v40 = vld [vmem:[#allocation2 + $0xe5] ss:$2 sm:$0xff] }
 0x2a2   :  { %v3414_v29 = vunpack.i.h.bf16 %v3412_v32  ;;  %v3413_v5 = vunpack.i.l.bf16 %v3412_v32  ;;  %v3407_v2 = vpop.permute.xlu0 %3406  ;;  %v3394_v51 = vunpack.i.h.bf16 %v5420_v55  ;;  %v3705_v57 = vpack.i.bf16 %v2004_v61, %v5504_v25  ;;  %3200 = vmatprep.subr.bf16.mxu1 %v3863_v27  ;;  %v1272_v17 = vld [vmem:[#allocation2 + $0x9a] ss:$2 sm:$0x1]  ;;  %v2030_v1 = vld [vmem:[#allocation2 + $0x105] ss:$2 sm:$0xff] }
 0x2a3   :  { %3701 = vrot.lane.b32.xlu1 %v6177_v60, %s3884_s10  ;;  %v3409_v12 = vunpack.i.h.bf16 %v3407_v2  ;;  %v3408_v39 = vunpack.i.l.bf16 %v3407_v2  ;;  %v3720_v58 = vpack.i.bf16 %v1267_v41, %v1265_v20  ;;  %v6180_v35 = vld [vmem:[#allocation12_spill] sm:$0xff]  ;;  %v2020_v61 = vld [vmem:[#allocation2 + $0x134] ss:$2 sm:$0x1]  ;;  %vm1820_vm15 = vcmask 654336  }
 0x2a4   :  { %v5499_v4 = vsel %vm1793_vm11, %v1785_v26, %v3413_v5  ;;  %v5502_v50 = vsel %vm1793_vm11, %v1786_v23, %v3414_v29  ;;  %3696 = vrot.lane.b32.xlu0 %v6179_v19, %s3883_s24  ;;  %v2563_v11 = vsel %vm470_vm1, %v5166_v15, %v3394_v51  ;;  %v2561_v62 = vsel %vm470_vm1, %v6180_v35, %v3393_v24  ;;  %v3865_v26 = vld [vmem:[%s6096_s4 + $0x38] sm:$0xff]  }
 0x2a5   :  { %v3422_v0 = vpop.permute.xlu1 %3421  ;;  %v5513_v47 = vsel %vm1784_vm7, %v1781_v63, %v3408_v39  ;;  %v5516_v53 = vsel %vm1784_vm7, %v1782_v46, %v3409_v12  ;;  %3201 = vmatpush3.bf16.msra.mxu1 %v3863_v27  ;;  %v3730_v29 = vpack.i.bf16 %v1272_v17, %v6183_v21  ;;  %v3399_v5 = vunpack.i.h.bf16 %v5460_v22  ;;  %v2018_v39 = vld [vmem:[#allocation2 + $0x124] ss:$2 sm:$0xff]  ;;  %v6185_v6 = vld [vmem:[#allocation16_spill] sm:$0xff] }
 0x2a6   :  { %v3424_v38 = vunpack.i.h.bf16 %v3422_v0  ;;  %v3423_v34 = vunpack.i.l.bf16 %v3422_v0  ;;  %v3417_v28 = vpop.permute.xlu0 %3416  ;;  %v3398_v15 = vunpack.i.l.bf16 %v5460_v22  ;;  %v6184_v63 = vld [vmem:[#allocation15_spill] sm:$0xff]  ;;  %v6186_v0 = vld [vmem:[#allocation6_spill] sm:$0xff]  ;;  %vm2708_vm10 = vcmask 1041408  }
 0x2a7   :  { %3711 = vrot.lane.b32.xlu1 %v3710_v49, %s3878_s19  ;;  %v3419_v18 = vunpack.i.h.bf16 %v3417_v28  ;;  %v3418_v42 = vunpack.i.l.bf16 %v3417_v28  ;;  %v2562_v46 = vsel %vm470_vm1, %v6184_v63, %v3399_v5  ;;  %v6187_v49 = vld [vmem:[#allocation7_spill] sm:$0xff]  ;;  %v3735_v28 = vpack.i.bf16 %v2020_v61, %v2018_v39  ;;  %v1889_v39 = vld [vmem:[#allocation2 + $0x119] ss:$2 sm:$0x1] }
 0x2a8   :  { %v5527_v37 = vsel %vm1802_vm4, %v5448_v14, %v3423_v34  ;;  %v5531_v10 = vsel %vm1802_vm4, %v5451_v59, %v3424_v38  ;;  %3706 = vrot.lane.b32.xlu0 %v3705_v57, %s3877_s18  ;;  %v3864_v59 = vld [vmem:[%s6096_s4 + $0x30] sm:$0xff]   ;;  %v2564_v19 = vsel %vm470_vm1, %v6185_v6, %v3398_v15  ;;  %v6188_v38 = vpack.i.bf16 %v6186_v0, %v6187_v49 }
 0x2a9   :  { %v3432_v55 = vpop.permute.xlu1 %3431  ;;  %v5536_v30 = vsel %vm1793_vm11, %v5407_v36, %v3418_v42  ;;  %v5540_v14 = vsel %vm1793_vm11, %v5410_v56, %v3419_v18  ;;  %v3715_v36 = vpack.i.bf16 %v2012_v43, %v2016_v31  ;;  %3202 = vmatprep.subr.bf16.mxu1 %v3864_v59  ;;  %v3740_v34 = vpack.i.bf16 %v2030_v1, %v2026_v40  ;;  %v1270_v20 = vld [vmem:[#allocation2 + $0x8a] ss:$2 sm:$0xff]  ;;  %v2028_v31 = vld [vmem:[#allocation2 + $0xf5] ss:$2 sm:$0xff] }
 0x2aa   :  { %v3434_v33 = vunpack.i.h.bf16 %v3432_v55  ;;  %v3433_v52 = vunpack.i.l.bf16 %v3432_v55  ;;  %v5549_v32 = vpop.permute.xlu0 %3426  ;;  %3203 = vmatpush3.bf16.msra.mxu1 %v3864_v59  ;;  %v2032_v55 = vld [vmem:[#allocation2 + $0x115] ss:$2 sm:$0xff]  ;;  %v2037_v40 = vld [vmem:[#allocation2 + $0x126] ss:$2 sm:$0xff] }
 0x2ab   :  { %3721 = vrot.lane.b32.xlu1 %v3720_v58, %s3883_s24  ;;  %3204 = vmatprep.subr.bf16.mxu1 %v3865_v26  ;;  %v6191_v58 = vld [vmem:[#allocation13_spill] sm:$0xff]  ;;  %v2036_v5 = vld [vmem:[#allocation2 + $0x135] ss:$2 sm:$0x1]  ;;  %v3428_v15 = vunpack.i.l.bf16 %v5549_v32 }
 0x2ac   :  { %v5553_v56 = vsel %vm6181_vm12, %v2561_v62, %v3433_v52  ;;  %v5556_v3 = vsel %vm6182_vm14, %v2563_v11, %v3434_v33  ;;  %3716 = vrot.lane.b32.xlu0 %v3715_v36, %s3878_s19  ;;  %v3750_v17 = vpack.i.bf16 %v1270_v20, %v6191_v58  ;;  %v2039_v1 = vld [vmem:[#allocation2 + $0x136] ss:$2 sm:$0x1]  ;;  %vm2684_vm12 = vcmask 1040384  }
 0x2ad   :  { %v3442_v44 = vpop.permute.xlu1 %3441  ;;  %v2565_v6 = vsel %vm470_vm1, %v5168_v9, %v3428_v15  ;;  %v3770_v0 = vpack.i.bf16 %v2039_v1, %v2037_v40  ;;  %v2069_v1 = vld [vmem:[#allocation2 + $0x131] ss:$2 sm:$0xff]  ;;  %vm2710_vm14 = vcmask 1046528  }
 0x2ae   :  { %v3444_v54 = vunpack.i.h.bf16 %v3442_v44  ;;  %v3443_v48 = vunpack.i.l.bf16 %v3442_v44  ;;  %v3437_v23 = vpop.permute.xlu0 %3436  ;;  %3205 = vmatpush3.bf16.msra.mxu1 %v3865_v26 }
 0x2af   :  { %3731 = vrot.lane.b32.xlu1 %v3730_v29, %s3884_s10  ;;  %v3439_v2 = vunpack.i.h.bf16 %v3437_v23  ;;  %v3438_v60 = vunpack.i.l.bf16 %v3437_v23  ;;  %v2034_v29 = vld [vmem:[#allocation2 + $0x125] ss:$2 sm:$0xff] }
 0x2b0   :  { %v5568_v22 = vsel %vm1811_vm5, %v5470_v8, %v3444_v54  ;;  %v5572_v12 = vsel %vm1811_vm5, %v5473_v45, %v3443_v48  ;;  %3726 = vrot.lane.b32.xlu0 %v6188_v38, %s3884_s10  ;;  %v3755_v23 = vpack.i.bf16 %v2036_v5, %v2034_v29 }
 0x2b1   :  { %v3452_v8 = vpop.permute.xlu1 %3451  ;;  %v5583_v45 = vsel %vm6189_vm9, %v2562_v46, %v3439_v2  ;;  %v5586_v41 = vsel %vm6190_vm8, %v2564_v19, %v3438_v60  ;;  %v6192_v2 = vld [vmem:[#allocation9_spill] sm:$0xff]  ;;  %vm2706_vm9 = vcmask 1044480   ;;  %vm2715_vm8 = vcmask 1045504  }
 0x2b2   :  { %v3454_v27 = vunpack.i.h.bf16 %v3452_v8  ;;  %v3453_v51 = vunpack.i.l.bf16 %v3452_v8  ;;  %v3447_v24 = vpop.permute.xlu0 %3446 }
 0x2b3   :  { %3741 = vrot.lane.b32.xlu1 %v3740_v34, %s3879_s20  ;;  %v3449_v57 = vunpack.i.h.bf16 %v3447_v24  ;;  %v3448_v18 = vunpack.i.l.bf16 %v3447_v24  ;;  %v2051_v34 = vld [vmem:[#allocation2 + $0x120] ss:$2 sm:$0xff] }
 0x2b4   :  { %v5591_v42 = vsel %vm1802_vm4, %v5499_v4, %v3453_v51  ;;  %v5595_v43 = vsel %vm1802_vm4, %v5502_v50, %v3454_v27  ;;  %3736 = vrot.lane.b32.xlu0 %v3735_v28, %s3878_s19  ;;  %v3745_v50 = vpack.i.bf16 %v2028_v31, %v2032_v55  ;;  %v2045_v28 = vld [vmem:[#allocation2 + $0xf0] ss:$2 sm:$0xff] }
 0x2b5   :  { %v3462_v33 = vpop.permute.xlu1 %3461  ;;  %v5601_v52 = vsel %vm1793_vm11, %v5513_v47, %v3448_v18  ;;  %v5605_v59 = vsel %vm1793_vm11, %v5516_v53, %v3449_v57  ;;  %v3429_v53 = vunpack.i.h.bf16 %v5549_v32  ;;  %v6193_v32 = vld [vmem:[#allocation8_spill] sm:$0xff]  ;;  %v6196_v18 = vld [vmem:[#allocation10_spill] sm:$0xff]  ;;  %v6197_v31 = vld [vmem:[#allocation11_spill] sm:$0xff] }
 0x2b6   :  { %v3464_v4 = vunpack.i.h.bf16 %v3462_v33  ;;  %v3463_v11 = vunpack.i.l.bf16 %v3462_v33  ;;  %v3457_v35 = vpop.permute.xlu0 %3456  ;;  %v6194_v60 = vpack.i.bf16 %v6192_v2, %v6193_v32  ;;  %v2049_v57 = vld [vmem:[#allocation2 + $0x110] ss:$2 sm:$0xff]  ;;  %v6198_v55 = vpack.i.bf16 %v6196_v18, %v6197_v31 }
 0x2b7   :  { %3751 = vrot.lane.b32.xlu1 %v3750_v17, %s3884_s10  ;;  %v3459_v62 = vunpack.i.h.bf16 %v3457_v35  ;;  %v3458_v36 = vunpack.i.l.bf16 %v3457_v35  ;;  %v2566_v46 = vsel %vm470_vm1, %v1889_v39, %v3429_v53  ;;  %v2065_v35 = vld [vmem:[#allocation2 + $0x111] ss:$2 sm:$0xff]  ;;  %v2055_v53 = vld [vmem:[#allocation2 + $0x140] ss:$2 sm:$0x1]  ;;  %vm1829_vm1 = vcmask 719872  }
 0x2b8   :  { %v5610_v21 = vsel %vm1811_vm5, %v5527_v37, %v3463_v11  ;;  %v5614_v47 = vsel %vm1811_vm5, %v5531_v10, %v3464_v4  ;;  %3746 = vrot.lane.b32.xlu0 %v3745_v50, %s3879_s20  ;;  %v2061_v11 = vld [vmem:[#allocation2 + $0xf1] ss:$2 sm:$0xff]  ;;  %v2067_v39 = vld [vmem:[#allocation2 + $0x121] ss:$2 sm:$0xff] }
 0x2b9   :  { %v3472_v44 = vpop.permute.xlu1 %3471  ;;  %v5621_v54 = vsel %vm1802_vm4, %v5536_v30, %v3458_v36  ;;  %v5625_v37 = vsel %vm1802_vm4, %v5540_v14, %v3459_v62  ;;  %v3775_v62 = vpack.i.bf16 %v2049_v57, %v2045_v28 }
 0x2ba   :  { %v3474_v48 = vunpack.i.h.bf16 %v3472_v44  ;;  %v3473_v10 = vunpack.i.l.bf16 %v3472_v44  ;;  %v3467_v26 = vpop.permute.xlu0 %3466  ;;  %v3790_v44 = vpack.i.bf16 %v2065_v35, %v2061_v11  ;;  %v2085_v11 = vld [vmem:[#allocation2 + $0x132] ss:$2 sm:$0xff]  ;;  %v2087_v35 = vld [vmem:[#allocation2 + $0x142] ss:$2 sm:$0x1] }
 0x2bb   :  { %3761 = vrot.lane.b32.xlu1 %v6194_v60, %s3880_s21  ;;  %v3469_v61 = vunpack.i.h.bf16 %v3467_v26  ;;  %v3468_v63 = vunpack.i.l.bf16 %v3467_v26  ;;  %v2071_v26 = vld [vmem:[#allocation2 + $0x141] ss:$2 sm:$0x1] }
 0x2bc   :  { %v5633_v30 = vsel %vm1757_vm0, %v5553_v56, %v3473_v10  ;;  %v5637_v14 = vsel %vm1757_vm0, %v5556_v3, %v3474_v48  ;;  %3756 = vrot.lane.b32.xlu0 %v3755_v23, %s3879_s20  ;;  %v2047_v3 = vld [vmem:[#allocation2 + $0x100] ss:$2 sm:$0xff] }
 0x2bd   :  { %v3482_v19 = vpop.permute.xlu1 %3481  ;;  %v5644_v49 = vsel %vm6159_vm2, %v2565_v6, %v3468_v63  ;;  %v5647_v56 = vsel %vm6195_vm3, %v2566_v46, %v3469_v61  ;;  %v3780_v17 = vpack.i.bf16 %v2047_v3, %v2051_v34  ;;  %v3800_v63 = vpack.i.bf16 %v2071_v26, %v2069_v1 }
 0x2be   :  { %v3484_v38 = vunpack.i.h.bf16 %v3482_v19  ;;  %v3483_v8 = vunpack.i.l.bf16 %v3482_v19  ;;  %v3477_v20 = vpop.permute.xlu0 %3476  ;;  %vm2712_vm2 = vcmask 1043456  }
 0x2bf   :  { %3771 = vrot.lane.b32.xlu1 %v3770_v0, %s3880_s21  ;;  %v3479_v27 = vunpack.i.h.bf16 %v3477_v20  ;;  %v3478_v9 = vunpack.i.l.bf16 %v3477_v20  ;;  %v2079_v0 = vld [vmem:[#allocation2 + $0x102] ss:$2 sm:$0xff] }
 0x2c0   :  { %v5652_v51 = vsel %vm1820_vm15, %v5568_v22, %v3484_v38  ;;  %v5656_v24 = vsel %vm1820_vm15, %v5572_v12, %v3483_v8  ;;  %3766 = vrot.lane.b32.xlu0 %v6198_v55, %s3880_s21  ;;  %v2083_v38 = vld [vmem:[#allocation2 + $0x122] ss:$2 sm:$0xff] }
 0x2c1   :  { %v3492_v58 = vpop.permute.xlu1 %3491  ;;  %v5664_v33 = vsel %vm1757_vm0, %v5583_v45, %v3479_v27  ;;  %v5668_v22 = vsel %vm1757_vm0, %v5586_v41, %v3478_v9  ;;  %v2053_v41 = vld [vmem:[#allocation2 + $0x130] ss:$2 sm:$0xff]  ;;  %v3810_v28 = vpack.i.bf16 %v2079_v0, %v2083_v38 }
 0x2c2   :  { %v3494_v4 = vunpack.i.h.bf16 %v3492_v58  ;;  %v3493_v12 = vunpack.i.l.bf16 %v3492_v58  ;;  %v3487_v50 = vpop.permute.xlu0 %3486  ;;  %v3785_v23 = vpack.i.bf16 %v2055_v53, %v2053_v41  ;;  %v2077_v27 = vld [vmem:[#allocation2 + $0xf2] ss:$2 sm:$0xff]  ;;  %v2090_v41 = vld [vmem:[#allocation2 + $0x143] ss:$2 sm:$0x1] }
 0x2c3   :  { %3781 = vrot.lane.b32.xlu1 %v3780_v17, %s3881_s22  ;;  %v3489_v36 = vunpack.i.h.bf16 %v3487_v50  ;;  %v3488_v29 = vunpack.i.l.bf16 %v3487_v50  ;;  %v2081_v9 = vld [vmem:[#allocation2 + $0x112] ss:$2 sm:$0xff] }
 0x2c4   :  { %v5673_v5 = vsel %vm1811_vm5, %v5591_v42, %v3493_v12  ;;  %v5677_v45 = vsel %vm1811_vm5, %v5595_v43, %v3494_v4  ;;  %3776 = vrot.lane.b32.xlu0 %v3775_v62, %s3881_s22 }
 0x2c5   :  { %v3502_v15 = vpop.permute.xlu1 %3501  ;;  %v5682_v48 = vsel %vm1802_vm4, %v5601_v52, %v3488_v29  ;;  %v5686_v10 = vsel %vm1802_vm4, %v5605_v59, %v3489_v36  ;;  %v2063_v59 = vld [vmem:[#allocation2 + $0x101] ss:$2 sm:$0xff] }
 0x2c6   :  { %v3504_v42 = vunpack.i.h.bf16 %v3502_v15  ;;  %v3503_v40 = vunpack.i.l.bf16 %v3502_v15  ;;  %v3497_v43 = vpop.permute.xlu0 %3496  ;;  %v3795_v8 = vpack.i.bf16 %v2063_v59, %v2067_v39 }
 0x2c7   :  { %3791 = vrot.lane.b32.xlu1 %v3790_v44, %s3882_s23  ;;  %v3499_v2 = vunpack.i.h.bf16 %v3497_v43  ;;  %v3498_v32 = vunpack.i.l.bf16 %v3497_v43 }
 0x2c8   :  { %v5691_v60 = vsel %vm1820_vm15, %v5610_v21, %v3503_v40  ;;  %v5695_v52 = vsel %vm1820_vm15, %v5614_v47, %v3504_v42  ;;  %3786 = vrot.lane.b32.xlu0 %v3785_v23, %s3881_s22 }
 0x2c9   :  { %v3512_v61 = vpop.permute.xlu1 %3511  ;;  %v5700_v46 = vsel %vm1811_vm5, %v5621_v54, %v3498_v32  ;;  %v5704_v6 = vsel %vm1811_vm5, %v5625_v37, %v3499_v2 }
 0x2ca   :  { %v3514_v21 = vunpack.i.h.bf16 %v3512_v61  ;;  %v3513_v19 = vunpack.i.l.bf16 %v3512_v61  ;;  %v3507_v47 = vpop.permute.xlu0 %3506 }
 0x2cb   :  { %3801 = vrot.lane.b32.xlu1 %v3800_v63, %s3882_s23  ;;  %v3509_v3 = vunpack.i.h.bf16 %v3507_v47  ;;  %v3508_v34 = vunpack.i.l.bf16 %v3507_v47 }
 0x2cc   :  { %v2585_v20 = vsel %vm1766_vm6, %v5633_v30, %v3513_v19  ;;  %v2587_v54 = vsel %vm1766_vm6, %v5637_v14, %v3514_v21  ;;  %3796 = vrot.lane.b32.xlu0 %v3795_v8, %s3882_s23  ;;  %v3805_v30 = vpack.i.bf16 %v2081_v9, %v2077_v27 }
 0x2cd   :  { %v3522_v37 = vpop.permute.xlu1 %3521  ;;  %v2581_v57 = vsel %vm1757_vm0, %v5644_v49, %v3508_v34  ;;  %v2582_v18 = vsel %vm1757_vm0, %v5647_v56, %v3509_v3  ;;  %v3820_v49 = vpack.i.bf16 %v5224_v13, %v5222_v7  ;;  %vm1838_vm0 = vcmask 785408  }
 0x2ce   :  { %v3524_v31 = vunpack.i.h.bf16 %v3522_v37  ;;  %v3523_v55 = vunpack.i.l.bf16 %v3522_v37  ;;  %v3517_v58 = vpop.permute.xlu0 %3516 }
 0x2cf   :  { %3811 = vrot.lane.b32.xlu1 %v3810_v28, %s3883_s24  ;;  %v3519_v14 = vunpack.i.h.bf16 %v3517_v58  ;;  %v3518_v17 = vunpack.i.l.bf16 %v3517_v58 }
 0x2d0   :  { %v1832_v4 = vsel %vm1829_vm1, %v5652_v51, %v3524_v31  ;;  %v2639_v12 = vsel %vm1829_vm1, %v5656_v24, %v3523_v55  ;;  %3806 = vrot.lane.b32.xlu0 %v3805_v30, %s3883_s24  ;;  %v2088_v51 = vld [vmem:[#allocation2 + $0x133] ss:$2 sm:$0xff]  ;;  %v3815_v24 = vpack.i.bf16 %v2087_v35, %v2085_v11 }
 0x2d1   :  { %v3532_v56 = vpop.permute.xlu1 %3531  ;;  %v2586_v50 = vsel %vm1766_vm6, %v5664_v33, %v3519_v14  ;;  %v2588_v62 = vsel %vm1766_vm6, %v5668_v22, %v3518_v17  ;;  %v3830_v22 = vpack.i.bf16 %v2090_v41, %v2088_v51 }
 0x2d2   :  { %v3534_v36 = vunpack.i.h.bf16 %v3532_v56  ;;  %v3533_v29 = vunpack.i.l.bf16 %v3532_v56  ;;  %v3527_v53 = vpop.permute.xlu0 %3526 }
 0x2d3   :  { %3821 = vrot.lane.b32.xlu1 %v3820_v49, %s3884_s10  ;;  %v3529_v15 = vunpack.i.h.bf16 %v3527_v53  ;;  %v3528_v44 = vunpack.i.l.bf16 %v3527_v53 }
 0x2d4   :  { %v5731_v7 = vsel %vm1820_vm15, %v5673_v5, %v3533_v29  ;;  %v5735_v13 = vsel %vm1820_vm15, %v5677_v45, %v3534_v36  ;;  %3816 = vrot.lane.b32.xlu0 %v3815_v24, %s3883_s24  ;;  %v3825_v5 = vpack.i.bf16 %v5220_v16, %v5504_v25 }
 0x2d5   :  { %v3542_v33 = vpop.permute.xlu1 %3541  ;;  %v1817_v42 = vsel %vm1811_vm5, %v5682_v48, %v3528_v44  ;;  %v1818_v40 = vsel %vm1811_vm5, %v5686_v10, %v3529_v15 }
 0x2d6   :  { %v3544_v1 = vunpack.i.h.bf16 %v3542_v33  ;;  %v3543_v26 = vunpack.i.l.bf16 %v3542_v33  ;;  %v3537_v43 = vpop.permute.xlu0 %3536 }
 0x2d7   :  { %3831 = vrot.lane.b32.xlu1 %v3830_v22, %s3884_s10  ;;  %v3539_v45 = vunpack.i.h.bf16 %v3537_v43  ;;  %v3538_v23 = vunpack.i.l.bf16 %v3537_v43 }
 0x2d8   :  { %v5747_v2 = vsel %vm1829_vm1, %v5691_v60, %v3543_v26  ;;  %v5751_v48 = vsel %vm1829_vm1, %v5695_v52, %v3544_v1  ;;  %3826 = vrot.lane.b32.xlu0 %v3825_v5, %s3884_s10 }
 0x2d9   :  { %v3552_v10 = vpop.permute.xlu1 %3551  ;;  %v5756_v32 = vsel %vm1820_vm15, %v5700_v46, %v3538_v23  ;;  %v5760_v16 = vsel %vm1820_vm15, %v5704_v6, %v3539_v45 }
 0x2da   :  { %v3554_v25 = vunpack.i.h.bf16 %v3552_v10  ;;  %v3553_v59 = vunpack.i.l.bf16 %v3552_v10  ;;  %v3547_v39 = vpop.permute.xlu0 %3546 }
 0x2db   :  { %v3549_v60 = vunpack.i.h.bf16 %v3547_v39  ;;  %v3548_v61 = vunpack.i.l.bf16 %v3547_v39 }
 0x2dc   :  { %v2593_v63 = vsel %vm1775_vm13, %v2585_v20, %v3553_v59  ;;  %v2595_v52 = vsel %vm1775_vm13, %v2587_v54, %v3554_v25 }
 0x2dd   :  { %v3562_v21 = vpop.permute.xlu1 %3561  ;;  %v2589_v19 = vsel %vm1766_vm6, %v2581_v57, %v3548_v61  ;;  %v2590_v46 = vsel %vm1766_vm6, %v2582_v18, %v3549_v60  ;;  %vm1847_vm6 = vcmask 850944  }
 0x2de   :  { %v3564_v0 = vunpack.i.h.bf16 %v3562_v21  ;;  %v3563_v38 = vunpack.i.l.bf16 %v3562_v21  ;;  %v3557_v47 = vpop.permute.xlu0 %3556 }
 0x2df   :  { %v3559_v6 = vunpack.i.h.bf16 %v3557_v47  ;;  %v3558_v8 = vunpack.i.l.bf16 %v3557_v47 }
 0x2e0   :  { %v5767_v3 = vsel %vm1838_vm0, %v1832_v4, %v3564_v0  ;;  %v5770_v34 = vsel %vm1838_vm0, %v2639_v12, %v3563_v38 }
 0x2e1   :  { %v5772_v20 = vpop.permute.xlu1 %3571  ;;  %v2594_v54 = vsel %vm1775_vm13, %v2586_v50, %v3559_v6  ;;  %v2596_v27 = vsel %vm1775_vm13, %v2588_v62, %v3558_v8 }
 0x2e2   :  { %v3567_v9 = vpop.permute.xlu0 %3566 }
 0x2e3   :  { %v3569_v37 = vunpack.i.h.bf16 %v3567_v9  ;;  %v3568_v28 = vunpack.i.l.bf16 %v3567_v9  ;;  %v3573_v9 = vunpack.i.l.bf16 %v5772_v20 }
 0x2e5   :  { %v5776_v57 = vpop.permute.xlu1 %3581  ;;  %v5779_v18 = vsel %vm1820_vm15, %v1817_v42, %v3568_v28  ;;  %v5782_v31 = vsel %vm1820_vm15, %v1818_v40, %v3569_v37 }
 0x2e6   :  { %v5784_v55 = vpop.permute.xlu0 %3576  ;;  %v3583_v6 = vunpack.i.l.bf16 %v5776_v57 }
 0x2e9   :  { %v3592_v58 = vpop.permute.xlu1 %3591 }
 0x2ea   :  { %v3594_v30 = vunpack.i.h.bf16 %v3592_v58  ;;  %v3593_v14 = vunpack.i.l.bf16 %v3592_v58  ;;  %v3587_v17 = vpop.permute.xlu0 %3586 }
 0x2eb   :  { %v3589_v4 = vunpack.i.h.bf16 %v3587_v17  ;;  %v3588_v12 = vunpack.i.l.bf16 %v3587_v17  ;;  %v3579_v17 = vunpack.i.h.bf16 %v5784_v55 }
 0x2ec   :  { %v2601_v11 = vsel %vm1784_vm7, %v2593_v63, %v3593_v14  ;;  %v2603_v35 = vsel %vm1784_vm7, %v2595_v52, %v3594_v30  ;;  %v3574_v14 = vunpack.i.h.bf16 %v5772_v20 }
 0x2ed   :  { %v5788_v49 = vpop.permute.xlu1 %3601  ;;  %v2597_v56 = vsel %vm1775_vm13, %v2589_v19, %v3588_v12  ;;  %v2598_v50 = vsel %vm1775_vm13, %v2590_v46, %v3589_v4  ;;  %vm1856_vm13 = vcmask 916480   ;;  %v3584_v4 = vunpack.i.h.bf16 %v5776_v57 }
 0x2ee   :  { %v3597_v62 = vpop.permute.xlu0 %3596  ;;  %v1842_v12 = vsel %vm1838_vm0, %v5747_v2, %v3583_v6  ;;  %v3603_v20 = vunpack.i.l.bf16 %v5788_v49 }
 0x2ef   :  { %v3599_v36 = vunpack.i.h.bf16 %v3597_v62  ;;  %v3598_v29 = vunpack.i.l.bf16 %v3597_v62 }
 0x2f1   :  { %v5792_v51 = vpop.permute.xlu1 %3611  ;;  %v2602_v41 = vsel %vm1784_vm7, %v2594_v54, %v3599_v36  ;;  %v2604_v53 = vsel %vm1784_vm7, %v2596_v27, %v3598_v29  ;;  %v3604_v54 = vunpack.i.h.bf16 %v5788_v49  ;;  %v1830_v36 = vsel %vm1829_vm1, %v5731_v7, %v3573_v9 }
 0x2f2   :  { %v5796_v24 = vpop.permute.xlu0 %3606  ;;  %v3614_v2 = vunpack.i.h.bf16 %v5792_v51  ;;  %v2648_v7 = vsel %vm1838_vm0, %v5751_v48, %v3584_v4 }
 0x2f3   :  { %v3609_v48 = vunpack.i.h.bf16 %v5796_v24 }
 0x2f5   :  { %v5798_v15 = vpop.permute.xlu1 %3621 }
 0x2f6   :  { %v5800_v44 = vpop.permute.xlu0 %3616  ;;  %v3623_v27 = vunpack.i.l.bf16 %v5798_v15  ;;  %v3624_v49 = vunpack.i.h.bf16 %v5798_v15  ;;  %v3608_v15 = vunpack.i.l.bf16 %v5796_v24 }
 0x2f9   :  { %v3632_v33 = vpop.permute.xlu1 %3631 }
 0x2fa   :  { %v3634_v22 = vunpack.i.h.bf16 %v3632_v33  ;;  %v3633_v42 = vunpack.i.l.bf16 %v3632_v33  ;;  %v3627_v40 = vpop.permute.xlu0 %3626  ;;  %v1831_v33 = vsel %vm1829_vm1, %v5735_v13, %v3574_v14  ;;  %v2655_v13 = vsel %vm1847_vm6, %v5770_v34, %v3603_v20 }
 0x2fb   :  { %v3629_v1 = vunpack.i.h.bf16 %v3627_v40  ;;  %v3628_v26 = vunpack.i.l.bf16 %v3627_v40  ;;  %v2656_v34 = vsel %vm1847_vm6, %v2648_v7, %v3624_v49 }
 0x2fc   :  { %v5803_v5 = vsel %vm1793_vm11, %v2601_v11, %v3633_v42  ;;  %v5806_v43 = vsel %vm1793_vm11, %v2603_v35, %v3634_v22  ;;  %v3578_v35 = vunpack.i.l.bf16 %v5784_v55  ;;  %v3613_v55 = vunpack.i.l.bf16 %v5792_v51 }
 0x2fd   :  { %v5808_v45 = vpop.permute.xlu1 %3641  ;;  %v5811_v23 = vsel %vm1784_vm7, %v2597_v56, %v3628_v26  ;;  %v5814_v10 = vsel %vm1784_vm7, %v2598_v50, %v3629_v1  ;;  %vm1865_vm7 = vcmask 982016   ;;  %v1850_v56 = vsel %vm1847_vm6, %v5767_v3, %v3604_v54 }
 0x2fe   :  { %v3637_v25 = vpop.permute.xlu0 %3636  ;;  %v3644_v37 = vunpack.i.h.bf16 %v5808_v45  ;;  %v1851_v50 = vsel %vm1847_vm6, %v1842_v12, %v3623_v27  ;;  %v1834_v40 = vsel %vm1829_vm1, %v5756_v32, %v3578_v35  ;;  %v1837_v51 = vsel %vm1829_vm1, %v5760_v16, %v3579_v17 }
 0x2ff   :  { %v3639_v59 = vunpack.i.h.bf16 %v3637_v25  ;;  %v3638_v39 = vunpack.i.l.bf16 %v3637_v25  ;;  %v3619_v1 = vunpack.i.h.bf16 %v5800_v44  ;;  %v3618_v26 = vunpack.i.l.bf16 %v5800_v44 }
 0x300   :  { %v1859_v29 = vsel %vm1856_vm13, %v1850_v56, %v3644_v37  ;;  %v3643_v25 = vunpack.i.l.bf16 %v5808_v45  ;;  %v1839_v32 = vsel %vm1838_vm0, %v1830_v36, %v3613_v55  ;;  %v1840_v16 = vsel %vm1838_vm0, %v1831_v33, %v3614_v2 }
 0x301   :  { %v5816_v60 = vpop.permute.xlu1 %3651  ;;  %v5819_v61 = vsel %vm1793_vm11, %v2602_v41, %v3639_v59  ;;  %v5822_v63 = vsel %vm1793_vm11, %v2604_v53, %v3638_v39  ;;  %v1843_v27 = vsel %vm1838_vm0, %v1834_v40, %v3618_v26  ;;  %v1846_v9 = vsel %vm1838_vm0, %v1837_v51, %v3619_v1 }
 0x302   :  { %v5824_v52 = vpop.permute.xlu0 %3646  ;;  %v3653_v39 = vunpack.i.l.bf16 %v5816_v60  ;;  %v3654_v6 = vunpack.i.h.bf16 %v5816_v60 }
 0x303   :  { %v3649_v60 = vunpack.i.h.bf16 %v5824_v52 }
 0x304   :  { %v1848_v12 = vsel %vm1847_vm6, %v1839_v32, %v3653_v39  ;;  %v1849_v56 = vsel %vm1847_vm6, %v1840_v16, %v3654_v6 }
 0x305   :  { %v5826_v21 = vpop.permute.xlu1 %3661 }
 0x306   :  { %v5828_v19 = vpop.permute.xlu0 %3656  ;;  %v3663_v28 = vunpack.i.l.bf16 %v5826_v21  ;;  %v3664_v45 = vunpack.i.h.bf16 %v5826_v21  ;;  %v3648_v21 = vunpack.i.l.bf16 %v5824_v52 }
 0x307   :  { %v3658_v24 = vunpack.i.l.bf16 %v5828_v19  ;;  %v3659_v37 = vunpack.i.h.bf16 %v5828_v19 }
 0x308   :  { %v1860_v57 = vsel %vm1856_vm13, %v1851_v50, %v3663_v28 }
 0x309   :  { %v5830_v46 = vpop.permute.xlu1 %3671  ;;  %v1852_v19 = vsel %vm1847_vm6, %v1843_v27, %v3658_v24  ;;  %v1855_v36 = vsel %vm1847_vm6, %v1846_v9, %v3659_v37 }
 0x30a   :  { %v5832_v0 = vpop.permute.xlu0 %3666 }
 0x30d   :  { %v5834_v38 = vpop.permute.xlu1 %3681 }
 0x30e   :  { %v5836_v47 = vpop.permute.xlu0 %3676  ;;  %v3684_v30 = vunpack.i.h.bf16 %v5834_v38  ;;  %v3683_v44 = vunpack.i.l.bf16 %v5834_v38  ;;  %v2663_v38 = vsel %vm1856_vm13, %v2655_v13, %v3643_v25 }
 0x310   :  { %v1868_v53 = vsel %vm1865_vm7, %v1859_v29, %v3684_v30  ;;  %v2671_v35 = vsel %vm1865_vm7, %v2663_v38, %v3683_v44 }
 0x311   :  { %v5839_v8 = vpop.permute.xlu1 %3691 }
 0x312   :  { %v5846_v58 = vpop.permute.xlu0 %3686  ;;  %v3693_v30 = vunpack.i.l.bf16 %v5839_v8  ;;  %v3694_v50 = vunpack.i.h.bf16 %v5839_v8 }
 0x313   :  { %v3689_v13 = vunpack.i.h.bf16 %v5846_v58  ;;  %v3688_v25 = vunpack.i.l.bf16 %v5846_v58  ;;  %v1836_v58 = vsel %vm1829_vm1, %v5782_v31, %v3609_v48 }
 0x314   :  { %v1858_v49 = vsel %vm1856_vm13, %v1849_v56, %v3694_v50  ;;  %v1845_v27 = vsel %vm1838_vm0, %v1836_v58, %v3649_v60  ;;  %v3673_v56 = vunpack.i.l.bf16 %v5830_v46 }
 0x315   :  { %v3702_v11 = vpop.permute.xlu1 %3701 }
 0x316   :  { %v3703_v62 = vunpack.i.l.bf16 %v3702_v11  ;;  %v3697_v41 = vpop.permute.xlu0 %3696  ;;  %v3704_v28 = vunpack.i.h.bf16 %v3702_v11  ;;  %v2664_v11 = vsel %vm1856_vm13, %v2656_v34, %v3664_v45 }
 0x317   :  { %v3699_v14 = vunpack.i.h.bf16 %v3697_v41  ;;  %v3698_v17 = vunpack.i.l.bf16 %v3697_v41  ;;  %v1857_v41 = vsel %vm1856_vm13, %v1848_v12, %v3693_v30 }
 0x318   :  { %v1869_v3 = vsel %vm1865_vm7, %v1860_v57, %v3703_v62  ;;  %v5913_v20 = vsel %vm1865_vm7, %v2664_v11, %v3704_v28  ;;  %v2680_v57 = vrot.slane %v2671_v35, 7  ;;  %v1854_v28 = vsel %vm1847_vm6, %v1845_v27, %v3689_v13 }
 0x319   :  { %v5872_v22 = vpop.permute.xlu1 %3711  ;;  %v2709_v42 = vsel %vm2708_vm10, %v1868_v53, %v1869_v3  ;;  %v1861_v2 = vsel %vm1856_vm13, %v1852_v19, %v3698_v17  ;;  %v1864_v55 = vsel %vm1856_vm13, %v1855_v36, %v3699_v14  ;;  %v2685_v40 = vrot.slane %v5913_v20, 7 }
 0x31a   :  { %v5886_v59 = vpop.permute.xlu0 %3706  ;;  %v3668_v19 = vunpack.i.l.bf16 %v5832_v0  ;;  %v3674_v11 = vunpack.i.h.bf16 %v5830_v46  ;;  %v3679_v36 = vunpack.i.h.bf16 %v5836_v47 }
 0x31c   :  { %v2613_v46 = vsel %vm1793_vm11, %v5811_v23, %v3668_v19 }
 0x31d   :  { %v3722_v54 = vpop.permute.xlu1 %3721 }
 0x31e   :  { %v5901_v4 = vpop.permute.xlu0 %3716  ;;  %v3724_v39 = vunpack.i.h.bf16 %v3722_v54  ;;  %v3723_v44 = vunpack.i.l.bf16 %v3722_v54 }
 0x321   :  { %v3732_v62 = vpop.permute.xlu1 %3731 }
 0x322   :  { %v3734_v29 = vunpack.i.h.bf16 %v3732_v62  ;;  %v3733_v52 = vunpack.i.l.bf16 %v3732_v62  ;;  %v3727_v53 = vpop.permute.xlu0 %3726  ;;  %v3669_v62 = vunpack.i.h.bf16 %v5832_v0  ;;  %v2619_v0 = vsel %vm1802_vm4, %v5806_v43, %v3674_v11 }
 0x323   :  { %v3729_v3 = vunpack.i.h.bf16 %v3727_v53  ;;  %v3728_v33 = vunpack.i.l.bf16 %v3727_v53  ;;  %v3709_v53 = vunpack.i.h.bf16 %v5886_v59 }
 0x324   :  { %v1870_v8 = vsel %vm1865_vm7, %v1861_v2, %v3733_v52  ;;  %v1873_v7 = vsel %vm1865_vm7, %v1864_v55, %v3734_v29  ;;  %v3678_v29 = vunpack.i.l.bf16 %v5836_v47  ;;  %v3714_v2 = vunpack.i.h.bf16 %v5872_v22 }
 0x325   :  { %v2714_v51 = vsel %vm2684_vm12, %v1873_v7, %v2680_v57  ;;  %v5923_v1 = vpop.permute.xlu1 %3741  ;;  %v2711_v26 = vsel %vm2710_vm14, %v2709_v42, %v1870_v8  ;;  %v1866_v32 = vsel %vm1865_vm7, %v1857_v41, %v3728_v33  ;;  %v1867_v16 = vsel %vm1865_vm7, %v1858_v49, %v3729_v3 }
 0x326   :  { %v5930_v34 = vpop.permute.xlu0 %3736  ;;  %v2707_v6 = vsel %vm2706_vm9, %v1866_v32, %v1867_v16  ;;  %v2716_v24 = vsel %vm2715_vm8, %v2714_v51, %v2685_v40  ;;  %v1835_v42 = vsel %vm1829_vm1, %v5779_v18, %v3608_v15  ;;  %v1863_v18 = vsel %vm1856_vm13, %v1854_v28, %v3724_v39 }
 0x327   :  { %v1844_v45 = vsel %vm1838_vm0, %v1835_v42, %v3648_v21  ;;  %v2720_v9 = vpack.c.bf16 %v2711_v26, %v2707_v6  ;;  %v2617_v57 = vsel %vm1802_vm4, %v5803_v5, %v3673_v56  ;;  %v3708_v41 = vunpack.i.l.bf16 %v5886_v59 }
 0x328   :  { %v1853_v37 = vsel %vm1847_vm6, %v1844_v45, %v3688_v25  ;;  %v3713_v55 = vunpack.i.l.bf16 %v5872_v22  ;;  %v3719_v47 = vunpack.i.h.bf16 %v5901_v4  ;;  %v2614_v5 = vsel %vm1793_vm11, %v5814_v10, %v3669_v62 }
 0x329   :  { %v3752_v54 = vpop.permute.xlu1 %3751  ;;  %v1862_v14 = vsel %vm1856_vm13, %v1853_v37, %v3723_v44  ;;  %3206 = vmatprep.mubr.bf16.mxu1 %v2720_v9  ;;  %v2618_v33 = vsel %vm1802_vm4, %v5819_v61, %v3679_v36  ;;  %v3718_v8 = vunpack.i.l.bf16 %v5901_v4  ;;  %v3743_v22 = vunpack.i.l.bf16 %v5923_v1 }
 0x32a   :  { %v3754_v38 = vunpack.i.h.bf16 %v3752_v54  ;;  %v3753_v30 = vunpack.i.l.bf16 %v3752_v54  ;;  %v3747_v15 = vpop.permute.xlu0 %3746  ;;  %v2620_v23 = vsel %vm1802_vm4, %v5822_v63, %v3678_v29  ;;  %v3739_v43 = vunpack.i.h.bf16 %v5930_v34 }
 0x32b   :  { %v3738_v59 = vunpack.i.l.bf16 %v5930_v34  ;;  %v3744_v7 = vunpack.i.h.bf16 %v5923_v1  ;;  %v2621_v51 = vsel %vm1802_vm4, %v2613_v46, %v3708_v41  ;;  %v2625_v10 = vsel %vm1811_vm5, %v2617_v57, %v3713_v55 }
 0x32c   :  { %v1871_v31 = vsel %vm1865_vm7, %v1862_v14, %v3753_v30  ;;  %v1872_v48 = vsel %vm1865_vm7, %v1863_v18, %v3754_v38  ;;  %v2627_v61 = vsel %vm1811_vm5, %v2619_v0, %v3714_v2  ;;  %v3749_v26 = vunpack.i.h.bf16 %v3747_v15 }
 0x32d   :  { %v2713_v17 = vsel %vm2712_vm2, %v1871_v31, %v1872_v48  ;;  %v3762_v60 = vpop.permute.xlu1 %3761  ;;  %v2622_v4 = vsel %vm1802_vm4, %v2614_v5, %v3709_v53  ;;  %v2626_v13 = vsel %vm1811_vm5, %v2618_v33, %v3719_v47  ;;  %v3748_v25 = vunpack.i.l.bf16 %v3747_v15  ;;  %vm6199_vm4 = vmmov %vm6195_vm3 }
 0x32e   :  { %v2721_v21 = vpack.c.bf16 %v2716_v24, %v2713_v17  ;;  %v3757_v12 = vpop.permute.xlu0 %3756  ;;  %v3764_v63 = vunpack.i.h.bf16 %v3762_v60  ;;  %v2628_v16 = vsel %vm1811_vm5, %v2620_v23, %v3718_v8  ;;  %v2633_v39 = vsel %vm1820_vm15, %v2625_v10, %v3743_v22 }
 0x32f   :  { %v3758_v1 = vunpack.i.l.bf16 %v3757_v12  ;;  %v3763_v44 = vunpack.i.l.bf16 %v3762_v60  ;;  %v2629_v34 = vsel %vm1811_vm5, %v2621_v51, %v3738_v59  ;;  %v2630_v6 = vsel %vm1811_vm5, %v2622_v4, %v3739_v43  ;;  %vm6200_vm5 = vmmov %vm6195_vm3 }
 0x330   :  { %3207 = vmatmul.mubr.bf16.vlgmr.msra.gmra.mrb[16].mxu1 %v2721_v21  ;;  %v2635_v24 = vsel %vm1820_vm15, %v2627_v61, %v3744_v7  ;;  %v3759_v42 = vunpack.i.h.bf16 %v3757_v12  ;;  %v2634_v45 = vsel %vm1820_vm15, %v2626_v13, %v3749_v26  ;;  %v2636_v37 = vsel %vm1820_vm15, %v2628_v16, %v3748_v25 }
 0x331   :  { %v5948_v35 = vpop.permute.xlu1 %3771  ;;  %v2643_v28 = vsel %vm1829_vm1, %v2635_v24, %v3764_v63  ;;  %v2637_v18 = vsel %vm1820_vm15, %v2629_v34, %v3758_v1  ;;  %v2641_v15 = vsel %vm1829_vm1, %v2633_v39, %v3763_v44  ;;  %vm2717_vm11 = vcmask 1042432  }
 0x332   :  { %v5953_v50 = vpop.permute.xlu0 %3766  ;;  %v3774_v9 = vunpack.i.h.bf16 %v5948_v35  ;;  %v3773_v54 = vunpack.i.l.bf16 %v5948_v35  ;;  %v2638_v17 = vsel %vm1820_vm15, %v2630_v6, %v3759_v42  ;;  %vm6201_vm15 = vmmov %vm6195_vm3 }
 0x333   :  { %v3769_v27 = vunpack.i.h.bf16 %v5953_v50  ;;  %v3768_v38 = vunpack.i.l.bf16 %v5953_v50 }
 0x334   :  { %v2646_v19 = vsel %vm1829_vm1, %v2638_v17, %v3774_v9  ;;  %v2645_v11 = vsel %vm1829_vm1, %v2637_v18, %v3773_v54 }
 0x335   :  { %v5958_v52 = vpop.permute.xlu1 %3781  ;;  %v2642_v56 = vsel %vm1829_vm1, %v2634_v45, %v3769_v27  ;;  %v2644_v62 = vsel %vm1829_vm1, %v2636_v37, %v3768_v38  ;;  %vm6202_vm1 = vmmov %vm6195_vm3 }
 0x336   :  { %v3777_v3 = vpop.permute.xlu0 %3776  ;;  %v3784_v30 = vunpack.i.h.bf16 %v5958_v52  ;;  %v3783_v60 = vunpack.i.l.bf16 %v5958_v52  ;;  %vm6206_vm10 = vmmov %vm6202_vm1 }
 0x337   :  { %v3779_v31 = vunpack.i.h.bf16 %v3777_v3  ;;  %v3778_v48 = vunpack.i.l.bf16 %v3777_v3  ;;  %vm6208_vm8 = vmmov %vm6202_vm1 }
 0x338   :  { %v2650_v36 = vsel %vm1838_vm0, %v2642_v56, %v3784_v30  ;;  %v2652_v0 = vsel %vm1838_vm0, %v2644_v62, %v3783_v60  ;;  %vm6209_vm2 = vmmov %vm6202_vm1 }
 0x339   :  { %v3792_v49 = vpop.permute.xlu1 %3791  ;;  %v2649_v2 = vsel %vm1838_vm0, %v2641_v15, %v3778_v48  ;;  %v2651_v52 = vsel %vm1838_vm0, %v2643_v28, %v3779_v31 }
 0x33a   :  { %v3787_v32 = vpop.permute.xlu0 %3786  ;;  %v3794_v21 = vunpack.i.h.bf16 %v3792_v49  ;;  %v3793_v12 = vunpack.i.l.bf16 %v3792_v49 }
 0x33b   :  { %v3788_v50 = vunpack.i.l.bf16 %v3787_v32  ;;  %v3789_v29 = vunpack.i.h.bf16 %v3787_v32 }
 0x33c   :  { %v2657_v53 = vsel %vm1847_vm6, %v2649_v2, %v3793_v12  ;;  %v2659_v47 = vsel %vm1847_vm6, %v2651_v52, %v3794_v21 }
 0x33d   :  { %v3802_v58 = vpop.permute.xlu1 %3801  ;;  %v2653_v33 = vsel %vm1838_vm0, %v2645_v11, %v3788_v50  ;;  %v2654_v43 = vsel %vm1838_vm0, %v2646_v19, %v3789_v29  ;;  %vm2865_vm0 = vcmask 123904  }
 0x33e   :  { %v3797_v14 = vpop.permute.xlu0 %3796  ;;  %v3803_v57 = vunpack.i.l.bf16 %v3802_v58  ;;  %v3804_v55 = vunpack.i.h.bf16 %v3802_v58 }
 0x33f   :  { %v3799_v3 = vunpack.i.h.bf16 %v3797_v14  ;;  %v3798_v8 = vunpack.i.l.bf16 %v3797_v14 }
 0x340   :  { %v2661_v59 = vsel %vm1847_vm6, %v2653_v33, %v3803_v57  ;;  %v2662_v10 = vsel %vm1847_vm6, %v2654_v43, %v3804_v55 }
 0x341   :  { %v3812_v35 = vpop.permute.xlu1 %3811  ;;  %v2658_v13 = vsel %vm1847_vm6, %v2650_v36, %v3799_v3  ;;  %v2660_v39 = vsel %vm1847_vm6, %v2652_v0, %v3798_v8  ;;  %vm6203_vm6 = vmmov %vm6202_vm1 }
 0x342   :  { %v3807_v41 = vpop.permute.xlu0 %3806  ;;  %v3814_v25 = vunpack.i.h.bf16 %v3812_v35  ;;  %v3813_v63 = vunpack.i.l.bf16 %v3812_v35 }
 0x343   :  { %v3808_v46 = vunpack.i.l.bf16 %v3807_v41  ;;  %v3809_v22 = vunpack.i.h.bf16 %v3807_v41 }
 0x344   :  { %v2666_v28 = vsel %vm1856_vm13, %v2658_v13, %v3814_v25  ;;  %v2668_v38 = vsel %vm1856_vm13, %v2660_v39, %v3813_v63 }
 0x345   :  { %v3822_v5 = vpop.permute.xlu1 %3821  ;;  %v2665_v7 = vsel %vm1856_vm13, %v2657_v53, %v3808_v46  ;;  %v2667_v1 = vsel %vm1856_vm13, %v2659_v47, %v3809_v22 }
 0x346   :  { %v3823_v23 = vunpack.i.l.bf16 %v3822_v5  ;;  %v3817_v49 = vpop.permute.xlu0 %3816  ;;  %v3824_v51 = vunpack.i.h.bf16 %v3822_v5 }
 0x347   :  { %v3819_v61 = vunpack.i.h.bf16 %v3817_v49  ;;  %v3818_v26 = vunpack.i.l.bf16 %v3817_v49 }
 0x348   :  { %v2673_v4 = vsel %vm1865_vm7, %v2665_v7, %v3823_v23  ;;  %v2675_v42 = vsel %vm1865_vm7, %v2667_v1, %v3824_v51 }
 0x349   :  { %v2686_v32 = vrot.slane %v2673_v4, 7  ;;  %v3832_v16 = vpop.permute.xlu1 %3831  ;;  %v2669_v6 = vsel %vm1856_vm13, %v2661_v59, %v3818_v26  ;;  %v2670_v24 = vsel %vm1856_vm13, %v2662_v10, %v3819_v61  ;;  %v2695_v20 = vrot.slane %v2675_v42, 7  ;;  %vm6204_vm13 = vmmov %vm6202_vm1 }
 0x34a   :  { %v3834_v44 = vunpack.i.h.bf16 %v3832_v16  ;;  %v3833_v34 = vunpack.i.l.bf16 %v3832_v16  ;;  %v3827_v58 = vpop.permute.xlu0 %3826 }
 0x34b   :  { %v2687_v45 = vsel %vm2684_vm12, %v2685_v40, %v2686_v32  ;;  %v3829_v27 = vunpack.i.h.bf16 %v3827_v58  ;;  %v3828_v9 = vunpack.i.l.bf16 %v3827_v58 }
 0x34c   :  { %v2677_v54 = vsel %vm1865_vm7, %v2669_v6, %v3833_v34  ;;  %v2678_v37 = vsel %vm1865_vm7, %v2670_v24, %v3834_v44 }
 0x34d   :  { %v2701_v30 = vrot.slane %v2677_v54, 7  ;;  %v2702_v14 = vrot.slane %v2678_v37, 7  ;;  %v2674_v18 = vsel %vm1865_vm7, %v2666_v28, %v3829_v27  ;;  %v2676_v15 = vsel %vm1865_vm7, %v2668_v38, %v3828_v9  ;;  %vm6205_vm7 = vmmov %vm6202_vm1 }
 0x34e   :  { %v2691_v31 = vrot.slane %v2674_v18, 7  ;;  %v2696_v40 = vrot.slane %v2676_v15, 7 }
 0x34f   :  { %v2703_v48 = vsel %vm2684_vm12, %v2701_v30, %v2702_v14 }
 0x350   :  { %v2697_v17 = vsel %vm2684_vm12, %v2695_v20, %v2696_v40  ;;  %v2718_v60 = vsel %vm2717_vm11, %v2687_v45, %v2691_v31  ;;  %v2723_v35 = vpack.c.bf16 %v2703_v48, %v2703_v48 }
 0x351   :  { %v2719_v21 = vsel %vm2706_vm9, %v2697_v17, %v2701_v30  ;;  %vm6207_vm9 = vmmov %vm6202_vm1 }
 0x352   :  { %v2722_v12 = vpack.c.bf16 %v2719_v21, %v2718_v60 }
 0x354   :  { %3210 = vmatprep.mubr.bf16.mxu1 %v2722_v12 }
 0x355   :  { %3211 = vmatmul.mubr.bf16.gmra.mrb[20].mxu1 %v2723_v35  ;;  %v2965_v35 = vld [vmem:[%s6097_s7] sm:$0xff] }
 0x403   :  { %v3208_v56 = vpop.f32.mrb[16].mxu1 }
 0x404   :  { %v2822_v19 = vpop.f32.mrb[17].mxu1  ;;  %v2857_v57 = vsel %vm6201_vm15, %v3208_v56, 0.0 }
 0x405   :  { %v3209_v11 = vpop.f32.mrb[18].mxu1  ;;  %v2854_v62 = vsel %vm6199_vm4, %v2822_v19, 0.0 }
 0x406   :  { %v2825_v50 = vpop.f32.mrb[19].mxu1  ;;  %v2859_v2 = vsel %vm6195_vm3, %v3209_v11, 0.0 }
 0x407   :  { %v2855_v36 = vsel %vm6200_vm5, %v2825_v50, 0.0 }
 0x408   :  { %v2856_v29 = vadd.f32 %v2855_v36, %v2854_v62  ;;  %v2995_v62 = vrot.slane %v2965_v35, 7 }
 0x40a   :  { %v2858_v41 = vadd.f32 %v2857_v57, %v2856_v29 }
 0x40c   :  { %v2860_v52 = vadd.f32 %v2859_v2, %v2858_v41 }
 0x428   :  { %v3212_v55 = vpop.f32.mrb[20].mxu1 }
 0x429   :  { %v2838_v46 = vpop.f32.mrb[21].mxu1  ;;  %v2866_v8 = vsel %vm2865_vm0, %v3212_v55, 0.0 }
 0x42a   :  { %v2861_v0 = vsel %vm6202_vm1, %v2838_v46, 0.0  ;;  %v3213_v53 = vpop.f32.mrb[22].mxu1 }
 0x42b   :  { %v2862_v47 = vadd.f32 %v2861_v0, %v2860_v52  ;;  %v2841_v3 = vpop.f32.mrb[23].mxu1  ;;  %v3108_v0 = vld [vmem:[%s6099_s6] ss:$0 sm:$0xff] }
 0x42c   :  { %v2863_v5 = vsel %vm6203_vm6, %v2841_v3, 0.0  ;;  %vm6210_vm6 = vmmov %vm6209_vm2 }
 0x42d   :  { %v2864_v33 = vadd.f32 %v2863_v5, %v2862_v47 }
 0x42f   :  { %v2867_v22 = vadd.f32 %v2866_v8, %v2864_v33 }
 0x431   :  { %v2868_v23 = vrot.slane %v2867_v22, 4 }
 0x433   :  { %v2869_v43 = vadd.f32 %v2868_v23, %v2867_v22 }
 0x435   :  { %v2870_v59 = vrot.slane %v2869_v43, 2 }
 0x437   :  { %v2871_v7 = vadd.f32 %v2870_v59, %v2869_v43 }
 0x439   :  { %v2872_v49 = vrot.slane %v2871_v7, 1 }
 0x43b   :  { %v2873_v51 = vadd.f32 %v2872_v49, %v2871_v7 }
 0x43d   :  { %v2874_v10 = vmul.f32 0.02, %v2873_v51 }
 0x43f   :  { %v2875_v61 = vsub.f32 %v2822_v19, %v2874_v10  ;;  %v2876_v26 = vsub.f32 %v2825_v50, %v2874_v10  ;;  %v2877_v4 = vsub.f32 %v3208_v56, %v2874_v10  ;;  %v2878_v13 = vsub.f32 %v3209_v11, %v2874_v10  ;;  %v2966_v56 = vld [vmem:[%s6097_s7 + $0x8] sm:$0xff]  ;;  %v2967_v19 = vld [vmem:[%s6097_s7 + $0x10] sm:$0xff]  ;;  %v2968_v11 = vld [vmem:[%s6097_s7 + $0x18] sm:$0x1] }
 0x440   :  { %v2879_v25 = vsub.f32 %v2838_v46, %v2874_v10  ;;  %v2880_v63 = vsub.f32 %v2841_v3, %v2874_v10  ;;  %v2881_v32 = vsub.f32 %v3212_v55, %v2874_v10  ;;  %v3107_v50 = vld [vmem:[%s6098_s5] ss:$0 sm:$0xff]  ;;  %v2996_v36 = vrot.slane %v2966_v56, 7 }
 0x441   :  { %v2882_v16 = vmul.f32 %v2875_v61, %v2875_v61  ;;  %v2883_v39 = vmul.f32 %v2876_v26, %v2876_v26  ;;  %v2884_v1 = vmul.f32 %v2877_v4, %v2877_v4  ;;  %v2885_v44 = vmul.f32 %v2878_v13, %v2878_v13 }
 0x442   :  { %v2886_v42 = vmul.f32 %v2879_v25, %v2879_v25  ;;  %v2887_v27 = vmul.f32 %v2880_v63, %v2880_v63  ;;  %v2888_v37 = vmul.f32 %v2881_v32, %v2881_v32  ;;  %v2998_v29 = vrot.slane %v2967_v19, 7 }
 0x443   :  { %v2889_v34 = vsel %vm6204_vm13, %v2882_v16, 0.0  ;;  %v2890_v6 = vsel %vm6205_vm7, %v2883_v39, 0.0  ;;  %v2892_v58 = vsel %vm6206_vm10, %v2884_v1, 0.0  ;;  %v2894_v9 = vsel %vm6207_vm9, %v2885_v44, 0.0  ;;  %vm6211_vm13 = vmmov %vm6209_vm2 }
 0x444   :  { %v2891_v24 = vadd.f32 %v2890_v6, %v2889_v34  ;;  %v2896_v28 = vsel %vm6208_vm8, %v2886_v42, 0.0  ;;  %v2898_v30 = vsel %vm6209_vm2, %v2887_v27, 0.0  ;;  %v2900_v18 = vsel %vm2865_vm0, %v2888_v37, 0.0  ;;  %vm6212_vm7 = vmmov %vm6209_vm2 }
 0x445   :  { %v3000_v57 = vrot.slane %v2968_v11, 7  ;;  %v2919_v41 = vmul.f32 %v3107_v50, %v2879_v25  ;;  %v2920_v2 = vmul.f32 %v3107_v50, %v2880_v63  ;;  %v2915_v52 = vmul.f32 %v3107_v50, %v2875_v61  ;;  %vm6213_vm9 = vmmov %vm6209_vm2 }
 0x446   :  { %v2893_v45 = vadd.f32 %v2892_v58, %v2891_v24  ;;  %v2916_v55 = vmul.f32 %v3107_v50, %v2876_v26  ;;  %v2921_v53 = vmul.f32 %v3107_v50, %v2881_v32  ;;  %v2917_v47 = vmul.f32 %v3107_v50, %v2877_v4  ;;  %vm6214_vm8 = vmmov %vm6209_vm2 }
 0x447   :  { %v2918_v3 = vmul.f32 %v3107_v50, %v2878_v13  ;;  %v2997_v5 = vsel %vm2684_vm12, %v2995_v62, %v2996_v36  ;;  %v2999_v49 = vsel %vm2684_vm12, %v2996_v36, %v2998_v29  ;;  %v3001_v4 = vsel %vm2684_vm12, %v2998_v29, %v3000_v57 }
 0x448   :  { %v2895_v54 = vadd.f32 %v2894_v9, %v2893_v45  ;;  %vm2978_vm10 = vcmask 122880  }
 0x44a   :  { %v2897_v38 = vadd.f32 %v2896_v28, %v2895_v54 }
 0x44c   :  { %v2899_v14 = vadd.f32 %v2898_v30, %v2897_v38 }
 0x44e   :  { %v2901_v15 = vadd.f32 %v2900_v18, %v2899_v14 }
 0x450   :  { %v2902_v20 = vrot.slane %v2901_v15, 4 }
 0x452   :  { %v2903_v31 = vadd.f32 %v2902_v20, %v2901_v15 }
 0x454   :  { %v2904_v40 = vrot.slane %v2903_v31, 2 }
 0x456   :  { %v2905_v48 = vadd.f32 %v2904_v40, %v2903_v31 }
 0x458   :  { %v2906_v17 = vrot.slane %v2905_v48, 1 }
 0x45a   :  { %v2907_v60 = vadd.f32 %v2906_v17, %v2905_v48 }
 0x45c   :  { %v2908_v21 = vmul.f32 0.02, %v2907_v60 }
 0x45e   :  { %v2922_v12 = vadd.f32 1e-05, %v2908_v21 }
 0x460   :  { %3868 = vrsqrt.f32 %v2922_v12 }
 0x46a   :  { %v3869_v46 = vpop.eup %3868 }
 0x46b   :  { %v2928_v33 = vmul.f32 %v3869_v46, %v2919_v41  ;;  %v2929_v8 = vmul.f32 %v3869_v46, %v2920_v2  ;;  %v2924_v22 = vmul.f32 %v3869_v46, %v2915_v52  ;;  %v2925_v23 = vmul.f32 %v3869_v46, %v2916_v55 }
 0x46c   :  { %v2926_v43 = vmul.f32 %v3869_v46, %v2917_v47  ;;  %v2927_v59 = vmul.f32 %v3869_v46, %v2918_v3  ;;  %v2930_v7 = vmul.f32 %v3869_v46, %v2921_v53 }
 0x46d   :  { %v2941_v51 = vadd.f32 %v3108_v0, %v2928_v33  ;;  %v2942_v10 = vadd.f32 %v3108_v0, %v2929_v8  ;;  %v2937_v61 = vadd.f32 %v3108_v0, %v2924_v22  ;;  %v2938_v26 = vadd.f32 %v3108_v0, %v2925_v23 }
 0x46e   :  { %v2939_v25 = vadd.f32 %v3108_v0, %v2926_v43  ;;  %v2940_v63 = vadd.f32 %v3108_v0, %v2927_v59  ;;  %v2943_v32 = vadd.f32 %v3108_v0, %v2930_v7 }
 0x46f   :  { %vm2949_vm11 = vcmp.ge.f32.partialorder %v2942_v10, 0.0  ;;  %v2956_v13 = vmul.f32 0.2, %v2942_v10  ;;  %vm2944_vm4 = vcmp.ge.f32.partialorder %v2937_v61, 0.0  ;;  %vm2945_vm5 = vcmp.ge.f32.partialorder %v2938_v26, 0.0 }
 0x470   :  { %vm2946_vm15 = vcmp.ge.f32.partialorder %v2939_v25, 0.0  ;;  %vm2947_vm3 = vcmp.ge.f32.partialorder %v2940_v63, 0.0  ;;  %v2951_v16 = vmul.f32 0.2, %v2937_v61  ;;  %v2952_v39 = vmul.f32 0.2, %v2938_v26 }
 0x471   :  { %v2963_v1 = vsel %vm2949_vm11, %v2942_v10, %v2956_v13  ;;  %v2953_v44 = vmul.f32 0.2, %v2939_v25  ;;  %v2954_v34 = vmul.f32 0.2, %v2940_v63  ;;  %vm2948_vm1 = vcmp.ge.f32.partialorder %v2941_v51, 0.0 }
 0x472   :  { %v2958_v6 = vsel %vm2944_vm4, %v2937_v61, %v2951_v16  ;;  %v2959_v24 = vsel %vm2945_vm5, %v2938_v26, %v2952_v39  ;;  %vm2950_vm0 = vcmp.ge.f32.partialorder %v2943_v32, 0.0  ;;  %v2955_v42 = vmul.f32 0.2, %v2941_v51 }
 0x473   :  { %v2960_v58 = vsel %vm2946_vm15, %v2939_v25, %v2953_v44  ;;  %v2961_v45 = vsel %vm2947_vm3, %v2940_v63, %v2954_v34  ;;  %v2969_v27 = vmul.f32 %v2965_v35, %v2958_v6  ;;  %v2970_v9 = vmul.f32 %v2966_v56, %v2959_v24 }
 0x474   :  { %v2971_v54 = vmul.f32 %v2967_v19, %v2960_v58  ;;  %v2972_v37 = vmul.f32 %v2968_v11, %v2961_v45  ;;  %v3006_v28 = vmul.f32 %v2995_v62, %v2961_v45  ;;  %v2957_v38 = vmul.f32 0.2, %v2943_v32 }
 0x475   :  { %v2973_v30 = vsel %vm6210_vm6, %v2969_v27, 0.0  ;;  %v2974_v14 = vsel %vm6211_vm13, %v2970_v9, 0.0  ;;  %v2962_v18 = vsel %vm2948_vm1, %v2941_v51, %v2955_v42  ;;  %v3008_v15 = vmul.f32 %v2999_v49, %v2963_v1 }
 0x476   :  { %v2975_v20 = vadd.f32 %v2974_v14, %v2973_v30  ;;  %v2976_v31 = vsel %vm6212_vm7, %v2971_v54, 0.0  ;;  %v3014_v40 = vrot.slane %v3006_v28, 1  ;;  %v2964_v48 = vsel %vm2950_vm0, %v2943_v32, %v2957_v38 }
 0x477   :  { %v3007_v17 = vmul.f32 %v2997_v5, %v2962_v18  ;;  %v3017_v60 = vrot.slane %v3008_v15, 1  ;;  %v3009_v12 = vmul.f32 %v3001_v4, %v2964_v48  ;;  %v2979_v35 = vsel %vm2978_vm10, %v2972_v37, 0.0 }
 0x478   :  { %v2977_v21 = vadd.f32 %v2976_v31, %v2975_v20  ;;  %v3044_v10 = vstv %s6100_s8 }
 0x479   :  { %v3015_v56 = vrot.slane %v3007_v17, 1  ;;  %v3019_v11 = vrot.slane %v3009_v12, 1 }
 0x47a   :  { %v2980_v19 = vadd.f32 %v2979_v35, %v2977_v21 }
 0x47b   :  { %v3016_v50 = vsel %vm2710_vm14, %v3014_v40, %v3015_v56  ;;  %v3018_v62 = vsel %vm2710_vm14, %v3015_v56, %v3017_v60  ;;  %v3020_v36 = vsel %vm2710_vm14, %v3017_v60, %v3019_v11  ;;  %v3030_v55 = vsel %vm2978_vm10, %v3019_v11, 0.0 }
 0x47c   :  { %2981 = vadd.xlane.f32.xlu0 %v2980_v19  ;;  %v3025_v29 = vsel %vm6213_vm9, %v3016_v50, 0.0  ;;  %v3026_v57 = vsel %vm6214_vm8, %v3018_v62, 0.0  ;;  %v3028_v2 = vsel %vm6209_vm2, %v3020_v36, 0.0  ;;  %vm3046_vm14 = vcmask 1024  }
 0x47d   :  { %v3027_v41 = vadd.f32 %v3026_v57, %v3025_v29 }
 0x47f   :  { %v3029_v52 = vadd.f32 %v3028_v2, %v3027_v41 }
 0x481   :  { %v3031_v46 = vadd.f32 %v3030_v55, %v3029_v52 }
 0x483   :  { %3032 = vadd.xlane.f32.xlu1 %v3031_v46 }
 0x509   :  { %v2982_v0 = vpop.xlane.xlu0 %2981 }
 0x50a   :  { %v2983_v53 = vrot.slane %v2982_v0, 4 }
 0x50c   :  { %v2984_v47 = vadd.f32 %v2983_v53, %v2982_v0 }
 0x50e   :  { %v2985_v3 = vrot.slane %v2984_v47, 2 }
 0x510   :  { %v3033_v5 = vpop.xlane.xlu1 %3032  ;;  %v2986_v33 = vadd.f32 %v2985_v3, %v2984_v47 }
 0x511   :  { %v3034_v8 = vrot.slane %v3033_v5, 4 }
 0x512   :  { %v2987_v22 = vrot.slane %v2986_v33, 1 }
 0x513   :  { %v3035_v23 = vadd.f32 %v3034_v8, %v3033_v5 }
 0x514   :  { %v2988_v43 = vadd.f32 %v2987_v22, %v2986_v33 }
 0x515   :  { %v3036_v59 = vrot.slane %v3035_v23, 2 }
 0x516   :  { %3216 = vpush %v2988_v43 }
 0x517   :  { %v3037_v7 = vadd.f32 %v3036_v59, %v3035_v23 }
 0x519   :  { %v3038_v49 = vrot.slane %v3037_v7, 1 }
 0x51b   :  { %v3039_v51 = vadd.f32 %v3038_v49, %v3037_v7 }
 0x51d   :  { %3218 = vpush %v3039_v51 }
 0x547   :  { %s3217_s5 = spop %3216 }
 0x548   :  { %v2990_v61 = vstv %s3217_s5 }
 0x54e   :  { %s3219_s6 = spop %3218 }
 0x54f   :  { %v3041_v26 = vstv %s3219_s6 }
 0x550   :  { %v3042_v25 = vsel %vm2684_vm12, %v2990_v61, %v3041_v26 }
 0x551   :  { %v3045_v63 = vadd.f32 %v3044_v10, %v3042_v25 }
 0x553   :  { %3047 = vst.msk [vmem:[%s6101_s9] sm:$0x3] %vm3046_vm14, %v3045_v63 }

</bundles_post_ra>
